<compile_context>
chip_gen: v5e
topology: v5e:2x2
jax: 0.10.0
libtpu: 0.0.40
codegen_flags: <defaults>
</compile_context>

<pallas_src>
import functools
import math

import jax
import jax.numpy as jnp
import numpy as np
from jax.experimental import pallas as pl
from jax.experimental.pallas import tpu as pltpu

TB = 8  # samples per grid step; batch is zero-padded to a multiple of TB


# ----------------------------------------------------------------------------
# Fused forward kernel (one batch tile of TB samples per grid step)
# ----------------------------------------------------------------------------
def _lenet5c_kernel(x_ref, a1_ref, b1_ref, p1h_ref, pw1_ref,
                    a2_ref, b2_ref, p2h_ref, pw2_ref,
                    p3h_ref, t3w_ref, sel_ref,
                    wf1_ref, bf1_ref, wf2_ref, bf2_ref, wf3_ref, bf3_ref,
                    o_ref, *, tb):
    f32 = jnp.float32
    n1 = tb * 32 - 4            # conv1 output rows (sample-row flattened)
    n2 = tb * 14 - 4            # conv2 output rows

    # conv1 5x5 valid (3->6) + bias + ReLU: 5 row-shifted band matmuls.
    # Rows r = s*32 + h (h<=27 valid per sample); lanes = w*6 + oc.
    y = jnp.dot(x_ref[pl.ds(0, n1), :], a1_ref[0], preferred_element_type=f32)
    for i in range(1, 5):
        y = y + jnp.dot(x_ref[pl.ds(i, n1), :], a1_ref[i],
                        preferred_element_type=f32)
    y = jnp.maximum(y + b1_ref[...], 0.0)

    # avg_pool1 2x2/2: row average via block-diag matrix, col average via
    # kron(avg, I6).  -> rows s*14 + h, lanes w*6 + c   (tb*14, 84)
    y = jnp.dot(p1h_ref[...], y, preferred_element_type=f32)
    y = jnp.dot(y, pw1_ref[...], preferred_element_type=f32)

    # conv2 5x5 valid (6->16) + bias + ReLU  -> (tb*14-4, 160)
    z = jnp.dot(y[0:n2, :], a2_ref[0], preferred_element_type=f32)
    for i in range(1, 5):
        z = z + jnp.dot(y[i:i + n2, :], a2_ref[i], preferred_element_type=f32)
    z = jnp.maximum(z + b2_ref[...], 0.0)

    # avg_pool2 2x2/2  -> rows s*5 + h, lanes w*16 + c   (tb*5, 80)
    z = jnp.dot(p2h_ref[...], z, preferred_element_type=f32)
    z = jnp.dot(z, pw2_ref[...], preferred_element_type=f32)

    # avg_pool3 3x3 stride 1 pad 1 (count_include_pad -> divisor 9)
    z = jnp.dot(p3h_ref[...], z, preferred_element_type=f32)
    z = jnp.dot(z, t3w_ref[...], preferred_element_type=f32)

    # fc1 + ReLU: the NCHW flatten is folded into per-spatial-row sample
    # selection (sel) and column-permuted fc1 weights (padded 120->128).
    h = jnp.zeros((tb, 128), f32)
    for r in range(5):
        rows = jnp.dot(sel_ref[r], z, preferred_element_type=f32)      # (tb,80)
        h = h + jnp.dot(rows, wf1_ref[r], preferred_element_type=f32)  # (tb,128)
    h = jnp.maximum(h + bf1_ref[...], 0.0)

    # fc2 + ReLU, fc3
    h = jnp.maximum(jnp.dot(h, wf2_ref[...], preferred_element_type=f32)
                    + bf2_ref[...], 0.0)
    out = jnp.dot(h, wf3_ref[...], preferred_element_type=f32) + bf3_ref[...]
    o_ref[...] = out.astype(o_ref.dtype)


# ----------------------------------------------------------------------------
# One-time parameter preparation (all reshapes/permutes/padding hoisted here)
# ----------------------------------------------------------------------------
def prepare_params(params, tb=TB):
    f32 = jnp.float32

    def band_placement(width_out, width_in):
        p = np.zeros((5, width_in, width_out), np.float32)
        for j in range(5):
            p[j, np.arange(width_out) + j, np.arange(width_out)] = 1.0
        return jnp.asarray(p)

    # conv1 band matrices A1[i]: (96, 168) with A1[i][(w+j)*3+c, w*6+oc] = W[oc,c,i,j]
    w1 = params["conv1_w"].astype(f32).transpose(2, 3, 1, 0)          # (i,j,c,oc)
    a1 = jnp.einsum("jyw,ijco->iycwo", band_placement(28, 32), w1)
    a1 = a1.reshape(5, 32 * 3, 28 * 6)
    b1 = jnp.tile(params["conv1_b"].astype(f32), 28).reshape(1, 168)

    # conv2 band matrices A2[i]: (84, 160)
    w2 = params["conv2_w"].astype(f32).transpose(2, 3, 1, 0)          # (i,j,c,oc)
    a2 = jnp.einsum("jyw,ijco->iycwo", band_placement(10, 14), w2)
    a2 = a2.reshape(5, 14 * 6, 10 * 16)
    b2 = jnp.tile(params["conv2_b"].astype(f32), 10).reshape(1, 160)

    def row_pool(tb_, in_rows, out_rows, total_cols):
        m = np.zeros((tb_ * out_rows, total_cols), np.float32)
        for s in range(tb_):
            for r in range(out_rows):
                m[s * out_rows + r, s * in_rows + 2 * r] = 0.5
                m[s * out_rows + r, s * in_rows + 2 * r + 1] = 0.5
        return jnp.asarray(m)

    def col_pool(w_in, chans):
        sp = np.zeros((w_in, w_in // 2), np.float32)
        sp[2 * np.arange(w_in // 2), np.arange(w_in // 2)] = 0.5
        sp[2 * np.arange(w_in // 2) + 1, np.arange(w_in // 2)] = 0.5
        return jnp.asarray(np.kron(sp, np.eye(chans, dtype=np.float32)))

    p1h = row_pool(tb, 32, 14, tb * 32 - 4)          # (tb*14, tb*32-4)
    pw1 = col_pool(28, 6)                            # (168, 84)
    p2h = row_pool(tb, 14, 5, tb * 14 - 4)           # (tb*5, tb*14-4)
    pw2 = col_pool(10, 16)                           # (160, 80)

    band5 = (np.abs(np.arange(5)[:, None] - np.arange(5)[None, :]) <= 1)
    band5 = band5.astype(np.float32)
    p3h = jnp.asarray(np.kron(np.eye(tb, dtype=np.float32), band5 / 9.0))
    t3w = jnp.asarray(np.kron(band5, np.eye(16, dtype=np.float32)))   # (80, 80)

    sel = np.zeros((5, tb, tb * 5), np.float32)
    for r in range(5):
        sel[r, np.arange(tb), np.arange(tb) * 5 + r] = 1.0
    sel = jnp.asarray(sel)

    # fc1: permute columns from torch's (c,h,w) flatten to our (h, w*16+c),
    # split per spatial row, pad out dim 120 -> 128 with zeros.
    wf1 = params["fc1_w"].astype(f32).reshape(120, 16, 5, 5)
    wf1 = wf1.transpose(2, 3, 1, 0).reshape(5, 80, 120)
    wf1 = jnp.pad(wf1, ((0, 0), (0, 0), (0, 8)))
    bf1 = jnp.pad(params["fc1_b"].astype(f32), (0, 8)).reshape(1, 128)

    wf2 = jnp.pad(params["fc2_w"].astype(f32).T, ((0, 8), (0, 44)))   # (128,128)
    bf2 = jnp.pad(params["fc2_b"].astype(f32), (0, 44)).reshape(1, 128)
    wf3 = jnp.pad(params["fc3_w"].astype(f32).T, ((0, 44), (0, 0)))   # (128,10)
    bf3 = params["fc3_b"].astype(f32).reshape(1, 10)

    return dict(a1=a1, b1=b1, p1h=p1h, pw1=pw1, a2=a2, b2=b2, p2h=p2h,
                pw2=pw2, p3h=p3h, t3w=t3w, sel=sel,
                wf1=wf1, bf1=bf1, wf2=wf2, bf2=bf2, wf3=wf3, bf3=bf3)


# ----------------------------------------------------------------------------
# Forward wrapper
# ----------------------------------------------------------------------------
def lenet5c_forward(prep, x):
    """x: (B, 3, 32, 32) NCHW f32 -> logits (B, 10) f32."""
    B = x.shape[0]
    bpad = ((B + TB - 1) // TB) * TB
    # Single cheap layout op: NCHW -> per-sample (H=32 rows, W*C=96 lanes).
    xr = jnp.transpose(x, (0, 2, 3, 1)).reshape(B, 32, 96).astype(jnp.float32)
    if bpad != B:
        xr = jnp.concatenate(
            [xr, jnp.zeros((bpad - B, 32, 96), xr.dtype)], axis=0)
    xr = xr.reshape(bpad * 32, 96)
    grid = (bpad // TB,)

    w_args = (prep["a1"], prep["b1"], prep["p1h"], prep["pw1"],
              prep["a2"], prep["b2"], prep["p2h"], prep["pw2"],
              prep["p3h"], prep["t3w"], prep["sel"],
              prep["wf1"], prep["bf1"], prep["wf2"], prep["bf2"],
              prep["wf3"], prep["bf3"])

    def whole(a):
        return pl.BlockSpec(a.shape, lambda i, _nd=a.ndim: (0,) * _nd)

    n1 = TB * 32 - 4
    n2 = TB * 14 - 4
    flops_step = 2 * (5 * n1 * 96 * 168
                      + TB * 14 * n1 * 168 + TB * 14 * 168 * 84
                      + 5 * n2 * 84 * 160
                      + TB * 5 * n2 * 160 + TB * 5 * 160 * 80
                      + TB * 5 * TB * 5 * 80 + TB * 5 * 80 * 80
                      + 5 * (TB * TB * 5 * 80 + TB * 80 * 128)
                      + TB * 128 * 128 + TB * 128 * 10)
    wbytes = 4 * sum(int(np.prod(a.shape)) for a in w_args)
    cost = pl.CostEstimate(
        flops=int(grid[0]) * int(flops_step),
        transcendentals=0,
        bytes_accessed=int(xr.size) * 4 + int(bpad) * 10 * 4 + wbytes)

    out = pl.pallas_call(
        functools.partial(_lenet5c_kernel, tb=TB),
        out_shape=jax.ShapeDtypeStruct((bpad, 10), jnp.float32),
        grid=grid,
        in_specs=[pl.BlockSpec((TB * 32, 96), lambda i: (i, 0))]     # batch tile
                 + [whole(a) for a in w_args],                       # resident
        out_specs=pl.BlockSpec((TB, 10), lambda i: (i, 0)),
        compiler_params=pltpu.CompilerParams(
            dimension_semantics=("parallel",)),
        cost_estimate=cost,
    )(xr, *w_args)
    return out[:B]


# ----------------------------------------------------------------------------
# Init (matches PyTorch kaiming_uniform_/zeros) and pure-JAX reference
# ----------------------------------------------------------------------------
def init_params(key):
    def kaiming_uniform(k, shape, fan_in):
        bound = math.sqrt(2.0) * math.sqrt(3.0 / fan_in)
        return jax.random.uniform(k, shape, jnp.float32, -bound, bound)

    ks = jax.random.split(key, 5)
    return {
        "conv1_w": kaiming_uniform(ks[0], (6, 3, 5, 5), 3 * 5 * 5),
        "conv1_b": jnp.zeros((6,), jnp.float32),
        "conv2_w": kaiming_uniform(ks[1], (16, 6, 5, 5), 6 * 5 * 5),
        "conv2_b": jnp.zeros((16,), jnp.float32),
        "fc1_w": kaiming_uniform(ks[2], (120, 400), 400),
        "fc1_b": jnp.zeros((120,), jnp.float32),
        "fc2_w": kaiming_uniform(ks[3], (84, 120), 120),
        "fc2_b": jnp.zeros((84,), jnp.float32),
        "fc3_w": kaiming_uniform(ks[4], (10, 84), 84),
        "fc3_b": jnp.zeros((10,), jnp.float32),
    }


def reference_forward(params, x):
    dn1 = jax.lax.conv_dimension_numbers(x.shape, params["conv1_w"].shape,
                                         ("NCHW", "OIHW", "NCHW"))
    y = jax.lax.conv_general_dilated(x, params["conv1_w"], (1, 1), "VALID",
                                     dimension_numbers=dn1)
    y = jnp.maximum(y + params["conv1_b"][None, :, None, None], 0.0)
    y = y.reshape(y.shape[0], y.shape[1], 14, 2, 14, 2).mean(axis=(3, 5))
    dn2 = jax.lax.conv_dimension_numbers(y.shape, params["conv2_w"].shape,
                                         ("NCHW", "OIHW", "NCHW"))
    y = jax.lax.conv_general_dilated(y, params["conv2_w"], (1, 1), "VALID",
                                     dimension_numbers=dn2)
    y = jnp.maximum(y + params["conv2_b"][None, :, None, None], 0.0)
    y = y.reshape(y.shape[0], y.shape[1], 5, 2, 5, 2).mean(axis=(3, 5))
    yp = jnp.pad(y, ((0, 0), (0, 0), (1, 1), (1, 1)))
    acc = jnp.zeros_like(y)
    for di in range(3):
        for dj in range(3):
            acc = acc + yp[:, :, di:di + 5, dj:dj + 5]
    y = acc / 9.0
    f = y.reshape(y.shape[0], -1)
    f = jnp.maximum(f @ params["fc1_w"].T + params["fc1_b"], 0.0)
    f = jnp.maximum(f @ params["fc2_w"].T + params["fc2_b"], 0.0)
    return f @ params["fc3_w"].T + params["fc3_b"]


if __name__ == "__main__":
    key = jax.random.PRNGKey(0)
    pkey, xkey = jax.random.split(key)
    params = init_params(pkey)
    prep = prepare_params(params)              # one-time weight preparation
    x = jax.random.normal(xkey, (2, 3, 32, 32), dtype=jnp.float32)

    logits = jax.jit(lenet5c_forward)(prep, x)
    jax.block_until_ready(logits)
    assert logits.shape == (2, 10)
    assert bool(jnp.all(jnp.isfinite(logits)))

    ref = reference_forward(params, x)
    err = float(jnp.max(jnp.abs(logits - ref)))
    scale = float(jnp.max(jnp.abs(ref))) + 1e-6
    assert err <= 0.05 * scale + 1e-3, f"mismatch vs reference: {err} / {scale}"
    print("KERNEL_OK")
</pallas_src>

<mosaic_0001>
module attributes {stable_mosaic.version = 11 : i64} {
  func.func @_lenet5c_kernel(%arg0: i32, %arg1: memref<256x96xf32, #tpu.memory_space<vmem>>, %arg2: memref<5x96x168xf32, #tpu.memory_space<vmem>>, %arg3: memref<1x168xf32, #tpu.memory_space<vmem>>, %arg4: memref<112x252xf32, #tpu.memory_space<vmem>>, %arg5: memref<168x84xf32, #tpu.memory_space<vmem>>, %arg6: memref<5x84x160xf32, #tpu.memory_space<vmem>>, %arg7: memref<1x160xf32, #tpu.memory_space<vmem>>, %arg8: memref<40x108xf32, #tpu.memory_space<vmem>>, %arg9: memref<160x80xf32, #tpu.memory_space<vmem>>, %arg10: memref<40x40xf32, #tpu.memory_space<vmem>>, %arg11: memref<80x80xf32, #tpu.memory_space<vmem>>, %arg12: memref<5x8x40xf32, #tpu.memory_space<vmem>>, %arg13: memref<5x80x128xf32, #tpu.memory_space<vmem>>, %arg14: memref<1x128xf32, #tpu.memory_space<vmem>>, %arg15: memref<128x128xf32, #tpu.memory_space<vmem>>, %arg16: memref<1x128xf32, #tpu.memory_space<vmem>>, %arg17: memref<128x10xf32, #tpu.memory_space<vmem>>, %arg18: memref<1x10xf32, #tpu.memory_space<vmem>>, %arg19: memref<8x10xf32, #tpu.memory_space<vmem>>) attributes {dimension_semantics = [#tpu.dimension_semantics<parallel>], iteration_bounds = array<i64: 1>, scalar_prefetch = 0 : i64, scratch_operands = 0 : i64, tpu.core_type = #tpu.core_type<tc>, window_params = [{transform_indices = @transform_0, window_bounds = array<i64: 256, 96>}, {pipeline_mode = #tpu.pipeline_mode<synchronous>, transform_indices = @transform_1, window_bounds = array<i64: 5, 96, 168>}, {pipeline_mode = #tpu.pipeline_mode<synchronous>, transform_indices = @transform_2, window_bounds = array<i64: 1, 168>}, {pipeline_mode = #tpu.pipeline_mode<synchronous>, transform_indices = @transform_3, window_bounds = array<i64: 112, 252>}, {pipeline_mode = #tpu.pipeline_mode<synchronous>, transform_indices = @transform_4, window_bounds = array<i64: 168, 84>}, {pipeline_mode = #tpu.pipeline_mode<synchronous>, transform_indices = @transform_5, window_bounds = array<i64: 5, 84, 160>}, {pipeline_mode = #tpu.pipeline_mode<synchronous>, transform_indices = @transform_6, window_bounds = array<i64: 1, 160>}, {pipeline_mode = #tpu.pipeline_mode<synchronous>, transform_indices = @transform_7, window_bounds = array<i64: 40, 108>}, {pipeline_mode = #tpu.pipeline_mode<synchronous>, transform_indices = @transform_8, window_bounds = array<i64: 160, 80>}, {pipeline_mode = #tpu.pipeline_mode<synchronous>, transform_indices = @transform_9, window_bounds = array<i64: 40, 40>}, {pipeline_mode = #tpu.pipeline_mode<synchronous>, transform_indices = @transform_10, window_bounds = array<i64: 80, 80>}, {pipeline_mode = #tpu.pipeline_mode<synchronous>, transform_indices = @transform_11, window_bounds = array<i64: 5, 8, 40>}, {pipeline_mode = #tpu.pipeline_mode<synchronous>, transform_indices = @transform_12, window_bounds = array<i64: 5, 80, 128>}, {pipeline_mode = #tpu.pipeline_mode<synchronous>, transform_indices = @transform_13, window_bounds = array<i64: 1, 128>}, {pipeline_mode = #tpu.pipeline_mode<synchronous>, transform_indices = @transform_14, window_bounds = array<i64: 128, 128>}, {pipeline_mode = #tpu.pipeline_mode<synchronous>, transform_indices = @transform_15, window_bounds = array<i64: 1, 128>}, {pipeline_mode = #tpu.pipeline_mode<synchronous>, transform_indices = @transform_16, window_bounds = array<i64: 128, 10>}, {pipeline_mode = #tpu.pipeline_mode<synchronous>, transform_indices = @transform_17, window_bounds = array<i64: 1, 10>}, {transform_indices = @transform_18, window_bounds = array<i64: 8, 10>}]} {
    %c0 = arith.constant 0 : index
    %c0_0 = arith.constant 0 : index
    %0 = vector.load %arg1[%c0, %c0_0] : memref<256x96xf32, #tpu.memory_space<vmem>>, vector<252x96xf32>
    %c0_1 = arith.constant 0 : index
    %c0_2 = arith.constant 0 : index
    %c0_3 = arith.constant 0 : index
    %1 = vector.load %arg2[%c0_1, %c0_2, %c0_3] : memref<5x96x168xf32, #tpu.memory_space<vmem>>, vector<1x96x168xf32>
    %2 = vector.shape_cast %1 : vector<1x96x168xf32> to vector<96x168xf32>
    %cst = arith.constant dense<0.000000e+00> : vector<252x168xf32>
    %3 = tpu.matmul %0, %2, %cst {dimension_numbers = #tpu.dot_dimension_numbers<[1], [0], [0], [1], [0, 0, 1, 1], [], []>} : vector<252x96xf32>, vector<96x168xf32>, vector<252x168xf32> -> vector<252x168xf32>
    %c1 = arith.constant 1 : index
    %c0_4 = arith.constant 0 : index
    %4 = vector.load %arg1[%c1, %c0_4] : memref<256x96xf32, #tpu.memory_space<vmem>>, vector<252x96xf32>
    %c1_5 = arith.constant 1 : index
    %c0_6 = arith.constant 0 : index
    %c0_7 = arith.constant 0 : index
    %5 = vector.load %arg2[%c1_5, %c0_6, %c0_7] : memref<5x96x168xf32, #tpu.memory_space<vmem>>, vector<1x96x168xf32>
    %6 = vector.shape_cast %5 : vector<1x96x168xf32> to vector<96x168xf32>
    %cst_8 = arith.constant dense<0.000000e+00> : vector<252x168xf32>
    %7 = tpu.matmul %4, %6, %cst_8 {dimension_numbers = #tpu.dot_dimension_numbers<[1], [0], [0], [1], [0, 0, 1, 1], [], []>} : vector<252x96xf32>, vector<96x168xf32>, vector<252x168xf32> -> vector<252x168xf32>
    %8 = arith.addf %3, %7 : vector<252x168xf32>
    %c2 = arith.constant 2 : index
    %c0_9 = arith.constant 0 : index
    %9 = vector.load %arg1[%c2, %c0_9] : memref<256x96xf32, #tpu.memory_space<vmem>>, vector<252x96xf32>
    %c2_10 = arith.constant 2 : index
    %c0_11 = arith.constant 0 : index
    %c0_12 = arith.constant 0 : index
    %10 = vector.load %arg2[%c2_10, %c0_11, %c0_12] : memref<5x96x168xf32, #tpu.memory_space<vmem>>, vector<1x96x168xf32>
    %11 = vector.shape_cast %10 : vector<1x96x168xf32> to vector<96x168xf32>
    %cst_13 = arith.constant dense<0.000000e+00> : vector<252x168xf32>
    %12 = tpu.matmul %9, %11, %cst_13 {dimension_numbers = #tpu.dot_dimension_numbers<[1], [0], [0], [1], [0, 0, 1, 1], [], []>} : vector<252x96xf32>, vector<96x168xf32>, vector<252x168xf32> -> vector<252x168xf32>
    %13 = arith.addf %8, %12 : vector<252x168xf32>
    %c3 = arith.constant 3 : index
    %c0_14 = arith.constant 0 : index
    %14 = vector.load %arg1[%c3, %c0_14] : memref<256x96xf32, #tpu.memory_space<vmem>>, vector<252x96xf32>
    %c3_15 = arith.constant 3 : index
    %c0_16 = arith.constant 0 : index
    %c0_17 = arith.constant 0 : index
    %15 = vector.load %arg2[%c3_15, %c0_16, %c0_17] : memref<5x96x168xf32, #tpu.memory_space<vmem>>, vector<1x96x168xf32>
    %16 = vector.shape_cast %15 : vector<1x96x168xf32> to vector<96x168xf32>
    %cst_18 = arith.constant dense<0.000000e+00> : vector<252x168xf32>
    %17 = tpu.matmul %14, %16, %cst_18 {dimension_numbers = #tpu.dot_dimension_numbers<[1], [0], [0], [1], [0, 0, 1, 1], [], []>} : vector<252x96xf32>, vector<96x168xf32>, vector<252x168xf32> -> vector<252x168xf32>
    %18 = arith.addf %13, %17 : vector<252x168xf32>
    %c4 = arith.constant 4 : index
    %c0_19 = arith.constant 0 : index
    %19 = vector.load %arg1[%c4, %c0_19] : memref<256x96xf32, #tpu.memory_space<vmem>>, vector<252x96xf32>
    %c4_20 = arith.constant 4 : index
    %c0_21 = arith.constant 0 : index
    %c0_22 = arith.constant 0 : index
    %20 = vector.load %arg2[%c4_20, %c0_21, %c0_22] : memref<5x96x168xf32, #tpu.memory_space<vmem>>, vector<1x96x168xf32>
    %21 = vector.shape_cast %20 : vector<1x96x168xf32> to vector<96x168xf32>
    %cst_23 = arith.constant dense<0.000000e+00> : vector<252x168xf32>
    %22 = tpu.matmul %19, %21, %cst_23 {dimension_numbers = #tpu.dot_dimension_numbers<[1], [0], [0], [1], [0, 0, 1, 1], [], []>} : vector<252x96xf32>, vector<96x168xf32>, vector<252x168xf32> -> vector<252x168xf32>
    %23 = arith.addf %18, %22 : vector<252x168xf32>
    %c0_24 = arith.constant 0 : index
    %c0_25 = arith.constant 0 : index
    %24 = vector.load %arg3[%c0_24, %c0_25] : memref<1x168xf32, #tpu.memory_space<vmem>>, vector<1x168xf32>
    %25 = vector.broadcast %24 : vector<1x168xf32> to vector<252x168xf32>
    %26 = arith.addf %23, %25 : vector<252x168xf32>
    %cst_26 = arith.constant 0.000000e+00 : f32
    %27 = vector.broadcast %cst_26 : f32 to vector<252x168xf32>
    %28 = arith.maximumf %26, %27 : vector<252x168xf32>
    %c0_27 = arith.constant 0 : index
    %c0_28 = arith.constant 0 : index
    %29 = vector.load %arg4[%c0_27, %c0_28] : memref<112x252xf32, #tpu.memory_space<vmem>>, vector<112x252xf32>
    %cst_29 = arith.constant dense<0.000000e+00> : vector<112x168xf32>
    %30 = tpu.matmul %29, %28, %cst_29 {dimension_numbers = #tpu.dot_dimension_numbers<[1], [0], [0], [1], [0, 0, 1, 1], [], []>} : vector<112x252xf32>, vector<252x168xf32>, vector<112x168xf32> -> vector<112x168xf32>
    %c0_30 = arith.constant 0 : index
    %c0_31 = arith.constant 0 : index
    %31 = vector.load %arg5[%c0_30, %c0_31] : memref<168x84xf32, #tpu.memory_space<vmem>>, vector<168x84xf32>
    %cst_32 = arith.constant dense<0.000000e+00> : vector<112x84xf32>
    %32 = tpu.matmul %30, %31, %cst_32 {dimension_numbers = #tpu.dot_dimension_numbers<[1], [0], [0], [1], [0, 0, 1, 1], [], []>} : vector<112x168xf32>, vector<168x84xf32>, vector<112x84xf32> -> vector<112x84xf32>
    %33 = vector.extract_strided_slice %32 {offsets = [0, 0], sizes = [108, 84], strides = [1, 1]} : vector<112x84xf32> to vector<108x84xf32>
    %c0_33 = arith.constant 0 : index
    %c0_34 = arith.constant 0 : index
    %c0_35 = arith.constant 0 : index
    %34 = vector.load %arg6[%c0_33, %c0_34, %c0_35] : memref<5x84x160xf32, #tpu.memory_space<vmem>>, vector<1x84x160xf32>
    %35 = vector.shape_cast %34 : vector<1x84x160xf32> to vector<84x160xf32>
    %cst_36 = arith.constant dense<0.000000e+00> : vector<108x160xf32>
    %36 = tpu.matmul %33, %35, %cst_36 {dimension_numbers = #tpu.dot_dimension_numbers<[1], [0], [0], [1], [0, 0, 1, 1], [], []>} : vector<108x84xf32>, vector<84x160xf32>, vector<108x160xf32> -> vector<108x160xf32>
    %37 = vector.extract_strided_slice %32 {offsets = [1, 0], sizes = [108, 84], strides = [1, 1]} : vector<112x84xf32> to vector<108x84xf32>
    %c1_37 = arith.constant 1 : index
    %c0_38 = arith.constant 0 : index
    %c0_39 = arith.constant 0 : index
    %38 = vector.load %arg6[%c1_37, %c0_38, %c0_39] : memref<5x84x160xf32, #tpu.memory_space<vmem>>, vector<1x84x160xf32>
    %39 = vector.shape_cast %38 : vector<1x84x160xf32> to vector<84x160xf32>
    %cst_40 = arith.constant dense<0.000000e+00> : vector<108x160xf32>
    %40 = tpu.matmul %37, %39, %cst_40 {dimension_numbers = #tpu.dot_dimension_numbers<[1], [0], [0], [1], [0, 0, 1, 1], [], []>} : vector<108x84xf32>, vector<84x160xf32>, vector<108x160xf32> -> vector<108x160xf32>
    %41 = arith.addf %36, %40 : vector<108x160xf32>
    %42 = vector.extract_strided_slice %32 {offsets = [2, 0], sizes = [108, 84], strides = [1, 1]} : vector<112x84xf32> to vector<108x84xf32>
    %c2_41 = arith.constant 2 : index
    %c0_42 = arith.constant 0 : index
    %c0_43 = arith.constant 0 : index
    %43 = vector.load %arg6[%c2_41, %c0_42, %c0_43] : memref<5x84x160xf32, #tpu.memory_space<vmem>>, vector<1x84x160xf32>
    %44 = vector.shape_cast %43 : vector<1x84x160xf32> to vector<84x160xf32>
    %cst_44 = arith.constant dense<0.000000e+00> : vector<108x160xf32>
    %45 = tpu.matmul %42, %44, %cst_44 {dimension_numbers = #tpu.dot_dimension_numbers<[1], [0], [0], [1], [0, 0, 1, 1], [], []>} : vector<108x84xf32>, vector<84x160xf32>, vector<108x160xf32> -> vector<108x160xf32>
    %46 = arith.addf %41, %45 : vector<108x160xf32>
    %47 = vector.extract_strided_slice %32 {offsets = [3, 0], sizes = [108, 84], strides = [1, 1]} : vector<112x84xf32> to vector<108x84xf32>
    %c3_45 = arith.constant 3 : index
    %c0_46 = arith.constant 0 : index
    %c0_47 = arith.constant 0 : index
    %48 = vector.load %arg6[%c3_45, %c0_46, %c0_47] : memref<5x84x160xf32, #tpu.memory_space<vmem>>, vector<1x84x160xf32>
    %49 = vector.shape_cast %48 : vector<1x84x160xf32> to vector<84x160xf32>
    %cst_48 = arith.constant dense<0.000000e+00> : vector<108x160xf32>
    %50 = tpu.matmul %47, %49, %cst_48 {dimension_numbers = #tpu.dot_dimension_numbers<[1], [0], [0], [1], [0, 0, 1, 1], [], []>} : vector<108x84xf32>, vector<84x160xf32>, vector<108x160xf32> -> vector<108x160xf32>
    %51 = arith.addf %46, %50 : vector<108x160xf32>
    %52 = vector.extract_strided_slice %32 {offsets = [4, 0], sizes = [108, 84], strides = [1, 1]} : vector<112x84xf32> to vector<108x84xf32>
    %c4_49 = arith.constant 4 : index
    %c0_50 = arith.constant 0 : index
    %c0_51 = arith.constant 0 : index
    %53 = vector.load %arg6[%c4_49, %c0_50, %c0_51] : memref<5x84x160xf32, #tpu.memory_space<vmem>>, vector<1x84x160xf32>
    %54 = vector.shape_cast %53 : vector<1x84x160xf32> to vector<84x160xf32>
    %cst_52 = arith.constant dense<0.000000e+00> : vector<108x160xf32>
    %55 = tpu.matmul %52, %54, %cst_52 {dimension_numbers = #tpu.dot_dimension_numbers<[1], [0], [0], [1], [0, 0, 1, 1], [], []>} : vector<108x84xf32>, vector<84x160xf32>, vector<108x160xf32> -> vector<108x160xf32>
    %56 = arith.addf %51, %55 : vector<108x160xf32>
    %c0_53 = arith.constant 0 : index
    %c0_54 = arith.constant 0 : index
    %57 = vector.load %arg7[%c0_53, %c0_54] : memref<1x160xf32, #tpu.memory_space<vmem>>, vector<1x160xf32>
    %58 = vector.broadcast %57 : vector<1x160xf32> to vector<108x160xf32>
    %59 = arith.addf %56, %58 : vector<108x160xf32>
    %cst_55 = arith.constant 0.000000e+00 : f32
    %60 = vector.broadcast %cst_55 : f32 to vector<108x160xf32>
    %61 = arith.maximumf %59, %60 : vector<108x160xf32>
    %c0_56 = arith.constant 0 : index
    %c0_57 = arith.constant 0 : index
    %62 = vector.load %arg8[%c0_56, %c0_57] : memref<40x108xf32, #tpu.memory_space<vmem>>, vector<40x108xf32>
    %cst_58 = arith.constant dense<0.000000e+00> : vector<40x160xf32>
    %63 = tpu.matmul %62, %61, %cst_58 {dimension_numbers = #tpu.dot_dimension_numbers<[1], [0], [0], [1], [0, 0, 1, 1], [], []>} : vector<40x108xf32>, vector<108x160xf32>, vector<40x160xf32> -> vector<40x160xf32>
    %c0_59 = arith.constant 0 : index
    %c0_60 = arith.constant 0 : index
    %64 = vector.load %arg9[%c0_59, %c0_60] : memref<160x80xf32, #tpu.memory_space<vmem>>, vector<160x80xf32>
    %cst_61 = arith.constant dense<0.000000e+00> : vector<40x80xf32>
    %65 = tpu.matmul %63, %64, %cst_61 {dimension_numbers = #tpu.dot_dimension_numbers<[1], [0], [0], [1], [0, 0, 1, 1], [], []>} : vector<40x160xf32>, vector<160x80xf32>, vector<40x80xf32> -> vector<40x80xf32>
    %c0_62 = arith.constant 0 : index
    %c0_63 = arith.constant 0 : index
    %66 = vector.load %arg10[%c0_62, %c0_63] : memref<40x40xf32, #tpu.memory_space<vmem>>, vector<40x40xf32>
    %cst_64 = arith.constant dense<0.000000e+00> : vector<40x80xf32>
    %67 = tpu.matmul %66, %65, %cst_64 {dimension_numbers = #tpu.dot_dimension_numbers<[1], [0], [0], [1], [0, 0, 1, 1], [], []>} : vector<40x40xf32>, vector<40x80xf32>, vector<40x80xf32> -> vector<40x80xf32>
    %c0_65 = arith.constant 0 : index
    %c0_66 = arith.constant 0 : index
    %68 = vector.load %arg11[%c0_65, %c0_66] : memref<80x80xf32, #tpu.memory_space<vmem>>, vector<80x80xf32>
    %cst_67 = arith.constant dense<0.000000e+00> : vector<40x80xf32>
    %69 = tpu.matmul %67, %68, %cst_67 {dimension_numbers = #tpu.dot_dimension_numbers<[1], [0], [0], [1], [0, 0, 1, 1], [], []>} : vector<40x80xf32>, vector<80x80xf32>, vector<40x80xf32> -> vector<40x80xf32>
    %cst_68 = arith.constant 0.000000e+00 : f32
    %70 = vector.broadcast %cst_68 : f32 to vector<8x128xf32>
    %c0_69 = arith.constant 0 : index
    %c0_70 = arith.constant 0 : index
    %c0_71 = arith.constant 0 : index
    %71 = vector.load %arg12[%c0_69, %c0_70, %c0_71] : memref<5x8x40xf32, #tpu.memory_space<vmem>>, vector<1x8x40xf32>
    %72 = vector.shape_cast %71 : vector<1x8x40xf32> to vector<8x40xf32>
    %cst_72 = arith.constant dense<0.000000e+00> : vector<8x80xf32>
    %73 = tpu.matmul %72, %69, %cst_72 {dimension_numbers = #tpu.dot_dimension_numbers<[1], [0], [0], [1], [0, 0, 1, 1], [], []>} : vector<8x40xf32>, vector<40x80xf32>, vector<8x80xf32> -> vector<8x80xf32>
    %c0_73 = arith.constant 0 : index
    %c0_74 = arith.constant 0 : index
    %c0_75 = arith.constant 0 : index
    %74 = vector.load %arg13[%c0_73, %c0_74, %c0_75] : memref<5x80x128xf32, #tpu.memory_space<vmem>>, vector<1x80x128xf32>
    %75 = vector.shape_cast %74 : vector<1x80x128xf32> to vector<80x128xf32>
    %cst_76 = arith.constant dense<0.000000e+00> : vector<8x128xf32>
    %76 = tpu.matmul %73, %75, %cst_76 {dimension_numbers = #tpu.dot_dimension_numbers<[1], [0], [0], [1], [0, 0, 1, 1], [], []>} : vector<8x80xf32>, vector<80x128xf32>, vector<8x128xf32> -> vector<8x128xf32>
    %77 = arith.addf %70, %76 : vector<8x128xf32>
    %c1_77 = arith.constant 1 : index
    %c0_78 = arith.constant 0 : index
    %c0_79 = arith.constant 0 : index
    %78 = vector.load %arg12[%c1_77, %c0_78, %c0_79] : memref<5x8x40xf32, #tpu.memory_space<vmem>>, vector<1x8x40xf32>
    %79 = vector.shape_cast %78 : vector<1x8x40xf32> to vector<8x40xf32>
    %cst_80 = arith.constant dense<0.000000e+00> : vector<8x80xf32>
    %80 = tpu.matmul %79, %69, %cst_80 {dimension_numbers = #tpu.dot_dimension_numbers<[1], [0], [0], [1], [0, 0, 1, 1], [], []>} : vector<8x40xf32>, vector<40x80xf32>, vector<8x80xf32> -> vector<8x80xf32>
    %c1_81 = arith.constant 1 : index
    %c0_82 = arith.constant 0 : index
    %c0_83 = arith.constant 0 : index
    %81 = vector.load %arg13[%c1_81, %c0_82, %c0_83] : memref<5x80x128xf32, #tpu.memory_space<vmem>>, vector<1x80x128xf32>
    %82 = vector.shape_cast %81 : vector<1x80x128xf32> to vector<80x128xf32>
    %cst_84 = arith.constant dense<0.000000e+00> : vector<8x128xf32>
    %83 = tpu.matmul %80, %82, %cst_84 {dimension_numbers = #tpu.dot_dimension_numbers<[1], [0], [0], [1], [0, 0, 1, 1], [], []>} : vector<8x80xf32>, vector<80x128xf32>, vector<8x128xf32> -> vector<8x128xf32>
    %84 = arith.addf %77, %83 : vector<8x128xf32>
    %c2_85 = arith.constant 2 : index
    %c0_86 = arith.constant 0 : index
    %c0_87 = arith.constant 0 : index
    %85 = vector.load %arg12[%c2_85, %c0_86, %c0_87] : memref<5x8x40xf32, #tpu.memory_space<vmem>>, vector<1x8x40xf32>
    %86 = vector.shape_cast %85 : vector<1x8x40xf32> to vector<8x40xf32>
    %cst_88 = arith.constant dense<0.000000e+00> : vector<8x80xf32>
    %87 = tpu.matmul %86, %69, %cst_88 {dimension_numbers = #tpu.dot_dimension_numbers<[1], [0], [0], [1], [0, 0, 1, 1], [], []>} : vector<8x40xf32>, vector<40x80xf32>, vector<8x80xf32> -> vector<8x80xf32>
    %c2_89 = arith.constant 2 : index
    %c0_90 = arith.constant 0 : index
    %c0_91 = arith.constant 0 : index
    %88 = vector.load %arg13[%c2_89, %c0_90, %c0_91] : memref<5x80x128xf32, #tpu.memory_space<vmem>>, vector<1x80x128xf32>
    %89 = vector.shape_cast %88 : vector<1x80x128xf32> to vector<80x128xf32>
    %cst_92 = arith.constant dense<0.000000e+00> : vector<8x128xf32>
    %90 = tpu.matmul %87, %89, %cst_92 {dimension_numbers = #tpu.dot_dimension_numbers<[1], [0], [0], [1], [0, 0, 1, 1], [], []>} : vector<8x80xf32>, vector<80x128xf32>, vector<8x128xf32> -> vector<8x128xf32>
    %91 = arith.addf %84, %90 : vector<8x128xf32>
    %c3_93 = arith.constant 3 : index
    %c0_94 = arith.constant 0 : index
    %c0_95 = arith.constant 0 : index
    %92 = vector.load %arg12[%c3_93, %c0_94, %c0_95] : memref<5x8x40xf32, #tpu.memory_space<vmem>>, vector<1x8x40xf32>
    %93 = vector.shape_cast %92 : vector<1x8x40xf32> to vector<8x40xf32>
    %cst_96 = arith.constant dense<0.000000e+00> : vector<8x80xf32>
    %94 = tpu.matmul %93, %69, %cst_96 {dimension_numbers = #tpu.dot_dimension_numbers<[1], [0], [0], [1], [0, 0, 1, 1], [], []>} : vector<8x40xf32>, vector<40x80xf32>, vector<8x80xf32> -> vector<8x80xf32>
    %c3_97 = arith.constant 3 : index
    %c0_98 = arith.constant 0 : index
    %c0_99 = arith.constant 0 : index
    %95 = vector.load %arg13[%c3_97, %c0_98, %c0_99] : memref<5x80x128xf32, #tpu.memory_space<vmem>>, vector<1x80x128xf32>
    %96 = vector.shape_cast %95 : vector<1x80x128xf32> to vector<80x128xf32>
    %cst_100 = arith.constant dense<0.000000e+00> : vector<8x128xf32>
    %97 = tpu.matmul %94, %96, %cst_100 {dimension_numbers = #tpu.dot_dimension_numbers<[1], [0], [0], [1], [0, 0, 1, 1], [], []>} : vector<8x80xf32>, vector<80x128xf32>, vector<8x128xf32> -> vector<8x128xf32>
    %98 = arith.addf %91, %97 : vector<8x128xf32>
    %c4_101 = arith.constant 4 : index
    %c0_102 = arith.constant 0 : index
    %c0_103 = arith.constant 0 : index
    %99 = vector.load %arg12[%c4_101, %c0_102, %c0_103] : memref<5x8x40xf32, #tpu.memory_space<vmem>>, vector<1x8x40xf32>
    %100 = vector.shape_cast %99 : vector<1x8x40xf32> to vector<8x40xf32>
    %cst_104 = arith.constant dense<0.000000e+00> : vector<8x80xf32>
    %101 = tpu.matmul %100, %69, %cst_104 {dimension_numbers = #tpu.dot_dimension_numbers<[1], [0], [0], [1], [0, 0, 1, 1], [], []>} : vector<8x40xf32>, vector<40x80xf32>, vector<8x80xf32> -> vector<8x80xf32>
    %c4_105 = arith.constant 4 : index
    %c0_106 = arith.constant 0 : index
    %c0_107 = arith.constant 0 : index
    %102 = vector.load %arg13[%c4_105, %c0_106, %c0_107] : memref<5x80x128xf32, #tpu.memory_space<vmem>>, vector<1x80x128xf32>
    %103 = vector.shape_cast %102 : vector<1x80x128xf32> to vector<80x128xf32>
    %cst_108 = arith.constant dense<0.000000e+00> : vector<8x128xf32>
    %104 = tpu.matmul %101, %103, %cst_108 {dimension_numbers = #tpu.dot_dimension_numbers<[1], [0], [0], [1], [0, 0, 1, 1], [], []>} : vector<8x80xf32>, vector<80x128xf32>, vector<8x128xf32> -> vector<8x128xf32>
    %105 = arith.addf %98, %104 : vector<8x128xf32>
    %c0_109 = arith.constant 0 : index
    %c0_110 = arith.constant 0 : index
    %106 = vector.load %arg14[%c0_109, %c0_110] : memref<1x128xf32, #tpu.memory_space<vmem>>, vector<1x128xf32>
    %107 = vector.broadcast %106 : vector<1x128xf32> to vector<8x128xf32>
    %108 = arith.addf %105, %107 : vector<8x128xf32>
    %cst_111 = arith.constant 0.000000e+00 : f32
    %109 = vector.broadcast %cst_111 : f32 to vector<8x128xf32>
    %110 = arith.maximumf %108, %109 : vector<8x128xf32>
    %c0_112 = arith.constant 0 : index
    %c0_113 = arith.constant 0 : index
    %111 = vector.load %arg15[%c0_112, %c0_113] : memref<128x128xf32, #tpu.memory_space<vmem>>, vector<128x128xf32>
    %cst_114 = arith.constant dense<0.000000e+00> : vector<8x128xf32>
    %112 = tpu.matmul %110, %111, %cst_114 {dimension_numbers = #tpu.dot_dimension_numbers<[1], [0], [0], [1], [0, 0, 1, 1], [], []>} : vector<8x128xf32>, vector<128x128xf32>, vector<8x128xf32> -> vector<8x128xf32>
    %c0_115 = arith.constant 0 : index
    %c0_116 = arith.constant 0 : index
    %113 = vector.load %arg16[%c0_115, %c0_116] : memref<1x128xf32, #tpu.memory_space<vmem>>, vector<1x128xf32>
    %114 = vector.broadcast %113 : vector<1x128xf32> to vector<8x128xf32>
    %115 = arith.addf %112, %114 : vector<8x128xf32>
    %cst_117 = arith.constant 0.000000e+00 : f32
    %116 = vector.broadcast %cst_117 : f32 to vector<8x128xf32>
    %117 = arith.maximumf %115, %116 : vector<8x128xf32>
    %c0_118 = arith.constant 0 : index
    %c0_119 = arith.constant 0 : index
    %118 = vector.load %arg17[%c0_118, %c0_119] : memref<128x10xf32, #tpu.memory_space<vmem>>, vector<128x10xf32>
    %cst_120 = arith.constant dense<0.000000e+00> : vector<8x10xf32>
    %119 = tpu.matmul %117, %118, %cst_120 {dimension_numbers = #tpu.dot_dimension_numbers<[1], [0], [0], [1], [0, 0, 1, 1], [], []>} : vector<8x128xf32>, vector<128x10xf32>, vector<8x10xf32> -> vector<8x10xf32>
    %c0_121 = arith.constant 0 : index
    %c0_122 = arith.constant 0 : index
    %120 = vector.load %arg18[%c0_121, %c0_122] : memref<1x10xf32, #tpu.memory_space<vmem>>, vector<1x10xf32>
    %121 = vector.broadcast %120 : vector<1x10xf32> to vector<8x10xf32>
    %122 = arith.addf %119, %121 : vector<8x10xf32>
    %c0_123 = arith.constant 0 : index
    %c0_124 = arith.constant 0 : index
    %123 = vector.load %arg19[%c0_123, %c0_124] : memref<8x10xf32, #tpu.memory_space<vmem>>, vector<8x10xf32>
    tpu.vector_store %arg19[%c0_123, %c0_124], %122 {strides = array<i32>} : memref<8x10xf32, #tpu.memory_space<vmem>>, vector<8x10xf32>,
    return
  }
  func.func @transform_0(%arg0: i32) -> (i32, i32) {
    %c0_i32 = arith.constant 0 : i32
    %c0_i32_0 = arith.constant 0 : i32
    return %arg0, %c0_i32 : i32, i32
  }
  func.func @transform_1(%arg0: i32) -> (i32, i32, i32) {
    %c0_i32 = arith.constant 0 : i32
    %c0_i32_0 = arith.constant 0 : i32
    %c0_i32_1 = arith.constant 0 : i32
    %c0_i32_2 = arith.constant 0 : i32
    return %c0_i32, %c0_i32_0, %c0_i32_1 : i32, i32, i32
  }
  func.func @transform_2(%arg0: i32) -> (i32, i32) {
    %c0_i32 = arith.constant 0 : i32
    %c0_i32_0 = arith.constant 0 : i32
    %c0_i32_1 = arith.constant 0 : i32
    return %c0_i32, %c0_i32_0 : i32, i32
  }
  func.func @transform_3(%arg0: i32) -> (i32, i32) {
    %c0_i32 = arith.constant 0 : i32
    %c0_i32_0 = arith.constant 0 : i32
    %c0_i32_1 = arith.constant 0 : i32
    return %c0_i32, %c0_i32_0 : i32, i32
  }
  func.func @transform_4(%arg0: i32) -> (i32, i32) {
    %c0_i32 = arith.constant 0 : i32
    %c0_i32_0 = arith.constant 0 : i32
    %c0_i32_1 = arith.constant 0 : i32
    return %c0_i32, %c0_i32_0 : i32, i32
  }
  func.func @transform_5(%arg0: i32) -> (i32, i32, i32) {
    %c0_i32 = arith.constant 0 : i32
    %c0_i32_0 = arith.constant 0 : i32
    %c0_i32_1 = arith.constant 0 : i32
    %c0_i32_2 = arith.constant 0 : i32
    return %c0_i32, %c0_i32_0, %c0_i32_1 : i32, i32, i32
  }
  func.func @transform_6(%arg0: i32) -> (i32, i32) {
    %c0_i32 = arith.constant 0 : i32
    %c0_i32_0 = arith.constant 0 : i32
    %c0_i32_1 = arith.constant 0 : i32
    return %c0_i32, %c0_i32_0 : i32, i32
  }
  func.func @transform_7(%arg0: i32) -> (i32, i32) {
    %c0_i32 = arith.constant 0 : i32
    %c0_i32_0 = arith.constant 0 : i32
    %c0_i32_1 = arith.constant 0 : i32
    return %c0_i32, %c0_i32_0 : i32, i32
  }
  func.func @transform_8(%arg0: i32) -> (i32, i32) {
    %c0_i32 = arith.constant 0 : i32
    %c0_i32_0 = arith.constant 0 : i32
    %c0_i32_1 = arith.constant 0 : i32
    return %c0_i32, %c0_i32_0 : i32, i32
  }
  func.func @transform_9(%arg0: i32) -> (i32, i32) {
    %c0_i32 = arith.constant 0 : i32
    %c0_i32_0 = arith.constant 0 : i32
    %c0_i32_1 = arith.constant 0 : i32
    return %c0_i32, %c0_i32_0 : i32, i32
  }
  func.func @transform_10(%arg0: i32) -> (i32, i32) {
    %c0_i32 = arith.constant 0 : i32
    %c0_i32_0 = arith.constant 0 : i32
    %c0_i32_1 = arith.constant 0 : i32
    return %c0_i32, %c0_i32_0 : i32, i32
  }
  func.func @transform_11(%arg0: i32) -> (i32, i32, i32) {
    %c0_i32 = arith.constant 0 : i32
    %c0_i32_0 = arith.constant 0 : i32
    %c0_i32_1 = arith.constant 0 : i32
    %c0_i32_2 = arith.constant 0 : i32
    return %c0_i32, %c0_i32_0, %c0_i32_1 : i32, i32, i32
  }
  func.func @transform_12(%arg0: i32) -> (i32, i32, i32) {
    %c0_i32 = arith.constant 0 : i32
    %c0_i32_0 = arith.constant 0 : i32
    %c0_i32_1 = arith.constant 0 : i32
    %c0_i32_2 = arith.constant 0 : i32
    return %c0_i32, %c0_i32_0, %c0_i32_1 : i32, i32, i32
  }
  func.func @transform_13(%arg0: i32) -> (i32, i32) {
    %c0_i32 = arith.constant 0 : i32
    %c0_i32_0 = arith.constant 0 : i32
    %c0_i32_1 = arith.constant 0 : i32
    return %c0_i32, %c0_i32_0 : i32, i32
  }
  func.func @transform_14(%arg0: i32) -> (i32, i32) {
    %c0_i32 = arith.constant 0 : i32
    %c0_i32_0 = arith.constant 0 : i32
    %c0_i32_1 = arith.constant 0 : i32
    return %c0_i32, %c0_i32_0 : i32, i32
  }
  func.func @transform_15(%arg0: i32) -> (i32, i32) {
    %c0_i32 = arith.constant 0 : i32
    %c0_i32_0 = arith.constant 0 : i32
    %c0_i32_1 = arith.constant 0 : i32
    return %c0_i32, %c0_i32_0 : i32, i32
  }
  func.func @transform_16(%arg0: i32) -> (i32, i32) {
    %c0_i32 = arith.constant 0 : i32
    %c0_i32_0 = arith.constant 0 : i32
    %c0_i32_1 = arith.constant 0 : i32
    return %c0_i32, %c0_i32_0 : i32, i32
  }
  func.func @transform_17(%arg0: i32) -> (i32, i32) {
    %c0_i32 = arith.constant 0 : i32
    %c0_i32_0 = arith.constant 0 : i32
    %c0_i32_1 = arith.constant 0 : i32
    return %c0_i32, %c0_i32_0 : i32, i32
  }
  func.func @transform_18(%arg0: i32) -> (i32, i32) {
    %c0_i32 = arith.constant 0 : i32
    %c0_i32_0 = arith.constant 0 : i32
    return %arg0, %c0_i32 : i32, i32
  }
}

</mosaic_0001>

<bundles_post_ra>
// kernel: lenet5c_forward.1
= control target key start
LH: loop header
LB: loop body
LE: loop exit
PB: predicated region body
PF: predicated region fallthrough
CT: control target
= control target key end

     0   :  { %vm172_vm0 = vcmask 785408   ;;  %vm2351_vm1 = vcmask 1043456   ;;  %vm2308_vm2 = vcmask 1014784   ;;  %vm2615_vm3 = vcmask 326656   ;;  %s9194_s1 = inlined_call_operand.vmem [shape: f32[5,96,168], index: 1, kind: input, shape index: {}]   ;;  %s9195_s0 = inlined_call_operand.vmem [shape: f32[256,96], index: 0, kind: input, shape index: {}]   ;;  %s9196_s2 = inlined_call_operand.vmem [shape: f32[1,168], index: 2, kind: input, shape index: {}]   ;;  %s9197_s3 = inlined_call_operand.vmem [shape: f32[112,252], index: 3, kind: input, shape index: {}]   ;;  %s9198_s4 = inlined_call_operand.vmem [shape: f32[168,84], index: 4, kind: input, shape index: {}]   ;;  %s9199_s5 = inlined_call_operand.vmem [shape: f32[5,84,160], index: 5, kind: input, shape index: {}]   ;;  %s9200_s6 = inlined_call_operand.vmem [shape: f32[1,160], index: 6, kind: input, shape index: {}]   ;;  %s9201_s7 = inlined_call_operand.vmem [shape: f32[40,108], index: 7, kind: input, shape index: {}]   ;;  %s9202_s8 = inlined_call_operand.vmem [shape: f32[160,80], index: 8, kind: input, shape index: {}]   ;;  %s9203_s9 = inlined_call_operand.vmem [shape: f32[40,40], index: 9, kind: input, shape index: {}]   ;;  %s9204_s10 = inlined_call_operand.vmem [shape: f32[80,80], index: 10, kind: input, shape index: {}]   ;;  %s9205_s12 = inlined_call_operand.vmem [shape: f32[5,80,128], index: 12, kind: input, shape index: {}]   ;;  %s9206_s11 = inlined_call_operand.vmem [shape: f32[5,8,40], index: 11, kind: input, shape index: {}]   ;;  %s9207_s14 = inlined_call_operand.vmem [shape: f32[128,128], index: 14, kind: input, shape index: {}]   ;;  %s9208_s13 = inlined_call_operand.vmem [shape: f32[1,128], index: 13, kind: input, shape index: {}]   ;;  %s9209_s15 = inlined_call_operand.vmem [shape: f32[1,128], index: 15, kind: input, shape index: {}]   ;;  %s9210_s16 = inlined_call_operand.vmem [shape: f32[128,10], index: 16, kind: input, shape index: {}]   ;;  %s9211_s17 = inlined_call_operand.vmem [shape: f32[1,10], index: 17, kind: input, shape index: {}]   ;;  %s9212_s18 = inlined_call_operand.vmem [shape: f32[8,10], index: 18, kind: output, shape index: {}]  }
   0x1   :  { %9224 = sst [smem:[#allocation114_spill]] %s9194_s1  ;;  %vm2863_vm4 = vcmask 687104   ;;  %vm2835_vm5 = vcmask 1046528   ;;  %vm3422_vm6 = vcmask 1044480   ;;  %vm3191_vm7 = vcmask 1045504  }
   0x2   :  { %9225 = sst [smem:[#allocation115_spill]] %s9195_s0  ;;  %vm3927_vm8 = vcmask 883712   ;;  %vm4033_vm9 = vcmask 261120   ;;  %vm4175_vm10 = vcmask 654336   ;;  %vm4606_vm11 = vcmask 80896  }
   0x3   :  { %9226 = sst [smem:[#allocation116_spill]] %s9196_s2 }
   0x4   :  { %s9227_s29 = sld [smem:[#allocation114_spill]] }
   0x5   :  { %s9228_s27 = sld [smem:[#allocation115_spill]] }
   0x6   :  { %s9335_s30 = sld [smem:[#allocation116_spill]] }
   0xa   :  { %v4634_v0 = vld [vmem:[%s9227_s29 + $0x170] sm:$0xff]  ;;  %v4635_v1 = vld [vmem:[%s9227_s29 + $0x178] sm:$0xff]  ;;  %v4632_v4 = vld [vmem:[%s9227_s29 + $0x160] sm:$0xff] }
   0xb   :  { %v113_v2 = vld [vmem:[%s9227_s29 + $0xb0] sm:$0xff]  ;;  %273 = vmatpush.msra.mxu0 %v4634_v0  ;;  %386 = vmatpush.msra.mxu1 %v4635_v1  ;;  %v114_v3 = vld [vmem:[%s9227_s29 + $0xb8] sm:$0xff]  ;;  %v4633_v5 = vld [vmem:[%s9227_s29 + $0x168] sm:$0xff] }
   0xc   :  { %595 = vmatpush.msra.mxu2 %v113_v2  ;;  %708 = vmatpush.msra.mxu3 %v114_v3  ;;  %v111_v6 = vld [vmem:[%s9227_s29 + $0xa0] sm:$0xff]  ;;  %v112_v7 = vld [vmem:[%s9227_s29 + $0xa8] sm:$0xff]  ;;  %v4630_v8 = vld [vmem:[%s9227_s29 + $0x150] sm:$0xff] }
   0xd   :  { %274 = vmatpush.msra.mxu0 %v4632_v4  ;;  %387 = vmatpush.msra.mxu1 %v4633_v5  ;;  %v4631_v9 = vld [vmem:[%s9227_s29 + $0x158] sm:$0xff]  ;;  %v109_v10 = vld [vmem:[%s9227_s29 + $0x90] sm:$0xff]  ;;  %v4628_v12 = vld [vmem:[%s9227_s29 + $0x140] sm:$0xff] }
   0xe   :  { %v110_v11 = vld [vmem:[%s9227_s29 + $0x98] sm:$0xff]  ;;  %596 = vmatpush.msra.mxu2 %v111_v6  ;;  %709 = vmatpush.msra.mxu3 %v112_v7  ;;  %v4629_v13 = vld [vmem:[%s9227_s29 + $0x148] sm:$0xff]  ;;  %v107_v14 = vld [vmem:[%s9227_s29 + $0x80] sm:$0xff] }
   0xf   :  { %275 = vmatpush.msra.mxu0 %v4630_v8  ;;  %388 = vmatpush.msra.mxu1 %v4631_v9  ;;  %v108_v15 = vld [vmem:[%s9227_s29 + $0x88] sm:$0xff]  ;;  %v4626_v16 = vld [vmem:[%s9227_s29 + $0x130] sm:$0xff]  ;;  %v4627_v17 = vld [vmem:[%s9227_s29 + $0x138] sm:$0xff] }
  0x10   :  { %597 = vmatpush.msra.mxu2 %v109_v10  ;;  %710 = vmatpush.msra.mxu3 %v110_v11  ;;  %v105_v18 = vld [vmem:[%s9227_s29 + $0x70] sm:$0xff]  ;;  %v106_v19 = vld [vmem:[%s9227_s29 + $0x78] sm:$0xff]  ;;  %v4624_v20 = vld [vmem:[%s9227_s29 + $0x120] sm:$0xff] }
  0x11   :  { %276 = vmatpush.msra.mxu0 %v4628_v12  ;;  %389 = vmatpush.msra.mxu1 %v4629_v13  ;;  %v4625_v21 = vld [vmem:[%s9227_s29 + $0x128] sm:$0xff]  ;;  %v103_v22 = vld [vmem:[%s9227_s29 + $0x60] sm:$0xff]  ;;  %v4622_v24 = vld [vmem:[%s9227_s29 + $0x110] sm:$0xff] }
  0x12   :  { %598 = vmatpush.msra.mxu2 %v107_v14  ;;  %711 = vmatpush.msra.mxu3 %v108_v15  ;;  %v104_v23 = vld [vmem:[%s9227_s29 + $0x68] sm:$0xff]  ;;  %v4623_v25 = vld [vmem:[%s9227_s29 + $0x118] sm:$0xff]  ;;  %v101_v26 = vld [vmem:[%s9227_s29 + $0x50] sm:$0xff] }
  0x13   :  { %277 = vmatpush.msra.mxu0 %v4626_v16  ;;  %390 = vmatpush.msra.mxu1 %v4627_v17  ;;  %v102_v27 = vld [vmem:[%s9227_s29 + $0x58] sm:$0xff]  ;;  %v4620_v28 = vld [vmem:[%s9227_s29 + $0x100] sm:$0xff]  ;;  %v4621_v29 = vld [vmem:[%s9227_s29 + $0x108] sm:$0xff] }
  0x14   :  { %599 = vmatpush.msra.mxu2 %v105_v18  ;;  %712 = vmatpush.msra.mxu3 %v106_v19  ;;  %v99_v30 = vld [vmem:[%s9227_s29 + $0x40] sm:$0xff]  ;;  %v100_v31 = vld [vmem:[%s9227_s29 + $0x48] sm:$0xff]  ;;  %v4618_v32 = vld [vmem:[%s9227_s29 + $0xf0] sm:$0xff] }
  0x15   :  { %278 = vmatpush.msra.mxu0 %v4624_v20  ;;  %391 = vmatpush.msra.mxu1 %v4625_v21  ;;  %v4619_v33 = vld [vmem:[%s9227_s29 + $0xf8] sm:$0xff]  ;;  %v97_v34 = vld [vmem:[%s9227_s29 + $0x30] sm:$0xff]  ;;  %v4616_v36 = vld [vmem:[%s9227_s29 + $0xe0] sm:$0xff] }
  0x16   :  { %600 = vmatpush.msra.mxu2 %v103_v22  ;;  %713 = vmatpush.msra.mxu3 %v104_v23  ;;  %v98_v35 = vld [vmem:[%s9227_s29 + $0x38] sm:$0xff]  ;;  %v4617_v37 = vld [vmem:[%s9227_s29 + $0xe8] sm:$0xff]  ;;  %v95_v38 = vld [vmem:[%s9227_s29 + $0x20] sm:$0xff] }
  0x17   :  { %279 = vmatpush.msra.mxu0 %v4622_v24  ;;  %392 = vmatpush.msra.mxu1 %v4623_v25  ;;  %v96_v39 = vld [vmem:[%s9227_s29 + $0x28] sm:$0xff]  ;;  %v4614_v40 = vld [vmem:[%s9227_s29 + $0xd0] sm:$0xff]  ;;  %v4615_v41 = vld [vmem:[%s9227_s29 + $0xd8] sm:$0xff] }
  0x18   :  { %601 = vmatpush.msra.mxu2 %v101_v26  ;;  %714 = vmatpush.msra.mxu3 %v102_v27  ;;  %v93_v42 = vld [vmem:[%s9227_s29 + $0x10] sm:$0xff]  ;;  %v94_v43 = vld [vmem:[%s9227_s29 + $0x18] sm:$0xff]  ;;  %v4612_v44 = vld [vmem:[%s9227_s29 + $0xc0] sm:$0xff] }
  0x19   :  { %280 = vmatpush.msra.mxu0 %v4620_v28  ;;  %393 = vmatpush.msra.mxu1 %v4621_v29  ;;  %v4613_v45 = vld [vmem:[%s9227_s29 + $0xc8] sm:$0xff]  ;;  %v91_v46 = vld [vmem:[%s9227_s29] sm:$0xff]  ;;  %v117_v52 = vld [vmem:[%s9228_s27 + $0x11] sm:$0xff] }
  0x1a   :  { %602 = vmatpush.msra.mxu2 %v99_v30  ;;  %715 = vmatpush.msra.mxu3 %v100_v31  ;;  %v92_v47 = vld [vmem:[%s9227_s29 + $0x8] sm:$0xff]  ;;  %v59_v49 = vld [vmem:[%s9228_s27] sm:$0xff]  ;;  %v61_v53 = vld [vmem:[%s9228_s27 + $0x10] sm:$0xff] }
  0x1b   :  { %281 = vmatpush.msra.mxu0 %v4618_v32  ;;  %394 = vmatpush.msra.mxu1 %v4619_v33  ;;  %v115_v48 = vld [vmem:[%s9228_s27 + $0x1] sm:$0xff]  ;;  %v116_v50 = vld [vmem:[%s9228_s27 + $0x9] sm:$0xff]  ;;  %v118_v54 = vld [vmem:[%s9228_s27 + $0x19] sm:$0xff] }
  0x1c   :  { %603 = vmatpush.msra.mxu2 %v97_v34  ;;  %716 = vmatpush.msra.mxu3 %v98_v35  ;;  %v60_v51 = vld [vmem:[%s9228_s27 + $0x8] sm:$0xff]  ;;  %v62_v55 = vld [vmem:[%s9228_s27 + $0x18] sm:$0xff]  ;;  %v63_v57 = vld [vmem:[%s9228_s27 + $0x20] sm:$0xff] }
  0x1d   :  { %282 = vmatpush.msra.mxu0 %v4616_v36  ;;  %395 = vmatpush.msra.mxu1 %v4617_v37  ;;  %v119_v56 = vld [vmem:[%s9228_s27 + $0x21] sm:$0xff]  ;;  %v120_v58 = vld [vmem:[%s9228_s27 + $0x29] sm:$0xff]  ;;  %v121_v60 = vld [vmem:[%s9228_s27 + $0x31] sm:$0xff] }
  0x1e   :  { %604 = vmatpush.msra.mxu2 %v95_v38  ;;  %717 = vmatpush.msra.mxu3 %v96_v39  ;;  %v64_v59 = vld [vmem:[%s9228_s27 + $0x28] sm:$0xff]  ;;  %v65_v61 = vld [vmem:[%s9228_s27 + $0x30] sm:$0xff]  ;;  %v122_v62 = vld [vmem:[%s9228_s27 + $0x39] sm:$0xff] }
  0x1f   :  { %283 = vmatpush.msra.mxu0 %v4614_v40  ;;  %396 = vmatpush.msra.mxu1 %v4615_v41  ;;  %v66_v63 = vld [vmem:[%s9228_s27 + $0x38] sm:$0xff]  ;;  %v123_v0 = vld [vmem:[%s9228_s27 + $0x41] sm:$0xff]  ;;  %v124_v2 = vld [vmem:[%s9228_s27 + $0x49] sm:$0xff] }
  0x20   :  { %605 = vmatpush.msra.mxu2 %v93_v42  ;;  %718 = vmatpush.msra.mxu3 %v94_v43  ;;  %v67_v1 = vld [vmem:[%s9228_s27 + $0x40] sm:$0xff]  ;;  %v68_v3 = vld [vmem:[%s9228_s27 + $0x48] sm:$0xff]  ;;  %v125_v4 = vld [vmem:[%s9228_s27 + $0x51] sm:$0xff] }
  0x21   :  { %284 = vmatpush.msra.mxu0 %v4612_v44  ;;  %397 = vmatpush.msra.mxu1 %v4613_v45  ;;  %v69_v5 = vld [vmem:[%s9228_s27 + $0x50] sm:$0xff]  ;;  %v126_v6 = vld [vmem:[%s9228_s27 + $0x59] sm:$0xff]  ;;  %v127_v8 = vld [vmem:[%s9228_s27 + $0x61] sm:$0xff] }
  0x22   :  { %606 = vmatpush.msra.mxu2 %v91_v46  ;;  %719 = vmatpush.msra.mxu3 %v92_v47  ;;  %v70_v7 = vld [vmem:[%s9228_s27 + $0x58] sm:$0xff]  ;;  %v71_v9 = vld [vmem:[%s9228_s27 + $0x60] sm:$0xff]  ;;  %v128_v10 = vld [vmem:[%s9228_s27 + $0x69] sm:$0xff] }
  0x23   :  { %4636 = vmatmul.msk.f32.vlgmr.msra.gmra.mxu0 %vm172_vm0, %v115_v48  ;;  %4668 = vmatmul.msk.f32.vlgmr.msra.gmra.mxu1 %vm172_vm0, %v115_v48  ;;  %v72_v11 = vld [vmem:[%s9228_s27 + $0x68] sm:$0xff]  ;;  %v129_v12 = vld [vmem:[%s9228_s27 + $0x71] sm:$0xff]  ;;  %v130_v14 = vld [vmem:[%s9228_s27 + $0x79] sm:$0xff] }
  0x24   :  { %4700 = vmatmul.msk.f32.vlgmr.msra.gmra.mxu2 %vm172_vm0, %v59_v49  ;;  %4732 = vmatmul.msk.f32.vlgmr.msra.gmra.mxu3 %vm172_vm0, %v59_v49  ;;  %v73_v13 = vld [vmem:[%s9228_s27 + $0x70] sm:$0xff]  ;;  %v74_v15 = vld [vmem:[%s9228_s27 + $0x78] sm:$0xff]  ;;  %v131_v18 = vld [vmem:[%s9228_s27 + $0x81] sm:$0xff] }
  0x25   :  { %v75_v19 = vld [vmem:[%s9228_s27 + $0x80] sm:$0xff]  ;;  %v132_v26 = vld [vmem:[%s9228_s27 + $0x89] sm:$0xff]  ;;  %v133_v34 = vld [vmem:[%s9228_s27 + $0x91] sm:$0xff] }
  0x26   :  { %v76_v27 = vld [vmem:[%s9228_s27 + $0x88] sm:$0xff]  ;;  %v77_v35 = vld [vmem:[%s9228_s27 + $0x90] sm:$0xff]  ;;  %v134_v42 = vld [vmem:[%s9228_s27 + $0x99] sm:$0xff] }
  0x27   :  { %v78_v43 = vld [vmem:[%s9228_s27 + $0x98] sm:$0xff] }
  0x2b   :  { %4637 = vmatmul.msk.f32.gmra.mxu0 %vm172_vm0, %v116_v50  ;;  %4669 = vmatmul.msk.f32.gmra.mxu1 %vm172_vm0, %v116_v50  ;;  %v135_v50 = vld [vmem:[%s9228_s27 + $0xa1] sm:$0xff] }
  0x2c   :  { %4701 = vmatmul.msk.f32.gmra.mxu2 %vm172_vm0, %v60_v51  ;;  %4733 = vmatmul.msk.f32.gmra.mxu3 %vm172_vm0, %v60_v51  ;;  %v79_v51 = vld [vmem:[%s9228_s27 + $0xa0] sm:$0xff] }
  0x33   :  { %4638 = vmatmul.msk.f32.gmra.mxu0 %vm172_vm0, %v117_v52  ;;  %4670 = vmatmul.msk.f32.gmra.mxu1 %vm172_vm0, %v117_v52 }
  0x34   :  { %4702 = vmatmul.msk.f32.gmra.mxu2 %vm172_vm0, %v61_v53  ;;  %4734 = vmatmul.msk.f32.gmra.mxu3 %vm172_vm0, %v61_v53 }
  0x3b   :  { %4639 = vmatmul.msk.f32.gmra.mxu0 %vm172_vm0, %v118_v54  ;;  %4671 = vmatmul.msk.f32.gmra.mxu1 %vm172_vm0, %v118_v54 }
  0x3c   :  { %4703 = vmatmul.msk.f32.gmra.mxu2 %vm172_vm0, %v62_v55  ;;  %4735 = vmatmul.msk.f32.gmra.mxu3 %vm172_vm0, %v62_v55 }
  0x43   :  { %4640 = vmatmul.msk.f32.gmra.mxu0 %vm172_vm0, %v119_v56  ;;  %4672 = vmatmul.msk.f32.gmra.mxu1 %vm172_vm0, %v119_v56 }
  0x44   :  { %4704 = vmatmul.msk.f32.gmra.mxu2 %vm172_vm0, %v63_v57  ;;  %4736 = vmatmul.msk.f32.gmra.mxu3 %vm172_vm0, %v63_v57 }
  0x4b   :  { %4641 = vmatmul.msk.f32.gmra.mxu0 %vm172_vm0, %v120_v58  ;;  %4673 = vmatmul.msk.f32.gmra.mxu1 %vm172_vm0, %v120_v58  ;;  %v136_v58 = vld [vmem:[%s9228_s27 + $0xa9] sm:$0xff] }
  0x4c   :  { %4705 = vmatmul.msk.f32.gmra.mxu2 %vm172_vm0, %v64_v59  ;;  %4737 = vmatmul.msk.f32.gmra.mxu3 %vm172_vm0, %v64_v59  ;;  %v80_v59 = vld [vmem:[%s9228_s27 + $0xa8] sm:$0xff] }
  0x53   :  { %4642 = vmatmul.msk.f32.gmra.mxu0 %vm172_vm0, %v121_v60  ;;  %4674 = vmatmul.msk.f32.gmra.mxu1 %vm172_vm0, %v121_v60 }
  0x54   :  { %4706 = vmatmul.msk.f32.gmra.mxu2 %vm172_vm0, %v65_v61  ;;  %4738 = vmatmul.msk.f32.gmra.mxu3 %vm172_vm0, %v65_v61 }
  0x5b   :  { %4643 = vmatmul.msk.f32.gmra.mxu0 %vm172_vm0, %v122_v62  ;;  %4675 = vmatmul.msk.f32.gmra.mxu1 %vm172_vm0, %v122_v62 }
  0x5c   :  { %4707 = vmatmul.msk.f32.gmra.mxu2 %vm172_vm0, %v66_v63  ;;  %4739 = vmatmul.msk.f32.gmra.mxu3 %vm172_vm0, %v66_v63 }
  0x63   :  { %4644 = vmatmul.msk.f32.gmra.mxu0 %vm172_vm0, %v123_v0  ;;  %4676 = vmatmul.msk.f32.gmra.mxu1 %vm172_vm0, %v123_v0 }
  0x64   :  { %4708 = vmatmul.msk.f32.gmra.mxu2 %vm172_vm0, %v67_v1  ;;  %4740 = vmatmul.msk.f32.gmra.mxu3 %vm172_vm0, %v67_v1 }
  0x6b   :  { %4645 = vmatmul.msk.f32.gmra.mxu0 %vm172_vm0, %v124_v2  ;;  %4677 = vmatmul.msk.f32.gmra.mxu1 %vm172_vm0, %v124_v2  ;;  %v137_v2 = vld [vmem:[%s9228_s27 + $0xb1] sm:$0xff] }
  0x6c   :  { %4709 = vmatmul.msk.f32.gmra.mxu2 %vm172_vm0, %v68_v3  ;;  %4741 = vmatmul.msk.f32.gmra.mxu3 %vm172_vm0, %v68_v3  ;;  %v81_v3 = vld [vmem:[%s9228_s27 + $0xb0] sm:$0xff] }
  0x73   :  { %4646 = vmatmul.msk.f32.gmra.mxu0 %vm172_vm0, %v125_v4  ;;  %4678 = vmatmul.msk.f32.gmra.mxu1 %vm172_vm0, %v125_v4 }
  0x74   :  { %4710 = vmatmul.msk.f32.gmra.mxu2 %vm172_vm0, %v69_v5  ;;  %4742 = vmatmul.msk.f32.gmra.mxu3 %vm172_vm0, %v69_v5 }
  0x7b   :  { %4647 = vmatmul.msk.f32.gmra.mxu0 %vm172_vm0, %v126_v6  ;;  %4679 = vmatmul.msk.f32.gmra.mxu1 %vm172_vm0, %v126_v6 }
  0x7c   :  { %4711 = vmatmul.msk.f32.gmra.mxu2 %vm172_vm0, %v70_v7  ;;  %4743 = vmatmul.msk.f32.gmra.mxu3 %vm172_vm0, %v70_v7 }
  0x83   :  { %4648 = vmatmul.msk.f32.gmra.mxu0 %vm172_vm0, %v127_v8  ;;  %4680 = vmatmul.msk.f32.gmra.mxu1 %vm172_vm0, %v127_v8 }
  0x84   :  { %4712 = vmatmul.msk.f32.gmra.mxu2 %vm172_vm0, %v71_v9  ;;  %4744 = vmatmul.msk.f32.gmra.mxu3 %vm172_vm0, %v71_v9 }
  0x8b   :  { %4649 = vmatmul.msk.f32.gmra.mxu0 %vm172_vm0, %v128_v10  ;;  %4681 = vmatmul.msk.f32.gmra.mxu1 %vm172_vm0, %v128_v10  ;;  %v138_v10 = vld [vmem:[%s9228_s27 + $0xb9] sm:$0xff] }
  0x8c   :  { %4713 = vmatmul.msk.f32.gmra.mxu2 %vm172_vm0, %v72_v11  ;;  %4745 = vmatmul.msk.f32.gmra.mxu3 %vm172_vm0, %v72_v11  ;;  %v82_v11 = vld [vmem:[%s9228_s27 + $0xb8] sm:$0xff] }
  0x93   :  { %4650 = vmatmul.msk.f32.gmra.mxu0 %vm172_vm0, %v129_v12  ;;  %4682 = vmatmul.msk.f32.gmra.mxu1 %vm172_vm0, %v129_v12 }
  0x94   :  { %4714 = vmatmul.msk.f32.gmra.mxu2 %vm172_vm0, %v73_v13  ;;  %4746 = vmatmul.msk.f32.gmra.mxu3 %vm172_vm0, %v73_v13 }
  0x9b   :  { %4651 = vmatmul.msk.f32.gmra.mxu0 %vm172_vm0, %v130_v14  ;;  %4683 = vmatmul.msk.f32.gmra.mxu1 %vm172_vm0, %v130_v14 }
  0x9c   :  { %4715 = vmatmul.msk.f32.gmra.mxu2 %vm172_vm0, %v74_v15  ;;  %4747 = vmatmul.msk.f32.gmra.mxu3 %vm172_vm0, %v74_v15 }
  0xa0   :  { %v286_v16 = vpop.f32.mrf.mxu0  ;;  %v399_v17 = vpop.f32.mrf.mxu1 }
  0xa3   :  { %4652 = vmatmul.msk.f32.gmra.mxu0 %vm172_vm0, %v131_v18  ;;  %4684 = vmatmul.msk.f32.gmra.mxu1 %vm172_vm0, %v131_v18  ;;  %v139_v18 = vld [vmem:[%s9228_s27 + $0xc1] sm:$0xff] }
  0xa4   :  { %4716 = vmatmul.msk.f32.gmra.mxu2 %vm172_vm0, %v75_v19  ;;  %4748 = vmatmul.msk.f32.gmra.mxu3 %vm172_vm0, %v75_v19  ;;  %v83_v19 = vld [vmem:[%s9228_s27 + $0xc0] sm:$0xff] }
  0xa7   :  { %v608_v20 = vpop.f32.mrf.mxu2  ;;  %v721_v21 = vpop.f32.mrf.mxu3 }
  0xa8   :  { %v5807_v22 = vadd.f32 %v608_v20, %v286_v16  ;;  %v5809_v23 = vadd.f32 %v721_v21, %v399_v17  ;;  %v289_v24 = vpop.f32.mrf.mxu0  ;;  %v402_v25 = vpop.f32.mrf.mxu1  ;;  %v4786_v20 = vld [vmem:[%s9227_s29 + $0x230] sm:$0xff] }
  0xa9   :  { %974 = vmatpush.msrb.mxu0 %v4786_v20  ;;  %v4774_v20 = vld [vmem:[%s9227_s29 + $0x1d0] sm:$0xff] }
  0xab   :  { %4653 = vmatmul.msk.f32.gmra.mxu0 %vm172_vm0, %v132_v26  ;;  %4685 = vmatmul.msk.f32.gmra.mxu1 %vm172_vm0, %v132_v26 }
  0xac   :  { %4717 = vmatmul.msk.f32.gmra.mxu2 %vm172_vm0, %v76_v27  ;;  %4749 = vmatmul.msk.f32.gmra.mxu3 %vm172_vm0, %v76_v27 }
  0xaf   :  { %v611_v28 = vpop.f32.mrf.mxu2  ;;  %v724_v29 = vpop.f32.mrf.mxu3 }
  0xb0   :  { %v5821_v30 = vadd.f32 %v611_v28, %v289_v24  ;;  %v5823_v31 = vadd.f32 %v724_v29, %v402_v25  ;;  %v292_v32 = vpop.f32.mrf.mxu0  ;;  %v405_v33 = vpop.f32.mrf.mxu1  ;;  %v140_v29 = vld [vmem:[%s9228_s27 + $0xc9] sm:$0xff] }
  0xb3   :  { %4654 = vmatmul.msk.f32.gmra.mxu0 %vm172_vm0, %v133_v34  ;;  %4686 = vmatmul.msk.f32.gmra.mxu1 %vm172_vm0, %v133_v34  ;;  %v4874_v34 = vld [vmem:[%s9227_s29 + $0x2f0] sm:$0xff] }
  0xb4   :  { %4718 = vmatmul.msk.f32.gmra.mxu2 %vm172_vm0, %v77_v35  ;;  %4750 = vmatmul.msk.f32.gmra.mxu3 %vm172_vm0, %v77_v35  ;;  %v4875_v35 = vld [vmem:[%s9227_s29 + $0x2f8] sm:$0xff] }
  0xb5   :  { %1417 = vmatpush.msrb.mxu2 %v4874_v34  ;;  %1530 = vmatpush.msrb.mxu3 %v4875_v35  ;;  %v4770_v34 = vld [vmem:[%s9227_s29 + $0x1b0] sm:$0xff]  ;;  %v4771_v35 = vld [vmem:[%s9227_s29 + $0x1b8] sm:$0xff] }
  0xb7   :  { %v614_v36 = vpop.f32.mrf.mxu2  ;;  %v727_v37 = vpop.f32.mrf.mxu3 }
  0xb8   :  { %v5835_v38 = vadd.f32 %v614_v36, %v292_v32  ;;  %v5837_v39 = vadd.f32 %v727_v37, %v405_v33  ;;  %v295_v40 = vpop.f32.mrf.mxu0  ;;  %v408_v41 = vpop.f32.mrf.mxu1  ;;  %v84_v32 = vld [vmem:[%s9228_s27 + $0xc8] sm:$0xff]  ;;  %v4787_v33 = vld [vmem:[%s9227_s29 + $0x238] sm:$0xff]  ;;  %v4784_v36 = vld [vmem:[%s9227_s29 + $0x220] sm:$0xff] }
  0xb9   :  { %1087 = vmatpush.msrb.mxu1 %v4787_v33  ;;  %v4785_v37 = vld [vmem:[%s9227_s29 + $0x228] sm:$0xff]  ;;  %975 = vmatpush.msrb.mxu0 %v4784_v36 }
  0xba   :  { %v4861_v33 = vld [vmem:[%s9227_s29 + $0x288] sm:$0xff] }
  0xbb   :  { %4655 = vmatmul.msk.f32.gmra.mxu0 %vm172_vm0, %v134_v42  ;;  %4687 = vmatmul.msk.f32.gmra.mxu1 %vm172_vm0, %v134_v42 }
  0xbc   :  { %4719 = vmatmul.msk.f32.gmra.mxu2 %vm172_vm0, %v78_v43  ;;  %4751 = vmatmul.msk.f32.gmra.mxu3 %vm172_vm0, %v78_v43  ;;  %v141_v43 = vld [vmem:[%s9228_s27 + $0xd1] sm:$0xff] }
  0xbd   :  { %1088 = vmatpush.msrb.mxu1 %v4785_v37 }
  0xbf   :  { %v617_v44 = vpop.f32.mrf.mxu2  ;;  %v730_v45 = vpop.f32.mrf.mxu3 }
  0xc0   :  { %v5849_v46 = vadd.f32 %v617_v44, %v295_v40  ;;  %v5851_v47 = vadd.f32 %v730_v45, %v408_v41  ;;  %v298_v48 = vpop.f32.mrf.mxu0  ;;  %v411_v49 = vpop.f32.mrf.mxu1  ;;  %v4872_v40 = vld [vmem:[%s9227_s29 + $0x2e0] sm:$0xff]  ;;  %v4873_v44 = vld [vmem:[%s9227_s29 + $0x2e8] sm:$0xff] }
  0xc1   :  { %1418 = vmatpush.msrb.mxu2 %v4872_v40  ;;  %1531 = vmatpush.msrb.mxu3 %v4873_v44  ;;  %v4858_v40 = vld [vmem:[%s9227_s29 + $0x270] sm:$0xff] }
  0xc3   :  { %4656 = vmatmul.msk.f32.gmra.mxu0 %vm172_vm0, %v135_v50  ;;  %4688 = vmatmul.msk.f32.gmra.mxu1 %vm172_vm0, %v135_v50 }
  0xc4   :  { %4720 = vmatmul.msk.f32.gmra.mxu2 %vm172_vm0, %v79_v51  ;;  %4752 = vmatmul.msk.f32.gmra.mxu3 %vm172_vm0, %v79_v51  ;;  %v4782_v51 = vld [vmem:[%s9227_s29 + $0x210] sm:$0xff] }
  0xc5   :  { %976 = vmatpush.msrb.mxu0 %v4782_v51  ;;  %v87_v51 = vld [vmem:[%s9228_s27 + $0xe0] sm:$0xff] }
  0xc7   :  { %v620_v52 = vpop.f32.mrf.mxu2  ;;  %v733_v53 = vpop.f32.mrf.mxu3 }
  0xc8   :  { %v5863_v54 = vadd.f32 %v620_v52, %v298_v48  ;;  %v5865_v55 = vadd.f32 %v733_v53, %v411_v49  ;;  %v301_v56 = vpop.f32.mrf.mxu0  ;;  %v414_v57 = vpop.f32.mrf.mxu1  ;;  %v4783_v52 = vld [vmem:[%s9227_s29 + $0x218] sm:$0xff]  ;;  %v4870_v53 = vld [vmem:[%s9227_s29 + $0x2d0] sm:$0xff] }
  0xc9   :  { %1089 = vmatpush.msrb.mxu1 %v4783_v52  ;;  %1419 = vmatpush.msrb.mxu2 %v4870_v53  ;;  %v4768_v52 = vld [vmem:[%s9227_s29 + $0x1a0] sm:$0xff]  ;;  %v4769_v53 = vld [vmem:[%s9227_s29 + $0x1a8] sm:$0xff] }
  0xcb   :  { %4657 = vmatmul.msk.f32.gmra.mxu0 %vm172_vm0, %v136_v58  ;;  %4689 = vmatmul.msk.f32.gmra.mxu1 %vm172_vm0, %v136_v58  ;;  %v4780_v58 = vld [vmem:[%s9227_s29 + $0x200] sm:$0xff] }
  0xcc   :  { %4721 = vmatmul.msk.f32.gmra.mxu2 %vm172_vm0, %v80_v59  ;;  %4753 = vmatmul.msk.f32.gmra.mxu3 %vm172_vm0, %v80_v59  ;;  %v4781_v59 = vld [vmem:[%s9227_s29 + $0x208] sm:$0xff] }
  0xcd   :  { %977 = vmatpush.msrb.mxu0 %v4780_v58  ;;  %1090 = vmatpush.msrb.mxu1 %v4781_v59  ;;  %v4766_v58 = vld [vmem:[%s9227_s29 + $0x190] sm:$0xff]  ;;  %v4767_v59 = vld [vmem:[%s9227_s29 + $0x198] sm:$0xff] }
  0xcf   :  { %v623_v60 = vpop.f32.mrf.mxu2  ;;  %v736_v61 = vpop.f32.mrf.mxu3 }
  0xd0   :  { %v5877_v62 = vadd.f32 %v623_v60, %v301_v56  ;;  %v5879_v63 = vadd.f32 %v736_v61, %v414_v57  ;;  %v304_v0 = vpop.f32.mrf.mxu0  ;;  %v417_v1 = vpop.f32.mrf.mxu1  ;;  %v85_v56 = vld [vmem:[%s9228_s27 + $0xd0] sm:$0xff]  ;;  %v4871_v57 = vld [vmem:[%s9227_s29 + $0x2d8] sm:$0xff]  ;;  %v4868_v60 = vld [vmem:[%s9227_s29 + $0x2c0] sm:$0xff] }
  0xd1   :  { %1532 = vmatpush.msrb.mxu3 %v4871_v57  ;;  %v4869_v61 = vld [vmem:[%s9227_s29 + $0x2c8] sm:$0xff]  ;;  %1420 = vmatpush.msrb.mxu2 %v4868_v60  ;;  %v4854_v60 = vld [vmem:[%s9227_s29 + $0x250] sm:$0xff] }
  0xd2   :  { %v4857_v57 = vld [vmem:[%s9227_s29 + $0x268] sm:$0xff] }
  0xd3   :  { %4658 = vmatmul.msk.f32.gmra.mxu0 %vm172_vm0, %v137_v2  ;;  %4690 = vmatmul.msk.f32.gmra.mxu1 %vm172_vm0, %v137_v2  ;;  %v4866_v2 = vld [vmem:[%s9227_s29 + $0x2b0] sm:$0xff] }
  0xd4   :  { %4722 = vmatmul.msk.f32.gmra.mxu2 %vm172_vm0, %v81_v3  ;;  %4754 = vmatmul.msk.f32.gmra.mxu3 %vm172_vm0, %v81_v3  ;;  %v4867_v3 = vld [vmem:[%s9227_s29 + $0x2b8] sm:$0xff] }
  0xd5   :  { %1533 = vmatpush.msrb.mxu3 %v4869_v61  ;;  %1421 = vmatpush.msrb.mxu2 %v4866_v2  ;;  %v4855_v61 = vld [vmem:[%s9227_s29 + $0x258] sm:$0xff] }
  0xd7   :  { %v626_v4 = vpop.f32.mrf.mxu2  ;;  %v739_v5 = vpop.f32.mrf.mxu3  ;;  %1534 = vmatpush.msrb.mxu3 %v4867_v3 }
  0xd8   :  { %v5891_v6 = vadd.f32 %v626_v4, %v304_v0  ;;  %v5893_v7 = vadd.f32 %v739_v5, %v417_v1  ;;  %v307_v8 = vpop.f32.mrf.mxu0  ;;  %v420_v9 = vpop.f32.mrf.mxu1  ;;  %v4778_v0 = vld [vmem:[%s9227_s29 + $0x1f0] sm:$0xff]  ;;  %v4779_v1 = vld [vmem:[%s9227_s29 + $0x1f8] sm:$0xff]  ;;  %v4776_v4 = vld [vmem:[%s9227_s29 + $0x1e0] sm:$0xff] }
  0xd9   :  { %v4777_v5 = vld [vmem:[%s9227_s29 + $0x1e8] sm:$0xff]  ;;  %978 = vmatpush.msrb.mxu0 %v4778_v0  ;;  %1091 = vmatpush.msrb.mxu1 %v4779_v1  ;;  %v4764_v0 = vld [vmem:[%s9227_s29 + $0x180] sm:$0xff] }
  0xda   :  { %v4765_v1 = vld [vmem:[%s9227_s29 + $0x188] sm:$0xff] }
  0xdb   :  { %4659 = vmatmul.msk.f32.gmra.mxu0 %vm172_vm0, %v138_v10  ;;  %4691 = vmatmul.msk.f32.gmra.mxu1 %vm172_vm0, %v138_v10  ;;  %v4864_v10 = vld [vmem:[%s9227_s29 + $0x2a0] sm:$0xff] }
  0xdc   :  { %4723 = vmatmul.msk.f32.gmra.mxu2 %vm172_vm0, %v82_v11  ;;  %4755 = vmatmul.msk.f32.gmra.mxu3 %vm172_vm0, %v82_v11  ;;  %v4865_v11 = vld [vmem:[%s9227_s29 + $0x2a8] sm:$0xff] }
  0xdd   :  { %979 = vmatpush.msrb.mxu0 %v4776_v4  ;;  %1092 = vmatpush.msrb.mxu1 %v4777_v5  ;;  %v4852_v4 = vld [vmem:[%s9227_s29 + $0x240] sm:$0xff]  ;;  %v4853_v5 = vld [vmem:[%s9227_s29 + $0x248] sm:$0xff] }
  0xde   :  { %1422 = vmatpush.msrb.mxu2 %v4864_v10  ;;  %1535 = vmatpush.msrb.mxu3 %v4865_v11 }
  0xdf   :  { %v629_v12 = vpop.f32.mrf.mxu2  ;;  %v742_v13 = vpop.f32.mrf.mxu3  ;;  %980 = vmatpush.msrb.mxu0 %v4774_v20 }
  0xe0   :  { %v5905_v14 = vadd.f32 %v629_v12, %v307_v8  ;;  %v5907_v15 = vadd.f32 %v742_v13, %v420_v9  ;;  %v310_v16 = vpop.f32.mrf.mxu0  ;;  %v423_v17 = vpop.f32.mrf.mxu1 }
  0xe3   :  { %4660 = vmatmul.msk.f32.gmra.mxu0 %vm172_vm0, %v139_v18  ;;  %4692 = vmatmul.msk.f32.gmra.mxu1 %vm172_vm0, %v139_v18  ;;  %v142_v18 = vld [vmem:[%s9228_s27 + $0xd9] sm:$0xff] }
  0xe4   :  { %4724 = vmatmul.msk.f32.gmra.mxu2 %vm172_vm0, %v83_v19  ;;  %4756 = vmatmul.msk.f32.gmra.mxu3 %vm172_vm0, %v83_v19  ;;  %v86_v19 = vld [vmem:[%s9228_s27 + $0xd8] sm:$0xff] }
  0xe7   :  { %v632_v21 = vpop.f32.mrf.mxu2  ;;  %v745_v24 = vpop.f32.mrf.mxu3 }
  0xe8   :  { %v5922_v25 = vadd.f32 %v632_v21, %v310_v16  ;;  %v5924_v26 = vadd.f32 %v745_v24, %v423_v17  ;;  %v313_v27 = vpop.f32.mrf.mxu0  ;;  %v426_v28 = vpop.f32.mrf.mxu1  ;;  %v4775_v21 = vld [vmem:[%s9227_s29 + $0x1d8] sm:$0xff]  ;;  %v4862_v24 = vld [vmem:[%s9227_s29 + $0x290] sm:$0xff] }
  0xe9   :  { %1093 = vmatpush.msrb.mxu1 %v4775_v21  ;;  %1423 = vmatpush.msrb.mxu2 %v4862_v24 }
  0xea   :  { %9229 = vst [vmem:[#allocation2_spill] sm:$0xff] %v5924_v26 }
  0xeb   :  { %4661 = vmatmul.msk.f32.gmra.mxu0 %vm172_vm0, %v140_v29  ;;  %4693 = vmatmul.msk.f32.gmra.mxu1 %vm172_vm0, %v140_v29  ;;  %v4773_v29 = vld [vmem:[%s9227_s29 + $0x1c8] sm:$0xff] }
  0xec   :  { %4725 = vmatmul.msk.f32.gmra.mxu2 %vm172_vm0, %v84_v32  ;;  %4757 = vmatmul.msk.f32.gmra.mxu3 %vm172_vm0, %v84_v32  ;;  %v4860_v32 = vld [vmem:[%s9227_s29 + $0x280] sm:$0xff] }
  0xed   :  { %1094 = vmatpush.msrb.mxu1 %v4773_v29  ;;  %1424 = vmatpush.msrb.mxu2 %v4860_v32  ;;  %v89_v29 = vld [vmem:[%s9228_s27 + $0xf0] sm:$0xff] }
  0xef   :  { %v635_v41 = vpop.f32.mrf.mxu2  ;;  %v748_v42 = vpop.f32.mrf.mxu3  ;;  %1095 = vmatpush.msrb.mxu1 %v4771_v35  ;;  %1425 = vmatpush.msrb.mxu2 %v4858_v40  ;;  %v146_v40 = vld [vmem:[%s9228_s27 + $0xf9] sm:$0xf] }
  0xf0   :  { %v5960_v45 = vadd.f32 %v635_v41, %v313_v27  ;;  %v5962_v48 = vadd.f32 %v748_v42, %v426_v28  ;;  %v316_v49 = vpop.f32.mrf.mxu0  ;;  %v429_v50 = vpop.f32.mrf.mxu1  ;;  %v4863_v27 = vld [vmem:[%s9227_s29 + $0x298] sm:$0xff]  ;;  %v4772_v28 = vld [vmem:[%s9227_s29 + $0x1c0] sm:$0xff] }
  0xf1   :  { %1536 = vmatpush.msrb.mxu3 %v4863_v27  ;;  %981 = vmatpush.msrb.mxu0 %v4772_v28  ;;  %v4859_v41 = vld [vmem:[%s9227_s29 + $0x278] sm:$0xff] }
  0xf2   :  { %9230 = vst [vmem:[#allocation3_spill] sm:$0xff] %v5962_v48  ;;  %1096 = vmatpush.msrb.mxu1 %v4769_v53  ;;  %v145_v28 = vld [vmem:[%s9228_s27 + $0xf1] sm:$0xff] }
  0xf3   :  { %4662 = vmatmul.msk.f32.gmra.mxu0 %vm172_vm0, %v141_v43  ;;  %4694 = vmatmul.msk.f32.gmra.mxu1 %vm172_vm0, %v141_v43 }
  0xf4   :  { %4726 = vmatmul.msk.f32.gmra.mxu2 %vm172_vm0, %v85_v56  ;;  %4758 = vmatmul.msk.f32.gmra.mxu3 %vm172_vm0, %v85_v56  ;;  %v4856_v56 = vld [vmem:[%s9227_s29 + $0x260] sm:$0xff] }
  0xf5   :  { %1537 = vmatpush.msrb.mxu3 %v4861_v33  ;;  %982 = vmatpush.msrb.mxu0 %v4770_v34 }
  0xf6   :  { %1426 = vmatpush.msrb.mxu2 %v4856_v56  ;;  %1097 = vmatpush.msrb.mxu1 %v4767_v59  ;;  %v817_v56 = vld [vmem:[%s9228_s27 + $0x2] sm:$0xff] }
  0xf7   :  { %v638_v8 = vpop.f32.mrf.mxu2  ;;  %v751_v9 = vpop.f32.mrf.mxu3  ;;  %1538 = vmatpush.msrb.mxu3 %v4859_v41  ;;  %983 = vmatpush.msrb.mxu0 %v4768_v52  ;;  %v90_v41 = vld [vmem:[%s9228_s27 + $0xf8] sm:$0xf] }
  0xf8   :  { %v6019_v12 = vadd.f32 %v638_v8, %v316_v49  ;;  %v6021_v13 = vadd.f32 %v751_v9, %v429_v50  ;;  %v319_v16 = vpop.f32.mrf.mxu0  ;;  %v432_v17 = vpop.f32.mrf.mxu1  ;;  %v143_v50 = vld [vmem:[%s9228_s27 + $0xe1] sm:$0xff]  ;;  %1427 = vmatpush.msrb.mxu2 %v4854_v60  ;;  %1098 = vmatpush.msrb.mxu1 %v4765_v1 }
  0xf9   :  { %1539 = vmatpush.msrb.mxu3 %v4857_v57  ;;  %984 = vmatpush.msrb.mxu0 %v4766_v58  ;;  %v1260_v57 = vld [vmem:[%s9228_s27 + $0x3] sm:$0xff] }
  0xfa   :  { %9231 = vst [vmem:[#allocation4_spill] sm:$0xff] %v6021_v13  ;;  %1428 = vmatpush.msrb.mxu2 %v4852_v4 }
  0xfb   :  { %4663 = vmatmul.msk.f32.gmra.mxu0 %vm172_vm0, %v142_v18  ;;  %4695 = vmatmul.msk.f32.gmra.mxu1 %vm172_vm0, %v142_v18 }
  0xfc   :  { %4727 = vmatmul.msk.f32.gmra.mxu2 %vm172_vm0, %v86_v19  ;;  %4759 = vmatmul.msk.f32.gmra.mxu3 %vm172_vm0, %v86_v19 }
  0xfd   :  { %1540 = vmatpush.msrb.mxu3 %v4855_v61  ;;  %985 = vmatpush.msrb.mxu0 %v4764_v0 }
  0xff   :  { %v641_v36 = vpop.f32.mrf.mxu2  ;;  %v754_v37 = vpop.f32.mrf.mxu3  ;;  %1541 = vmatpush.msrb.mxu3 %v4853_v5 }
 0x100   :  { %v6069_v42 = vadd.f32 %v641_v36, %v319_v16  ;;  %v6071_v43 = vadd.f32 %v754_v37, %v432_v17  ;;  %v322_v44 = vpop.f32.mrf.mxu0  ;;  %v435_v49 = vpop.f32.mrf.mxu1  ;;  %v144_v16 = vld [vmem:[%s9228_s27 + $0xe9] sm:$0xff] }
 0x101   :  { %v88_v17 = vld [vmem:[%s9228_s27 + $0xe8] sm:$0xff] }
 0x102   :  { %9232 = vst [vmem:[#allocation5_spill] sm:$0xff] %v6071_v43 }
 0x103   :  { %4664 = vmatmul.msk.f32.gmra.mxu0 %vm172_vm0, %v143_v50  ;;  %4696 = vmatmul.msk.f32.gmra.mxu1 %vm172_vm0, %v143_v50 }
 0x104   :  { %4728 = vmatmul.msk.f32.gmra.mxu2 %vm172_vm0, %v87_v51  ;;  %4760 = vmatmul.msk.f32.gmra.mxu3 %vm172_vm0, %v87_v51 }
 0x107   :  { %v644_v2 = vpop.f32.mrf.mxu2  ;;  %v757_v3 = vpop.f32.mrf.mxu3 }
 0x108   :  { %v6119_v8 = vadd.f32 %v644_v2, %v322_v44  ;;  %v6121_v9 = vadd.f32 %v757_v3, %v435_v49  ;;  %v325_v10 = vpop.f32.mrf.mxu0  ;;  %v438_v11 = vpop.f32.mrf.mxu1  ;;  %v818_v2 = vld [vmem:[%s9228_s27 + $0xa] sm:$0xff] }
 0x109   :  { %v1261_v3 = vld [vmem:[%s9228_s27 + $0xb] sm:$0xff] }
 0x10a   :  { %9233 = vst [vmem:[#allocation6_spill] sm:$0xff] %v6121_v9 }
 0x10b   :  { %4665 = vmatmul.msk.f32.gmra.mxu0 %vm172_vm0, %v144_v16  ;;  %4697 = vmatmul.msk.f32.gmra.mxu1 %vm172_vm0, %v144_v16 }
 0x10c   :  { %4729 = vmatmul.msk.f32.gmra.mxu2 %vm172_vm0, %v88_v17  ;;  %4761 = vmatmul.msk.f32.gmra.mxu3 %vm172_vm0, %v88_v17 }
 0x10f   :  { %v647_v18 = vpop.f32.mrf.mxu2  ;;  %v760_v19 = vpop.f32.mrf.mxu3 }
 0x110   :  { %v6133_v20 = vadd.f32 %v647_v18, %v325_v10  ;;  %v6135_v21 = vadd.f32 %v760_v19, %v438_v11  ;;  %v328_v24 = vpop.f32.mrf.mxu0  ;;  %v441_v27 = vpop.f32.mrf.mxu1  ;;  %v819_v18 = vld [vmem:[%s9228_s27 + $0x12] sm:$0xff] }
 0x111   :  { %v1262_v19 = vld [vmem:[%s9228_s27 + $0x13] sm:$0xff] }
 0x113   :  { %4666 = vmatmul.msk.f32.gmra.mxu0 %vm172_vm0, %v145_v28  ;;  %4698 = vmatmul.msk.f32.gmra.mxu1 %vm172_vm0, %v145_v28 }
 0x114   :  { %4730 = vmatmul.msk.f32.gmra.mxu2 %vm172_vm0, %v89_v29  ;;  %4762 = vmatmul.msk.f32.gmra.mxu3 %vm172_vm0, %v89_v29 }
 0x117   :  { %v650_v32 = vpop.f32.mrf.mxu2  ;;  %v763_v33 = vpop.f32.mrf.mxu3 }
 0x118   :  { %v6147_v34 = vadd.f32 %v650_v32, %v328_v24  ;;  %v6149_v35 = vadd.f32 %v763_v33, %v441_v27  ;;  %v331_v36 = vpop.f32.mrf.mxu0  ;;  %v444_v37 = vpop.f32.mrf.mxu1 }
 0x11b   :  { %4667 = vmatmul.msk.f32.gmra.mxu0 %vm172_vm0, %v146_v40  ;;  %4699 = vmatmul.msk.f32.gmra.mxu1 %vm172_vm0, %v146_v40 }
 0x11c   :  { %4731 = vmatmul.msk.f32.gmra.mxu2 %vm172_vm0, %v90_v41  ;;  %4763 = vmatmul.msk.f32.gmra.mxu3 %vm172_vm0, %v90_v41 }
 0x11f   :  { %v653_v44 = vpop.f32.mrf.mxu2  ;;  %v766_v49 = vpop.f32.mrf.mxu3 }
 0x120   :  { %v6161_v50 = vadd.f32 %v653_v44, %v331_v36  ;;  %v6163_v51 = vadd.f32 %v766_v49, %v444_v37  ;;  %v334_v52 = vpop.f32.mrf.mxu0  ;;  %v447_v53 = vpop.f32.mrf.mxu1  ;;  %v820_v36 = vld [vmem:[%s9228_s27 + $0x1a] sm:$0xff] }
 0x121   :  { %v1263_v37 = vld [vmem:[%s9228_s27 + $0x1b] sm:$0xff] }
 0x123   :  { %4788 = vmatmul.msk.f32.vlgmr.msrb.gmra.mxu0 %vm172_vm0, %v817_v56  ;;  %4820 = vmatmul.msk.f32.vlgmr.msrb.gmra.mxu1 %vm172_vm0, %v817_v56  ;;  %v821_v56 = vld [vmem:[%s9228_s27 + $0x22] sm:$0xff] }
 0x124   :  { %4876 = vmatmul.msk.f32.vlgmr.msrb.gmra.mxu2 %vm172_vm0, %v1260_v57  ;;  %4908 = vmatmul.msk.f32.vlgmr.msrb.gmra.mxu3 %vm172_vm0, %v1260_v57  ;;  %v1264_v57 = vld [vmem:[%s9228_s27 + $0x23] sm:$0xff] }
 0x127   :  { %v656_v58 = vpop.f32.mrf.mxu2  ;;  %v769_v59 = vpop.f32.mrf.mxu3 }
 0x128   :  { %v6175_v60 = vadd.f32 %v656_v58, %v334_v52  ;;  %v6177_v61 = vadd.f32 %v769_v59, %v447_v53  ;;  %v337_v0 = vpop.f32.mrf.mxu0  ;;  %v450_v1 = vpop.f32.mrf.mxu1 }
 0x12a   :  { %9234 = vst [vmem:[#allocation7_spill] sm:$0xff] %v6175_v60  ;;  %v845_v60 = vld [vmem:[%s9228_s27 + $0xe2] sm:$0xff] }
 0x12b   :  { %9235 = vst [vmem:[#allocation8_spill] sm:$0xff] %v6177_v61  ;;  %4789 = vmatmul.msk.f32.gmra.mxu0 %vm172_vm0, %v818_v2  ;;  %4821 = vmatmul.msk.f32.gmra.mxu1 %vm172_vm0, %v818_v2  ;;  %v829_v61 = vld [vmem:[%s9228_s27 + $0x62] sm:$0xff] }
 0x12c   :  { %4877 = vmatmul.msk.f32.gmra.mxu2 %vm172_vm0, %v1261_v3  ;;  %4909 = vmatmul.msk.f32.gmra.mxu3 %vm172_vm0, %v1261_v3 }
 0x12f   :  { %v659_v4 = vpop.f32.mrf.mxu2  ;;  %v772_v5 = vpop.f32.mrf.mxu3 }
 0x130   :  { %v6189_v10 = vadd.f32 %v659_v4, %v337_v0  ;;  %v6191_v11 = vadd.f32 %v772_v5, %v450_v1  ;;  %v340_v16 = vpop.f32.mrf.mxu0  ;;  %v453_v17 = vpop.f32.mrf.mxu1  ;;  %v822_v4 = vld [vmem:[%s9228_s27 + $0x2a] sm:$0xff] }
 0x131   :  { %v1265_v5 = vld [vmem:[%s9228_s27 + $0x2b] sm:$0xff] }
 0x132   :  { %9236 = vst [vmem:[#allocation9_spill] sm:$0xff] %v6189_v10 }
 0x133   :  { %9237 = vst [vmem:[#allocation10_spill] sm:$0xff] %v6191_v11  ;;  %4790 = vmatmul.msk.f32.gmra.mxu0 %vm172_vm0, %v819_v18  ;;  %4822 = vmatmul.msk.f32.gmra.mxu1 %vm172_vm0, %v819_v18 }
 0x134   :  { %4878 = vmatmul.msk.f32.gmra.mxu2 %vm172_vm0, %v1262_v19  ;;  %4910 = vmatmul.msk.f32.gmra.mxu3 %vm172_vm0, %v1262_v19 }
 0x137   :  { %v662_v24 = vpop.f32.mrf.mxu2  ;;  %v775_v27 = vpop.f32.mrf.mxu3 }
 0x138   :  { %v6203_v28 = vadd.f32 %v662_v24, %v340_v16  ;;  %v6205_v29 = vadd.f32 %v775_v27, %v453_v17  ;;  %v343_v32 = vpop.f32.mrf.mxu0  ;;  %v456_v33 = vpop.f32.mrf.mxu1 }
 0x13a   :  { %9238 = vst [vmem:[#allocation11_spill] sm:$0xff] %v6203_v28  ;;  %v846_v28 = vld [vmem:[%s9228_s27 + $0xea] sm:$0xff] }
 0x13b   :  { %9239 = vst [vmem:[#allocation12_spill] sm:$0xff] %v6205_v29  ;;  %4791 = vmatmul.msk.f32.gmra.mxu0 %vm172_vm0, %v820_v36  ;;  %4823 = vmatmul.msk.f32.gmra.mxu1 %vm172_vm0, %v820_v36  ;;  %v830_v29 = vld [vmem:[%s9228_s27 + $0x6a] sm:$0xff] }
 0x13c   :  { %4879 = vmatmul.msk.f32.gmra.mxu2 %vm172_vm0, %v1263_v37  ;;  %4911 = vmatmul.msk.f32.gmra.mxu3 %vm172_vm0, %v1263_v37 }
 0x13f   :  { %v665_v40 = vpop.f32.mrf.mxu2  ;;  %v778_v41 = vpop.f32.mrf.mxu3 }
 0x140   :  { %v6217_v44 = vadd.f32 %v665_v40, %v343_v32  ;;  %v6219_v49 = vadd.f32 %v778_v41, %v456_v33  ;;  %v346_v52 = vpop.f32.mrf.mxu0  ;;  %v459_v53 = vpop.f32.mrf.mxu1  ;;  %v823_v32 = vld [vmem:[%s9228_s27 + $0x32] sm:$0xff] }
 0x141   :  { %v1266_v33 = vld [vmem:[%s9228_s27 + $0x33] sm:$0xff] }
 0x142   :  { %9240 = vst [vmem:[#allocation13_spill] sm:$0xff] %v6217_v44  ;;  %v1291_v44 = vld [vmem:[%s9228_s27 + $0xfb] sm:$0xf] }
 0x143   :  { %9241 = vst [vmem:[#allocation14_spill] sm:$0xff] %v6219_v49  ;;  %4792 = vmatmul.msk.f32.gmra.mxu0 %vm172_vm0, %v821_v56  ;;  %4824 = vmatmul.msk.f32.gmra.mxu1 %vm172_vm0, %v821_v56  ;;  %v824_v56 = vld [vmem:[%s9228_s27 + $0x3a] sm:$0xff] }
 0x144   :  { %4880 = vmatmul.msk.f32.gmra.mxu2 %vm172_vm0, %v1264_v57  ;;  %4912 = vmatmul.msk.f32.gmra.mxu3 %vm172_vm0, %v1264_v57  ;;  %v1267_v57 = vld [vmem:[%s9228_s27 + $0x3b] sm:$0xff] }
 0x147   :  { %v668_v58 = vpop.f32.mrf.mxu2  ;;  %v781_v59 = vpop.f32.mrf.mxu3 }
 0x148   :  { %v6231_v0 = vadd.f32 %v668_v58, %v346_v52  ;;  %v6233_v1 = vadd.f32 %v781_v59, %v459_v53  ;;  %v349_v2 = vpop.f32.mrf.mxu0  ;;  %v462_v3 = vpop.f32.mrf.mxu1 }
 0x14a   :  { %9242 = vst [vmem:[#allocation15_spill] sm:$0xff] %v6231_v0  ;;  %v1703_v0 = vld [vmem:[%s9228_s27 + $0x4] sm:$0xff] }
 0x14b   :  { %9243 = vst [vmem:[#allocation16_spill] sm:$0xff] %v6233_v1  ;;  %4793 = vmatmul.msk.f32.gmra.mxu0 %vm172_vm0, %v822_v4  ;;  %4825 = vmatmul.msk.f32.gmra.mxu1 %vm172_vm0, %v822_v4  ;;  %v831_v1 = vld [vmem:[%s9228_s27 + $0x72] sm:$0xff] }
 0x14c   :  { %4881 = vmatmul.msk.f32.gmra.mxu2 %vm172_vm0, %v1265_v5  ;;  %4913 = vmatmul.msk.f32.gmra.mxu3 %vm172_vm0, %v1265_v5 }
 0x14f   :  { %v671_v16 = vpop.f32.mrf.mxu2  ;;  %v784_v17 = vpop.f32.mrf.mxu3 }
 0x150   :  { %v6245_v18 = vadd.f32 %v671_v16, %v349_v2  ;;  %v6247_v19 = vadd.f32 %v784_v17, %v462_v3  ;;  %v352_v24 = vpop.f32.mrf.mxu0  ;;  %v465_v27 = vpop.f32.mrf.mxu1  ;;  %v825_v16 = vld [vmem:[%s9228_s27 + $0x42] sm:$0xff] }
 0x151   :  { %v1268_v17 = vld [vmem:[%s9228_s27 + $0x43] sm:$0xff] }
 0x152   :  { %9244 = vst [vmem:[#allocation17_spill] sm:$0xff] %v6245_v18 }
 0x153   :  { %9245 = vst [vmem:[#allocation18_spill] sm:$0xff] %v6247_v19  ;;  %4794 = vmatmul.msk.f32.gmra.mxu0 %vm172_vm0, %v823_v32  ;;  %4826 = vmatmul.msk.f32.gmra.mxu1 %vm172_vm0, %v823_v32 }
 0x154   :  { %4882 = vmatmul.msk.f32.gmra.mxu2 %vm172_vm0, %v1266_v33  ;;  %4914 = vmatmul.msk.f32.gmra.mxu3 %vm172_vm0, %v1266_v33 }
 0x157   :  { %v674_v36 = vpop.f32.mrf.mxu2  ;;  %v787_v37 = vpop.f32.mrf.mxu3 }
 0x158   :  { %v6259_v40 = vadd.f32 %v674_v36, %v352_v24  ;;  %v6261_v41 = vadd.f32 %v787_v37, %v465_v27  ;;  %v355_v52 = vpop.f32.mrf.mxu0  ;;  %v468_v53 = vpop.f32.mrf.mxu1 }
 0x15a   :  { %9246 = vst [vmem:[#allocation19_spill] sm:$0xff] %v6259_v40 }
 0x15b   :  { %9247 = vst [vmem:[#allocation20_spill] sm:$0xff] %v6261_v41  ;;  %4795 = vmatmul.msk.f32.gmra.mxu0 %vm172_vm0, %v824_v56  ;;  %4827 = vmatmul.msk.f32.gmra.mxu1 %vm172_vm0, %v824_v56  ;;  %v832_v41 = vld [vmem:[%s9228_s27 + $0x7a] sm:$0xff] }
 0x15c   :  { %4883 = vmatmul.msk.f32.gmra.mxu2 %vm172_vm0, %v1267_v57  ;;  %4915 = vmatmul.msk.f32.gmra.mxu3 %vm172_vm0, %v1267_v57 }
 0x15f   :  { %v677_v58 = vpop.f32.mrf.mxu2  ;;  %v790_v59 = vpop.f32.mrf.mxu3 }
 0x160   :  { %v6273_v2 = vadd.f32 %v677_v58, %v355_v52  ;;  %v6275_v3 = vadd.f32 %v790_v59, %v468_v53  ;;  %v358_v4 = vpop.f32.mrf.mxu0  ;;  %v471_v5 = vpop.f32.mrf.mxu1  ;;  %v826_v52 = vld [vmem:[%s9228_s27 + $0x4a] sm:$0xff] }
 0x161   :  { %v1269_v53 = vld [vmem:[%s9228_s27 + $0x4b] sm:$0xff] }
 0x162   :  { %9248 = vst [vmem:[#allocation21_spill] sm:$0xff] %v6273_v2 }
 0x163   :  { %9249 = vst [vmem:[#allocation22_spill] sm:$0xff] %v6275_v3  ;;  %4796 = vmatmul.msk.f32.gmra.mxu0 %vm172_vm0, %v825_v16  ;;  %4828 = vmatmul.msk.f32.gmra.mxu1 %vm172_vm0, %v825_v16  ;;  %v827_v16 = vld [vmem:[%s9228_s27 + $0x52] sm:$0xff] }
 0x164   :  { %4884 = vmatmul.msk.f32.gmra.mxu2 %vm172_vm0, %v1268_v17  ;;  %4916 = vmatmul.msk.f32.gmra.mxu3 %vm172_vm0, %v1268_v17  ;;  %v1270_v17 = vld [vmem:[%s9228_s27 + $0x53] sm:$0xff] }
 0x167   :  { %v680_v24 = vpop.f32.mrf.mxu2  ;;  %v793_v27 = vpop.f32.mrf.mxu3 }
 0x168   :  { %v6287_v32 = vadd.f32 %v680_v24, %v358_v4  ;;  %v6289_v33 = vadd.f32 %v793_v27, %v471_v5  ;;  %v361_v36 = vpop.f32.mrf.mxu0  ;;  %v474_v37 = vpop.f32.mrf.mxu1 }
 0x16a   :  { %9250 = vst [vmem:[#allocation23_spill] sm:$0xff] %v6287_v32 }
 0x16b   :  { %9251 = vst [vmem:[#allocation24_spill] sm:$0xff] %v6289_v33  ;;  %4797 = vmatmul.msk.f32.gmra.mxu0 %vm172_vm0, %v826_v52  ;;  %4829 = vmatmul.msk.f32.gmra.mxu1 %vm172_vm0, %v826_v52  ;;  %v833_v33 = vld [vmem:[%s9228_s27 + $0x82] sm:$0xff] }
 0x16c   :  { %4885 = vmatmul.msk.f32.gmra.mxu2 %vm172_vm0, %v1269_v53  ;;  %4917 = vmatmul.msk.f32.gmra.mxu3 %vm172_vm0, %v1269_v53 }
 0x16f   :  { %v683_v56 = vpop.f32.mrf.mxu2  ;;  %v796_v57 = vpop.f32.mrf.mxu3 }
 0x170   :  { %v6301_v58 = vadd.f32 %v683_v56, %v361_v36  ;;  %v6303_v59 = vadd.f32 %v796_v57, %v474_v37  ;;  %v364_v4 = vpop.f32.mrf.mxu0  ;;  %v477_v5 = vpop.f32.mrf.mxu1  ;;  %v828_v56 = vld [vmem:[%s9228_s27 + $0x5a] sm:$0xff] }
 0x171   :  { %v1271_v57 = vld [vmem:[%s9228_s27 + $0x5b] sm:$0xff] }
 0x172   :  { %9252 = vst [vmem:[#allocation25_spill] sm:$0xff] %v6301_v58 }
 0x173   :  { %9253 = vst [vmem:[#allocation26_spill] sm:$0xff] %v6303_v59  ;;  %4798 = vmatmul.msk.f32.gmra.mxu0 %vm172_vm0, %v827_v16  ;;  %4830 = vmatmul.msk.f32.gmra.mxu1 %vm172_vm0, %v827_v16 }
 0x174   :  { %4886 = vmatmul.msk.f32.gmra.mxu2 %vm172_vm0, %v1270_v17  ;;  %4918 = vmatmul.msk.f32.gmra.mxu3 %vm172_vm0, %v1270_v17 }
 0x177   :  { %v686_v24 = vpop.f32.mrf.mxu2  ;;  %v799_v27 = vpop.f32.mrf.mxu3 }
 0x178   :  { %v6315_v36 = vadd.f32 %v686_v24, %v364_v4  ;;  %v6317_v37 = vadd.f32 %v799_v27, %v477_v5  ;;  %v367_v52 = vpop.f32.mrf.mxu0  ;;  %v480_v53 = vpop.f32.mrf.mxu1 }
 0x17a   :  { %9254 = vst [vmem:[#allocation27_spill] sm:$0xff] %v6315_v36 }
 0x17b   :  { %9255 = vst [vmem:[#allocation28_spill] sm:$0xff] %v6317_v37  ;;  %4799 = vmatmul.msk.f32.gmra.mxu0 %vm172_vm0, %v828_v56  ;;  %4831 = vmatmul.msk.f32.gmra.mxu1 %vm172_vm0, %v828_v56  ;;  %v1272_v56 = vld [vmem:[%s9228_s27 + $0x63] sm:$0xff] }
 0x17c   :  { %4887 = vmatmul.msk.f32.gmra.mxu2 %vm172_vm0, %v1271_v57  ;;  %4919 = vmatmul.msk.f32.gmra.mxu3 %vm172_vm0, %v1271_v57 }
 0x17f   :  { %v689_v4 = vpop.f32.mrf.mxu2  ;;  %v802_v5 = vpop.f32.mrf.mxu3 }
 0x180   :  { %v6329_v16 = vadd.f32 %v689_v4, %v367_v52  ;;  %v6331_v17 = vadd.f32 %v802_v5, %v480_v53  ;;  %v370_v24 = vpop.f32.mrf.mxu0  ;;  %v483_v27 = vpop.f32.mrf.mxu1 }
 0x182   :  { %9256 = vst [vmem:[#allocation29_spill] sm:$0xff] %v6329_v16 }
 0x183   :  { %9257 = vst [vmem:[#allocation30_spill] sm:$0xff] %v6331_v17  ;;  %4800 = vmatmul.msk.f32.gmra.mxu0 %vm172_vm0, %v829_v61  ;;  %4832 = vmatmul.msk.f32.gmra.mxu1 %vm172_vm0, %v829_v61  ;;  %v1273_v61 = vld [vmem:[%s9228_s27 + $0x6b] sm:$0xff] }
 0x184   :  { %4888 = vmatmul.msk.f32.gmra.mxu2 %vm172_vm0, %v1272_v56  ;;  %4920 = vmatmul.msk.f32.gmra.mxu3 %vm172_vm0, %v1272_v56 }
 0x187   :  { %v692_v52 = vpop.f32.mrf.mxu2  ;;  %v805_v53 = vpop.f32.mrf.mxu3 }
 0x188   :  { %v6343_v57 = vadd.f32 %v692_v52, %v370_v24  ;;  %v6345_v4 = vadd.f32 %v805_v53, %v483_v27  ;;  %v373_v5 = vpop.f32.mrf.mxu0  ;;  %v486_v11 = vpop.f32.mrf.mxu1 }
 0x18a   :  { %9258 = vst [vmem:[#allocation31_spill] sm:$0xff] %v6343_v57 }
 0x18b   :  { %9259 = vst [vmem:[#allocation32_spill] sm:$0xff] %v6345_v4  ;;  %4801 = vmatmul.msk.f32.gmra.mxu0 %vm172_vm0, %v830_v29  ;;  %4833 = vmatmul.msk.f32.gmra.mxu1 %vm172_vm0, %v830_v29  ;;  %v1274_v29 = vld [vmem:[%s9228_s27 + $0x73] sm:$0xff]  ;;  %v4952_v4 = vld [vmem:[%s9227_s29 + $0x360] sm:$0xff] }
 0x18c   :  { %4889 = vmatmul.msk.f32.gmra.mxu2 %vm172_vm0, %v1273_v61  ;;  %4921 = vmatmul.msk.f32.gmra.mxu3 %vm172_vm0, %v1273_v61 }
 0x18f   :  { %v695_v24 = vpop.f32.mrf.mxu2  ;;  %v808_v27 = vpop.f32.mrf.mxu3 }
 0x190   :  { %v6357_v56 = vadd.f32 %v695_v24, %v373_v5  ;;  %v6359_v52 = vadd.f32 %v808_v27, %v486_v11  ;;  %v376_v53 = vpop.f32.mrf.mxu0  ;;  %v489_v49 = vpop.f32.mrf.mxu1 }
 0x192   :  { %9260 = vst [vmem:[#allocation33_spill] sm:$0xff] %v6357_v56 }
 0x193   :  { %9261 = vst [vmem:[#allocation34_spill] sm:$0xff] %v6359_v52  ;;  %4802 = vmatmul.msk.f32.gmra.mxu0 %vm172_vm0, %v831_v1  ;;  %4834 = vmatmul.msk.f32.gmra.mxu1 %vm172_vm0, %v831_v1  ;;  %v1275_v1 = vld [vmem:[%s9228_s27 + $0x7b] sm:$0xff] }
 0x194   :  { %4890 = vmatmul.msk.f32.gmra.mxu2 %vm172_vm0, %v1274_v29  ;;  %4922 = vmatmul.msk.f32.gmra.mxu3 %vm172_vm0, %v1274_v29 }
 0x197   :  { %v698_v11 = vpop.f32.mrf.mxu2  ;;  %v811_v5 = vpop.f32.mrf.mxu3 }
 0x198   :  { %v6371_v61 = vadd.f32 %v698_v11, %v376_v53  ;;  %v6373_v24 = vadd.f32 %v811_v5, %v489_v49  ;;  %v379_v27 = vpop.f32.mrf.mxu0  ;;  %v492_v19 = vpop.f32.mrf.mxu1 }
 0x19a   :  { %9262 = vst [vmem:[#allocation35_spill] sm:$0xff] %v6371_v61 }
 0x19b   :  { %9263 = vst [vmem:[#allocation36_spill] sm:$0xff] %v6373_v24  ;;  %4803 = vmatmul.msk.f32.gmra.mxu0 %vm172_vm0, %v832_v41  ;;  %4835 = vmatmul.msk.f32.gmra.mxu1 %vm172_vm0, %v832_v41  ;;  %v1276_v41 = vld [vmem:[%s9228_s27 + $0x83] sm:$0xff]  ;;  %v844_v24 = vld [vmem:[%s9228_s27 + $0xda] sm:$0xff] }
 0x19c   :  { %4891 = vmatmul.msk.f32.gmra.mxu2 %vm172_vm0, %v1275_v1  ;;  %4923 = vmatmul.msk.f32.gmra.mxu3 %vm172_vm0, %v1275_v1 }
 0x19f   :  { %v701_v49 = vpop.f32.mrf.mxu2  ;;  %v814_v53 = vpop.f32.mrf.mxu3 }
 0x1a0   :  { %v6385_v29 = vadd.f32 %v701_v49, %v379_v27  ;;  %v6387_v11 = vadd.f32 %v814_v53, %v492_v19  ;;  %v987_v5 = vpop.f32.mrf.mxu0  ;;  %v1100_v3 = vpop.f32.mrf.mxu1 }
 0x1a1   :  { %v1196_v19 = vadd.f32 %v987_v5, %v5807_v22  ;;  %v1197_v27 = vadd.f32 %v1100_v3, %v5809_v23 }
 0x1a2   :  { %9264 = vst [vmem:[#allocation37_spill] sm:$0xff] %v6385_v29 }
 0x1a3   :  { %9265 = vst [vmem:[#allocation38_spill] sm:$0xff] %v6387_v11  ;;  %4804 = vmatmul.msk.f32.gmra.mxu0 %vm172_vm0, %v833_v33  ;;  %4836 = vmatmul.msk.f32.gmra.mxu1 %vm172_vm0, %v833_v33  ;;  %v834_v33 = vld [vmem:[%s9228_s27 + $0x8a] sm:$0xff] }
 0x1a4   :  { %4892 = vmatmul.msk.f32.gmra.mxu2 %vm172_vm0, %v1276_v41  ;;  %4924 = vmatmul.msk.f32.gmra.mxu3 %vm172_vm0, %v1276_v41  ;;  %v1277_v41 = vld [vmem:[%s9228_s27 + $0x8b] sm:$0xff] }
 0x1a7   :  { %v1430_v1 = vpop.f32.mrf.mxu2  ;;  %v1543_v49 = vpop.f32.mrf.mxu3 }
 0x1a8   :  { %v6401_v53 = vadd.f32 %v1430_v1, %v1196_v19  ;;  %v6403_v59 = vadd.f32 %v1543_v49, %v1197_v27  ;;  %v990_v37 = vpop.f32.mrf.mxu0  ;;  %v1103_v17 = vpop.f32.mrf.mxu1 }
 0x1a9   :  { %v1198_v22 = vadd.f32 %v990_v37, %v5821_v30  ;;  %v1199_v23 = vadd.f32 %v1103_v17, %v5823_v31 }
 0x1aa   :  { %9266 = vst [vmem:[#allocation39_spill] sm:$0xff] %v6403_v59 }
 0x1ab   :  { %4805 = vmatmul.msk.f32.gmra.mxu0 %vm172_vm0, %v834_v33  ;;  %4837 = vmatmul.msk.f32.gmra.mxu1 %vm172_vm0, %v834_v33  ;;  %v835_v33 = vld [vmem:[%s9228_s27 + $0x92] sm:$0xff] }
 0x1ac   :  { %4893 = vmatmul.msk.f32.gmra.mxu2 %vm172_vm0, %v1277_v41  ;;  %4925 = vmatmul.msk.f32.gmra.mxu3 %vm172_vm0, %v1277_v41  ;;  %v1278_v41 = vld [vmem:[%s9228_s27 + $0x93] sm:$0xff] }
 0x1af   :  { %v1433_v3 = vpop.f32.mrf.mxu2  ;;  %v1546_v5 = vpop.f32.mrf.mxu3 }
 0x1b0   :  { %v6417_v19 = vadd.f32 %v1433_v3, %v1198_v22  ;;  %v6419_v27 = vadd.f32 %v1546_v5, %v1199_v23  ;;  %v993_v1 = vpop.f32.mrf.mxu0  ;;  %v1106_v49 = vpop.f32.mrf.mxu1 }
 0x1b1   :  { %v1200_v30 = vadd.f32 %v993_v1, %v5835_v38  ;;  %v1201_v31 = vadd.f32 %v1106_v49, %v5837_v39 }
 0x1b2   :  { %9267 = vst [vmem:[#allocation40_spill] sm:$0xff] %v6419_v27 }
 0x1b3   :  { %4806 = vmatmul.msk.f32.gmra.mxu0 %vm172_vm0, %v835_v33  ;;  %4838 = vmatmul.msk.f32.gmra.mxu1 %vm172_vm0, %v835_v33  ;;  %v836_v33 = vld [vmem:[%s9228_s27 + $0x9a] sm:$0xff] }
 0x1b4   :  { %4894 = vmatmul.msk.f32.gmra.mxu2 %vm172_vm0, %v1278_v41  ;;  %4926 = vmatmul.msk.f32.gmra.mxu3 %vm172_vm0, %v1278_v41  ;;  %v1279_v41 = vld [vmem:[%s9228_s27 + $0x9b] sm:$0xff] }
 0x1b7   :  { %v1436_v37 = vpop.f32.mrf.mxu2  ;;  %v1549_v17 = vpop.f32.mrf.mxu3 }
 0x1b8   :  { %v6433_v22 = vadd.f32 %v1436_v37, %v1200_v30  ;;  %v6435_v23 = vadd.f32 %v1549_v17, %v1201_v31  ;;  %v996_v3 = vpop.f32.mrf.mxu0  ;;  %v1109_v5 = vpop.f32.mrf.mxu1 }
 0x1b9   :  { %v1202_v38 = vadd.f32 %v996_v3, %v5849_v46  ;;  %v1203_v39 = vadd.f32 %v1109_v5, %v5851_v47 }
 0x1ba   :  { %9268 = vst [vmem:[#allocation41_spill] sm:$0xff] %v6435_v23 }
 0x1bb   :  { %4807 = vmatmul.msk.f32.gmra.mxu0 %vm172_vm0, %v836_v33  ;;  %4839 = vmatmul.msk.f32.gmra.mxu1 %vm172_vm0, %v836_v33  ;;  %v837_v33 = vld [vmem:[%s9228_s27 + $0xa2] sm:$0xff] }
 0x1bc   :  { %4895 = vmatmul.msk.f32.gmra.mxu2 %vm172_vm0, %v1279_v41  ;;  %4927 = vmatmul.msk.f32.gmra.mxu3 %vm172_vm0, %v1279_v41  ;;  %v1280_v41 = vld [vmem:[%s9228_s27 + $0xa3] sm:$0xff] }
 0x1bf   :  { %v1439_v1 = vpop.f32.mrf.mxu2  ;;  %v1552_v49 = vpop.f32.mrf.mxu3 }
 0x1c0   :  { %v6449_v30 = vadd.f32 %v1439_v1, %v1202_v38  ;;  %v6451_v31 = vadd.f32 %v1552_v49, %v1203_v39  ;;  %v999_v37 = vpop.f32.mrf.mxu0  ;;  %v1112_v17 = vpop.f32.mrf.mxu1 }
 0x1c1   :  { %v1204_v46 = vadd.f32 %v999_v37, %v5863_v54  ;;  %v1205_v47 = vadd.f32 %v1112_v17, %v5865_v55 }
 0x1c2   :  { %9269 = vst [vmem:[#allocation42_spill] sm:$0xff] %v6451_v31 }
 0x1c3   :  { %4808 = vmatmul.msk.f32.gmra.mxu0 %vm172_vm0, %v837_v33  ;;  %4840 = vmatmul.msk.f32.gmra.mxu1 %vm172_vm0, %v837_v33  ;;  %v838_v33 = vld [vmem:[%s9228_s27 + $0xaa] sm:$0xff] }
 0x1c4   :  { %4896 = vmatmul.msk.f32.gmra.mxu2 %vm172_vm0, %v1280_v41  ;;  %4928 = vmatmul.msk.f32.gmra.mxu3 %vm172_vm0, %v1280_v41  ;;  %v1281_v41 = vld [vmem:[%s9228_s27 + $0xab] sm:$0xff] }
 0x1c7   :  { %v1442_v3 = vpop.f32.mrf.mxu2  ;;  %v1555_v5 = vpop.f32.mrf.mxu3 }
 0x1c8   :  { %v6465_v38 = vadd.f32 %v1442_v3, %v1204_v46  ;;  %v6467_v39 = vadd.f32 %v1555_v5, %v1205_v47  ;;  %v1002_v1 = vpop.f32.mrf.mxu0  ;;  %v1115_v49 = vpop.f32.mrf.mxu1 }
 0x1c9   :  { %v1206_v54 = vadd.f32 %v1002_v1, %v5877_v62  ;;  %v1207_v55 = vadd.f32 %v1115_v49, %v5879_v63 }
 0x1ca   :  { %9270 = vst [vmem:[#allocation43_spill] sm:$0xff] %v6467_v39 }
 0x1cb   :  { %4809 = vmatmul.msk.f32.gmra.mxu0 %vm172_vm0, %v838_v33  ;;  %4841 = vmatmul.msk.f32.gmra.mxu1 %vm172_vm0, %v838_v33  ;;  %v839_v33 = vld [vmem:[%s9228_s27 + $0xb2] sm:$0xff] }
 0x1cc   :  { %4897 = vmatmul.msk.f32.gmra.mxu2 %vm172_vm0, %v1281_v41  ;;  %4929 = vmatmul.msk.f32.gmra.mxu3 %vm172_vm0, %v1281_v41  ;;  %v1282_v41 = vld [vmem:[%s9228_s27 + $0xb3] sm:$0xff] }
 0x1cf   :  { %v1445_v37 = vpop.f32.mrf.mxu2  ;;  %v1558_v17 = vpop.f32.mrf.mxu3 }
 0x1d0   :  { %v6481_v46 = vadd.f32 %v1445_v37, %v1206_v54  ;;  %v6483_v47 = vadd.f32 %v1558_v17, %v1207_v55  ;;  %v1005_v3 = vpop.f32.mrf.mxu0  ;;  %v1118_v5 = vpop.f32.mrf.mxu1 }
 0x1d1   :  { %v1208_v62 = vadd.f32 %v1005_v3, %v5891_v6  ;;  %v1209_v63 = vadd.f32 %v1118_v5, %v5893_v7 }
 0x1d2   :  { %9271 = vst [vmem:[#allocation44_spill] sm:$0xff] %v6483_v47 }
 0x1d3   :  { %4810 = vmatmul.msk.f32.gmra.mxu0 %vm172_vm0, %v839_v33  ;;  %4842 = vmatmul.msk.f32.gmra.mxu1 %vm172_vm0, %v839_v33  ;;  %v840_v33 = vld [vmem:[%s9228_s27 + $0xba] sm:$0xff] }
 0x1d4   :  { %4898 = vmatmul.msk.f32.gmra.mxu2 %vm172_vm0, %v1282_v41  ;;  %4930 = vmatmul.msk.f32.gmra.mxu3 %vm172_vm0, %v1282_v41  ;;  %v1283_v41 = vld [vmem:[%s9228_s27 + $0xbb] sm:$0xff] }
 0x1d7   :  { %v1448_v1 = vpop.f32.mrf.mxu2  ;;  %v1561_v49 = vpop.f32.mrf.mxu3 }
 0x1d8   :  { %v6497_v54 = vadd.f32 %v1448_v1, %v1208_v62  ;;  %v6499_v55 = vadd.f32 %v1561_v49, %v1209_v63  ;;  %v1008_v37 = vpop.f32.mrf.mxu0  ;;  %v1121_v17 = vpop.f32.mrf.mxu1 }
 0x1d9   :  { %v1210_v6 = vadd.f32 %v1008_v37, %v5905_v14  ;;  %v1211_v7 = vadd.f32 %v1121_v17, %v5907_v15  ;;  %v1284_v14 = vld [vmem:[%s9228_s27 + $0xc3] sm:$0xff]  ;;  %v4962_v15 = vld [vmem:[%s9227_s29 + $0x3b0] sm:$0xff] }
 0x1da   :  { %9272 = vst [vmem:[#allocation45_spill] sm:$0xff] %v6499_v55  ;;  %1860 = vmatpush.msra.mxu0 %v4962_v15  ;;  %v843_v15 = vld [vmem:[%s9228_s27 + $0xd2] sm:$0xff] }
 0x1db   :  { %4811 = vmatmul.msk.f32.gmra.mxu0 %vm172_vm0, %v840_v33  ;;  %4843 = vmatmul.msk.f32.gmra.mxu1 %vm172_vm0, %v840_v33  ;;  %v841_v33 = vld [vmem:[%s9228_s27 + $0xc2] sm:$0xff] }
 0x1dc   :  { %4899 = vmatmul.msk.f32.gmra.mxu2 %vm172_vm0, %v1283_v41  ;;  %4931 = vmatmul.msk.f32.gmra.mxu3 %vm172_vm0, %v1283_v41  ;;  %v842_v41 = vld [vmem:[%s9228_s27 + $0xca] sm:$0xff] }
 0x1df   :  { %v1451_v3 = vpop.f32.mrf.mxu2  ;;  %v1564_v5 = vpop.f32.mrf.mxu3 }
 0x1e0   :  { %v6513_v62 = vadd.f32 %v1451_v3, %v1210_v6  ;;  %v6515_v63 = vadd.f32 %v1564_v5, %v1211_v7  ;;  %v6517_v1 = vpop.f32.mrf.mxu0  ;;  %v6519_v49 = vpop.f32.mrf.mxu1  ;;  %v1285_v6 = vld [vmem:[%s9228_s27 + $0xcb] sm:$0xff]  ;;  %v4963_v7 = vld [vmem:[%s9227_s29 + $0x3b8] sm:$0xff]  ;;  %v4960_v3 = vld [vmem:[%s9227_s29 + $0x3a0] sm:$0xff] }
 0x1e1   :  { %9274 = vst [vmem:[#allocation47_spill] sm:$0xff] %v6519_v49  ;;  %1973 = vmatpush.msra.mxu1 %v4963_v7  ;;  %v4961_v5 = vld [vmem:[%s9227_s29 + $0x3a8] sm:$0xff]  ;;  %1861 = vmatpush.msra.mxu0 %v4960_v3  ;;  %v1286_v7 = vld [vmem:[%s9228_s27 + $0xd3] sm:$0xff]  ;;  %v4956_v3 = vld [vmem:[%s9227_s29 + $0x380] sm:$0xff] }
 0x1e2   :  { %9273 = vst [vmem:[#allocation46_spill] sm:$0xff] %v6515_v63  ;;  %v1728_v63 = vld [vmem:[%s9228_s27 + $0xcc] sm:$0xff] }
 0x1e3   :  { %4812 = vmatmul.msk.f32.gmra.mxu0 %vm172_vm0, %v841_v33  ;;  %4844 = vmatmul.msk.f32.gmra.mxu1 %vm172_vm0, %v841_v33 }
 0x1e4   :  { %4900 = vmatmul.msk.f32.gmra.mxu2 %vm172_vm0, %v1284_v14  ;;  %4932 = vmatmul.msk.f32.gmra.mxu3 %vm172_vm0, %v1284_v14 }
 0x1e5   :  { %1974 = vmatpush.msra.mxu1 %v4961_v5  ;;  %v4957_v5 = vld [vmem:[%s9227_s29 + $0x388] sm:$0xff] }
 0x1e7   :  { %v6903_v59 = vpop.f32.mrf.mxu3 }
 0x1e8   :  { %v6534_v37 = vpop.f32.mrf.mxu0  ;;  %v6536_v17 = vpop.f32.mrf.mxu1  ;;  %9317 = vst [vmem:[#allocation90_spill] sm:$0xff] %v6903_v59 }
 0x1e9   :  { %9275 = vst [vmem:[#allocation48_spill] sm:$0xff] %v6536_v17 }
 0x1eb   :  { %4813 = vmatmul.msk.f32.gmra.mxu0 %vm172_vm0, %v842_v41  ;;  %4845 = vmatmul.msk.f32.gmra.mxu1 %vm172_vm0, %v842_v41  ;;  %v4958_v41 = vld [vmem:[%s9227_s29 + $0x390] sm:$0xff] }
 0x1ec   :  { %4901 = vmatmul.msk.f32.gmra.mxu2 %vm172_vm0, %v1285_v6  ;;  %4933 = vmatmul.msk.f32.gmra.mxu3 %vm172_vm0, %v1285_v6  ;;  %v4959_v6 = vld [vmem:[%s9227_s29 + $0x398] sm:$0xff] }
 0x1ed   :  { %1862 = vmatpush.msra.mxu0 %v4958_v41  ;;  %1975 = vmatpush.msra.mxu1 %v4959_v6  ;;  %v4954_v41 = vld [vmem:[%s9227_s29 + $0x370] sm:$0xff]  ;;  %v4955_v6 = vld [vmem:[%s9227_s29 + $0x378] sm:$0xff] }
 0x1ef   :  { %1863 = vmatpush.msra.mxu0 %v4956_v3  ;;  %1976 = vmatpush.msra.mxu1 %v4957_v5  ;;  %v1287_v3 = vld [vmem:[%s9228_s27 + $0xdb] sm:$0xff]  ;;  %v4950_v5 = vld [vmem:[%s9227_s29 + $0x350] sm:$0xff]  ;;  %v6916_v23 = vpop.f32.mrf.mxu3 }
 0x1f0   :  { %v6557_v33 = vpop.f32.mrf.mxu0  ;;  %v6559_v14 = vpop.f32.mrf.mxu1  ;;  %9319 = vst [vmem:[#allocation92_spill] sm:$0xff] %v6916_v23 }
 0x1f1   :  { %9276 = vst [vmem:[#allocation49_spill] sm:$0xff] %v6559_v14  ;;  %1864 = vmatpush.msra.mxu0 %v4954_v41  ;;  %1977 = vmatpush.msra.mxu1 %v4955_v6  ;;  %v4951_v41 = vld [vmem:[%s9227_s29 + $0x358] sm:$0xff]  ;;  %v4949_v6 = vld [vmem:[%s9227_s29 + $0x348] sm:$0xff] }
 0x1f3   :  { %4814 = vmatmul.msk.f32.gmra.mxu0 %vm172_vm0, %v843_v15  ;;  %4846 = vmatmul.msk.f32.gmra.mxu1 %vm172_vm0, %v843_v15  ;;  %v4953_v15 = vld [vmem:[%s9227_s29 + $0x368] sm:$0xff] }
 0x1f4   :  { %4902 = vmatmul.msk.f32.gmra.mxu2 %vm172_vm0, %v1286_v7  ;;  %4934 = vmatmul.msk.f32.gmra.mxu3 %vm172_vm0, %v1286_v7 }
 0x1f5   :  { %1865 = vmatpush.msra.mxu0 %v4952_v4  ;;  %1978 = vmatpush.msra.mxu1 %v4953_v15  ;;  %v4948_v4 = vld [vmem:[%s9227_s29 + $0x340] sm:$0xff]  ;;  %v4946_v15 = vld [vmem:[%s9227_s29 + $0x330] sm:$0xff] }
 0x1f7   :  { %1866 = vmatpush.msra.mxu0 %v4950_v5  ;;  %1979 = vmatpush.msra.mxu1 %v4951_v41  ;;  %v1288_v5 = vld [vmem:[%s9228_s27 + $0xe3] sm:$0xff]  ;;  %v6931_v39 = vpop.f32.mrf.mxu3 }
 0x1f8   :  { %v6595_v7 = vpop.f32.mrf.mxu0  ;;  %v6597_v52 = vpop.f32.mrf.mxu1  ;;  %v4944_v41 = vld [vmem:[%s9227_s29 + $0x320] sm:$0xff]  ;;  %9321 = vst [vmem:[#allocation94_spill] sm:$0xff] %v6931_v39 }
 0x1f9   :  { %9277 = vst [vmem:[#allocation50_spill] sm:$0xff] %v6597_v52  ;;  %1867 = vmatpush.msra.mxu0 %v4948_v4  ;;  %1980 = vmatpush.msra.mxu1 %v4949_v6  ;;  %v4945_v4 = vld [vmem:[%s9227_s29 + $0x328] sm:$0xff]  ;;  %v4942_v6 = vld [vmem:[%s9227_s29 + $0x310] sm:$0xff] }
 0x1fb   :  { %4815 = vmatmul.msk.f32.gmra.mxu0 %vm172_vm0, %v844_v24  ;;  %4847 = vmatmul.msk.f32.gmra.mxu1 %vm172_vm0, %v844_v24  ;;  %v4947_v24 = vld [vmem:[%s9227_s29 + $0x338] sm:$0xff] }
 0x1fc   :  { %4903 = vmatmul.msk.f32.gmra.mxu2 %vm172_vm0, %v1287_v3  ;;  %4935 = vmatmul.msk.f32.gmra.mxu3 %vm172_vm0, %v1287_v3 }
 0x1fd   :  { %1868 = vmatpush.msra.mxu0 %v4946_v15  ;;  %1981 = vmatpush.msra.mxu1 %v4947_v24  ;;  %v4943_v15 = vld [vmem:[%s9227_s29 + $0x318] sm:$0xff]  ;;  %v4940_v24 = vld [vmem:[%s9227_s29 + $0x300] sm:$0xff] }
 0x1ff   :  { %1869 = vmatpush.msra.mxu0 %v4944_v41  ;;  %1982 = vmatpush.msra.mxu1 %v4945_v4  ;;  %v1289_v41 = vld [vmem:[%s9228_s27 + $0xeb] sm:$0xff]  ;;  %v6942_v55 = vpop.f32.mrf.mxu3 }
 0x200   :  { %v6627_v3 = vpop.f32.mrf.mxu0  ;;  %v6629_v11 = vpop.f32.mrf.mxu1  ;;  %9323 = vst [vmem:[#allocation96_spill] sm:$0xff] %v6942_v55 }
 0x201   :  { %9278 = vst [vmem:[#allocation51_spill] sm:$0xff] %v6629_v11  ;;  %1870 = vmatpush.msra.mxu0 %v4942_v6  ;;  %1983 = vmatpush.msra.mxu1 %v4943_v15  ;;  %v847_v15 = vld [vmem:[%s9228_s27 + $0xf2] sm:$0xff] }
 0x203   :  { %4816 = vmatmul.msk.f32.gmra.mxu0 %vm172_vm0, %v845_v60  ;;  %4848 = vmatmul.msk.f32.gmra.mxu1 %vm172_vm0, %v845_v60  ;;  %v4941_v60 = vld [vmem:[%s9227_s29 + $0x308] sm:$0xff] }
 0x204   :  { %4904 = vmatmul.msk.f32.gmra.mxu2 %vm172_vm0, %v1288_v5  ;;  %4936 = vmatmul.msk.f32.gmra.mxu3 %vm172_vm0, %v1288_v5 }
 0x205   :  { %1871 = vmatpush.msra.mxu0 %v4940_v24  ;;  %1984 = vmatpush.msra.mxu1 %v4941_v60  ;;  %v1290_v24 = vld [vmem:[%s9228_s27 + $0xf3] sm:$0xff] }
 0x207   :  { %v6960_v49 = vpop.f32.mrf.mxu3 }
 0x208   :  { %v6659_v5 = vpop.f32.mrf.mxu0  ;;  %v6661_v10 = vpop.f32.mrf.mxu1  ;;  %9326 = vst [vmem:[#allocation99_spill] sm:$0xff] %v6960_v49 }
 0x20b   :  { %4817 = vmatmul.msk.f32.gmra.mxu0 %vm172_vm0, %v846_v28  ;;  %4849 = vmatmul.msk.f32.gmra.mxu1 %vm172_vm0, %v846_v28 }
 0x20c   :  { %4905 = vmatmul.msk.f32.gmra.mxu2 %vm172_vm0, %v1289_v41  ;;  %4937 = vmatmul.msk.f32.gmra.mxu3 %vm172_vm0, %v1289_v41  ;;  %v848_v41 = vld [vmem:[%s9228_s27 + $0xfa] sm:$0xf] }
 0x20f   :  { %v6969_v17 = vpop.f32.mrf.mxu3 }
 0x210   :  { %v6673_v4 = vpop.f32.mrf.mxu0  ;;  %v6675_v6 = vpop.f32.mrf.mxu1  ;;  %9328 = vst [vmem:[#allocation101_spill] sm:$0xff] %v6969_v17  ;;  %v7013_v17 = vld [vmem:[%s9335_s30] sm:$0x3] }
 0x213   :  { %4818 = vmatmul.msk.f32.gmra.mxu0 %vm172_vm0, %v847_v15  ;;  %4850 = vmatmul.msk.f32.gmra.mxu1 %vm172_vm0, %v847_v15 }
 0x214   :  { %4906 = vmatmul.msk.f32.gmra.mxu2 %vm172_vm0, %v1290_v24  ;;  %4938 = vmatmul.msk.f32.gmra.mxu3 %vm172_vm0, %v1290_v24 }
 0x218   :  { %v6687_v28 = vpop.f32.mrf.mxu0  ;;  %v6689_v60 = vpop.f32.mrf.mxu1 }
 0x21b   :  { %4819 = vmatmul.msk.f32.gmra.mxu0 %vm172_vm0, %v848_v41  ;;  %4851 = vmatmul.msk.f32.gmra.mxu1 %vm172_vm0, %v848_v41 }
 0x21c   :  { %4907 = vmatmul.msk.f32.gmra.mxu2 %vm172_vm0, %v1291_v44  ;;  %4939 = vmatmul.msk.f32.gmra.mxu3 %vm172_vm0, %v1291_v44  ;;  %v1704_v44 = vld [vmem:[%s9228_s27 + $0xc] sm:$0xff] }
 0x220   :  { %v6701_v15 = vpop.f32.mrf.mxu0  ;;  %v6703_v24 = vpop.f32.mrf.mxu1 }
 0x221   :  { %9279 = vst [vmem:[#allocation52_spill] sm:$0xff] %v6701_v15 }
 0x222   :  { %9280 = vst [vmem:[#allocation53_spill] sm:$0xff] %v6703_v24 }
 0x223   :  { %4964 = vmatmul.msk.f32.vlgmr.msra.gmra.mxu0 %vm172_vm0, %v1703_v0  ;;  %4996 = vmatmul.msk.f32.vlgmr.msra.gmra.mxu1 %vm172_vm0, %v1703_v0  ;;  %v1705_v0 = vld [vmem:[%s9228_s27 + $0x14] sm:$0xff] }
 0x228   :  { %v6710_v18 = vpop.f32.mrf.mxu0  ;;  %v6712_v40 = vpop.f32.mrf.mxu1 }
 0x229   :  { %9281 = vst [vmem:[#allocation54_spill] sm:$0xff] %v6710_v18 }
 0x22a   :  { %9282 = vst [vmem:[#allocation55_spill] sm:$0xff] %v6712_v40 }
 0x22b   :  { %4965 = vmatmul.msk.f32.gmra.mxu0 %vm172_vm0, %v1704_v44  ;;  %4997 = vmatmul.msk.f32.gmra.mxu1 %vm172_vm0, %v1704_v44  ;;  %v1706_v44 = vld [vmem:[%s9228_s27 + $0x1c] sm:$0xff] }
 0x230   :  { %v6719_v41 = vpop.f32.mrf.mxu0  ;;  %v6721_v24 = vpop.f32.mrf.mxu1 }
 0x231   :  { %9283 = vst [vmem:[#allocation56_spill] sm:$0xff] %v6719_v41 }
 0x232   :  { %9284 = vst [vmem:[#allocation57_spill] sm:$0xff] %v6721_v24 }
 0x233   :  { %4966 = vmatmul.msk.f32.gmra.mxu0 %vm172_vm0, %v1705_v0  ;;  %4998 = vmatmul.msk.f32.gmra.mxu1 %vm172_vm0, %v1705_v0  ;;  %v1707_v0 = vld [vmem:[%s9228_s27 + $0x24] sm:$0xff] }
 0x238   :  { %v6728_v40 = vpop.f32.mrf.mxu0  ;;  %v6730_v15 = vpop.f32.mrf.mxu1 }
 0x239   :  { %9285 = vst [vmem:[#allocation58_spill] sm:$0xff] %v6728_v40 }
 0x23a   :  { %9286 = vst [vmem:[#allocation59_spill] sm:$0xff] %v6730_v15 }
 0x23b   :  { %4967 = vmatmul.msk.f32.gmra.mxu0 %vm172_vm0, %v1706_v44  ;;  %4999 = vmatmul.msk.f32.gmra.mxu1 %vm172_vm0, %v1706_v44  ;;  %v1708_v44 = vld [vmem:[%s9228_s27 + $0x2c] sm:$0xff] }
 0x240   :  { %v6737_v24 = vpop.f32.mrf.mxu0  ;;  %v6739_v18 = vpop.f32.mrf.mxu1 }
 0x241   :  { %9287 = vst [vmem:[#allocation60_spill] sm:$0xff] %v6737_v24 }
 0x242   :  { %9288 = vst [vmem:[#allocation61_spill] sm:$0xff] %v6739_v18 }
 0x243   :  { %4968 = vmatmul.msk.f32.gmra.mxu0 %vm172_vm0, %v1707_v0  ;;  %5000 = vmatmul.msk.f32.gmra.mxu1 %vm172_vm0, %v1707_v0  ;;  %v1709_v0 = vld [vmem:[%s9228_s27 + $0x34] sm:$0xff] }
 0x248   :  { %v6746_v15 = vpop.f32.mrf.mxu0  ;;  %v6748_v41 = vpop.f32.mrf.mxu1 }
 0x249   :  { %9289 = vst [vmem:[#allocation62_spill] sm:$0xff] %v6746_v15 }
 0x24a   :  { %9290 = vst [vmem:[#allocation63_spill] sm:$0xff] %v6748_v41 }
 0x24b   :  { %4969 = vmatmul.msk.f32.gmra.mxu0 %vm172_vm0, %v1708_v44  ;;  %5001 = vmatmul.msk.f32.gmra.mxu1 %vm172_vm0, %v1708_v44  ;;  %v1710_v44 = vld [vmem:[%s9228_s27 + $0x3c] sm:$0xff] }
 0x250   :  { %v6755_v18 = vpop.f32.mrf.mxu0  ;;  %v6757_v40 = vpop.f32.mrf.mxu1 }
 0x251   :  { %9291 = vst [vmem:[#allocation64_spill] sm:$0xff] %v6755_v18 }
 0x252   :  { %9292 = vst [vmem:[#allocation65_spill] sm:$0xff] %v6757_v40 }
 0x253   :  { %4970 = vmatmul.msk.f32.gmra.mxu0 %vm172_vm0, %v1709_v0  ;;  %5002 = vmatmul.msk.f32.gmra.mxu1 %vm172_vm0, %v1709_v0  ;;  %v1711_v0 = vld [vmem:[%s9228_s27 + $0x44] sm:$0xff] }
 0x258   :  { %v6764_v41 = vpop.f32.mrf.mxu0  ;;  %v6766_v24 = vpop.f32.mrf.mxu1 }
 0x259   :  { %9293 = vst [vmem:[#allocation66_spill] sm:$0xff] %v6764_v41 }
 0x25a   :  { %9294 = vst [vmem:[#allocation67_spill] sm:$0xff] %v6766_v24 }
 0x25b   :  { %4971 = vmatmul.msk.f32.gmra.mxu0 %vm172_vm0, %v1710_v44  ;;  %5003 = vmatmul.msk.f32.gmra.mxu1 %vm172_vm0, %v1710_v44  ;;  %v1712_v44 = vld [vmem:[%s9228_s27 + $0x4c] sm:$0xff] }
 0x260   :  { %v6773_v40 = vpop.f32.mrf.mxu0  ;;  %v6775_v15 = vpop.f32.mrf.mxu1 }
 0x261   :  { %9295 = vst [vmem:[#allocation68_spill] sm:$0xff] %v6773_v40 }
 0x262   :  { %9296 = vst [vmem:[#allocation69_spill] sm:$0xff] %v6775_v15 }
 0x263   :  { %4972 = vmatmul.msk.f32.gmra.mxu0 %vm172_vm0, %v1711_v0  ;;  %5004 = vmatmul.msk.f32.gmra.mxu1 %vm172_vm0, %v1711_v0  ;;  %v1713_v0 = vld [vmem:[%s9228_s27 + $0x54] sm:$0xff] }
 0x268   :  { %v6782_v24 = vpop.f32.mrf.mxu0  ;;  %v6784_v18 = vpop.f32.mrf.mxu1 }
 0x269   :  { %9297 = vst [vmem:[#allocation70_spill] sm:$0xff] %v6782_v24 }
 0x26a   :  { %9298 = vst [vmem:[#allocation71_spill] sm:$0xff] %v6784_v18 }
 0x26b   :  { %4973 = vmatmul.msk.f32.gmra.mxu0 %vm172_vm0, %v1712_v44  ;;  %5005 = vmatmul.msk.f32.gmra.mxu1 %vm172_vm0, %v1712_v44  ;;  %v1714_v44 = vld [vmem:[%s9228_s27 + $0x5c] sm:$0xff] }
 0x270   :  { %v6791_v15 = vpop.f32.mrf.mxu0  ;;  %v6793_v41 = vpop.f32.mrf.mxu1 }
 0x271   :  { %9299 = vst [vmem:[#allocation72_spill] sm:$0xff] %v6791_v15 }
 0x272   :  { %9300 = vst [vmem:[#allocation73_spill] sm:$0xff] %v6793_v41 }
 0x273   :  { %4974 = vmatmul.msk.f32.gmra.mxu0 %vm172_vm0, %v1713_v0  ;;  %5006 = vmatmul.msk.f32.gmra.mxu1 %vm172_vm0, %v1713_v0  ;;  %v1715_v0 = vld [vmem:[%s9228_s27 + $0x64] sm:$0xff] }
 0x278   :  { %v6800_v18 = vpop.f32.mrf.mxu0  ;;  %v6802_v2 = vpop.f32.mrf.mxu1 }
 0x279   :  { %9301 = vst [vmem:[#allocation74_spill] sm:$0xff] %v6800_v18  ;;  %v6863_v18 = vpop.f32.mrf.mxu2 }
 0x27a   :  { %9302 = vst [vmem:[#allocation75_spill] sm:$0xff] %v6802_v2 }
 0x27b   :  { %4975 = vmatmul.msk.f32.gmra.mxu0 %vm172_vm0, %v1714_v44  ;;  %5007 = vmatmul.msk.f32.gmra.mxu1 %vm172_vm0, %v1714_v44  ;;  %v1716_v44 = vld [vmem:[%s9228_s27 + $0x6c] sm:$0xff] }
 0x280   :  { %v6809_v41 = vpop.f32.mrf.mxu0  ;;  %v6811_v40 = vpop.f32.mrf.mxu1 }
 0x281   :  { %9303 = vst [vmem:[#allocation76_spill] sm:$0xff] %v6809_v41  ;;  %v6874_v57 = vpop.f32.mrf.mxu2 }
 0x282   :  { %9304 = vst [vmem:[#allocation77_spill] sm:$0xff] %v6811_v40 }
 0x283   :  { %4976 = vmatmul.msk.f32.gmra.mxu0 %vm172_vm0, %v1715_v0  ;;  %5008 = vmatmul.msk.f32.gmra.mxu1 %vm172_vm0, %v1715_v0  ;;  %v1717_v0 = vld [vmem:[%s9228_s27 + $0x74] sm:$0xff] }
 0x288   :  { %v6818_v2 = vpop.f32.mrf.mxu0  ;;  %v6820_v32 = vpop.f32.mrf.mxu1 }
 0x289   :  { %9305 = vst [vmem:[#allocation78_spill] sm:$0xff] %v6818_v2 }
 0x28a   :  { %9306 = vst [vmem:[#allocation79_spill] sm:$0xff] %v6820_v32 }
 0x28b   :  { %4977 = vmatmul.msk.f32.gmra.mxu0 %vm172_vm0, %v1716_v44  ;;  %5009 = vmatmul.msk.f32.gmra.mxu1 %vm172_vm0, %v1716_v44  ;;  %v1718_v44 = vld [vmem:[%s9228_s27 + $0x7c] sm:$0xff] }
 0x290   :  { %v6827_v40 = vpop.f32.mrf.mxu0  ;;  %v6829_v24 = vpop.f32.mrf.mxu1 }
 0x291   :  { %9307 = vst [vmem:[#allocation80_spill] sm:$0xff] %v6827_v40  ;;  %v6892_v40 = vpop.f32.mrf.mxu2 }
 0x292   :  { %9308 = vst [vmem:[#allocation81_spill] sm:$0xff] %v6829_v24 }
 0x293   :  { %4978 = vmatmul.msk.f32.gmra.mxu0 %vm172_vm0, %v1717_v0  ;;  %5010 = vmatmul.msk.f32.gmra.mxu1 %vm172_vm0, %v1717_v0  ;;  %v1719_v0 = vld [vmem:[%s9228_s27 + $0x84] sm:$0xff] }
 0x298   :  { %v6836_v32 = vpop.f32.mrf.mxu0  ;;  %v6838_v58 = vpop.f32.mrf.mxu1 }
 0x299   :  { %9309 = vst [vmem:[#allocation82_spill] sm:$0xff] %v6836_v32 }
 0x29a   :  { %9310 = vst [vmem:[#allocation83_spill] sm:$0xff] %v6838_v58 }
 0x29b   :  { %4979 = vmatmul.msk.f32.gmra.mxu0 %vm172_vm0, %v1718_v44  ;;  %5011 = vmatmul.msk.f32.gmra.mxu1 %vm172_vm0, %v1718_v44  ;;  %v1720_v44 = vld [vmem:[%s9228_s27 + $0x8c] sm:$0xff] }
 0x2a0   :  { %v6845_v24 = vpop.f32.mrf.mxu0  ;;  %v6847_v15 = vpop.f32.mrf.mxu1 }
 0x2a1   :  { %9311 = vst [vmem:[#allocation84_spill] sm:$0xff] %v6847_v15 }
 0x2a3   :  { %4980 = vmatmul.msk.f32.gmra.mxu0 %vm172_vm0, %v1719_v0  ;;  %5012 = vmatmul.msk.f32.gmra.mxu1 %vm172_vm0, %v1719_v0  ;;  %v1721_v0 = vld [vmem:[%s9228_s27 + $0x94] sm:$0xff] }
 0x2a8   :  { %v6854_v58 = vpop.f32.mrf.mxu0  ;;  %v6856_v36 = vpop.f32.mrf.mxu1 }
 0x2a9   :  { %9312 = vst [vmem:[#allocation85_spill] sm:$0xff] %v6856_v36  ;;  %v6905_v36 = vpop.f32.mrf.mxu2 }
 0x2ab   :  { %4981 = vmatmul.msk.f32.gmra.mxu0 %vm172_vm0, %v1720_v44  ;;  %5013 = vmatmul.msk.f32.gmra.mxu1 %vm172_vm0, %v1720_v44  ;;  %v1722_v44 = vld [vmem:[%s9228_s27 + $0x9c] sm:$0xff] }
 0x2b0   :  { %v6865_v16 = vpop.f32.mrf.mxu0  ;;  %v6867_v41 = vpop.f32.mrf.mxu1 }
 0x2b1   :  { %9313 = vst [vmem:[#allocation86_spill] sm:$0xff] %v6867_v41 }
 0x2b3   :  { %4982 = vmatmul.msk.f32.gmra.mxu0 %vm172_vm0, %v1721_v0  ;;  %5014 = vmatmul.msk.f32.gmra.mxu1 %vm172_vm0, %v1721_v0  ;;  %v1723_v0 = vld [vmem:[%s9228_s27 + $0xa4] sm:$0xff] }
 0x2b8   :  { %v6876_v32 = vpop.f32.mrf.mxu0  ;;  %v6878_v29 = vpop.f32.mrf.mxu1 }
 0x2b9   :  { %9314 = vst [vmem:[#allocation87_spill] sm:$0xff] %v6878_v29  ;;  %v6920_v29 = vpop.f32.mrf.mxu2 }
 0x2bb   :  { %4983 = vmatmul.msk.f32.gmra.mxu0 %vm172_vm0, %v1722_v44  ;;  %5015 = vmatmul.msk.f32.gmra.mxu1 %vm172_vm0, %v1722_v44  ;;  %v1724_v44 = vld [vmem:[%s9228_s27 + $0xac] sm:$0xff] }
 0x2c0   :  { %v6885_v2 = vpop.f32.mrf.mxu0  ;;  %v6887_v56 = vpop.f32.mrf.mxu1 }
 0x2c1   :  { %9315 = vst [vmem:[#allocation88_spill] sm:$0xff] %v6887_v56 }
 0x2c3   :  { %4984 = vmatmul.msk.f32.gmra.mxu0 %vm172_vm0, %v1723_v0  ;;  %5016 = vmatmul.msk.f32.gmra.mxu1 %vm172_vm0, %v1723_v0  ;;  %v1725_v0 = vld [vmem:[%s9228_s27 + $0xb4] sm:$0xff] }
 0x2c8   :  { %v6896_v61 = vpop.f32.mrf.mxu0  ;;  %v6898_v15 = vpop.f32.mrf.mxu1 }
 0x2c9   :  { %9316 = vst [vmem:[#allocation89_spill] sm:$0xff] %v6898_v15  ;;  %v1469_v15 = vpop.f32.mrf.mxu2 }
 0x2cb   :  { %4985 = vmatmul.msk.f32.gmra.mxu0 %vm172_vm0, %v1724_v44  ;;  %5017 = vmatmul.msk.f32.gmra.mxu1 %vm172_vm0, %v1724_v44  ;;  %v1726_v44 = vld [vmem:[%s9228_s27 + $0xbc] sm:$0xff] }
 0x2d0   :  { %v6909_v27 = vpop.f32.mrf.mxu0  ;;  %v6911_v41 = vpop.f32.mrf.mxu1 }
 0x2d1   :  { %9318 = vst [vmem:[#allocation91_spill] sm:$0xff] %v6911_v41  ;;  %v1727_v41 = vld [vmem:[%s9228_s27 + $0xc4] sm:$0xff]  ;;  %v1472_v59 = vpop.f32.mrf.mxu2 }
 0x2d3   :  { %4986 = vmatmul.msk.f32.gmra.mxu0 %vm172_vm0, %v1725_v0  ;;  %5018 = vmatmul.msk.f32.gmra.mxu1 %vm172_vm0, %v1725_v0 }
 0x2d8   :  { %v6922_v31 = vpop.f32.mrf.mxu0  ;;  %v6924_v56 = vpop.f32.mrf.mxu1 }
 0x2d9   :  { %9320 = vst [vmem:[#allocation93_spill] sm:$0xff] %v6924_v56 }
 0x2db   :  { %4987 = vmatmul.msk.f32.gmra.mxu0 %vm172_vm0, %v1726_v44  ;;  %5019 = vmatmul.msk.f32.gmra.mxu1 %vm172_vm0, %v1726_v44 }
 0x2e0   :  { %v6933_v47 = vpop.f32.mrf.mxu0  ;;  %v6935_v0 = vpop.f32.mrf.mxu1 }
 0x2e1   :  { %9322 = vst [vmem:[#allocation95_spill] sm:$0xff] %v6935_v0 }
 0x2e3   :  { %4988 = vmatmul.msk.f32.gmra.mxu0 %vm172_vm0, %v1727_v41  ;;  %5020 = vmatmul.msk.f32.gmra.mxu1 %vm172_vm0, %v1727_v41  ;;  %v1729_v41 = vld [vmem:[%s9228_s27 + $0xd4] sm:$0xff] }
 0x2e8   :  { %v6944_v56 = vpop.f32.mrf.mxu0  ;;  %v6946_v44 = vpop.f32.mrf.mxu1 }
 0x2e9   :  { %9324 = vst [vmem:[#allocation97_spill] sm:$0xff] %v6946_v44  ;;  %v1475_v44 = vpop.f32.mrf.mxu2 }
 0x2eb   :  { %4989 = vmatmul.msk.f32.gmra.mxu0 %vm172_vm0, %v1728_v63  ;;  %5021 = vmatmul.msk.f32.gmra.mxu1 %vm172_vm0, %v1728_v63  ;;  %v1730_v63 = vld [vmem:[%s9228_s27 + $0xdc] sm:$0xff] }
 0x2f0   :  { %v6953_v0 = vpop.f32.mrf.mxu0  ;;  %v6955_v23 = vpop.f32.mrf.mxu1 }
 0x2f1   :  { %9325 = vst [vmem:[#allocation98_spill] sm:$0xff] %v6955_v23  ;;  %v6973_v23 = vpop.f32.mrf.mxu2 }
 0x2f2   :  { %9329 = vst [vmem:[#allocation102_spill] sm:$0xff] %v6973_v23 }
 0x2f3   :  { %4990 = vmatmul.msk.f32.gmra.mxu0 %vm172_vm0, %v1729_v41  ;;  %5022 = vmatmul.msk.f32.gmra.mxu1 %vm172_vm0, %v1729_v41  ;;  %v1731_v41 = vld [vmem:[%s9228_s27 + $0xe4] sm:$0xff] }
 0x2f8   :  { %v1906_v26 = vpop.f32.mrf.mxu0  ;;  %v6964_v39 = vpop.f32.mrf.mxu1 }
 0x2f9   :  { %9327 = vst [vmem:[#allocation100_spill] sm:$0xff] %v6964_v39  ;;  %v6982_v39 = vpop.f32.mrf.mxu3  ;;  %v6984_v14 = vpop.f32.mrf.mxu2 }
 0x2fa   :  { %9331 = vst [vmem:[#allocation104_spill] sm:$0xff] %v6984_v14 }
 0x2fb   :  { %4991 = vmatmul.msk.f32.gmra.mxu0 %vm172_vm0, %v1730_v63  ;;  %5023 = vmatmul.msk.f32.gmra.mxu1 %vm172_vm0, %v1730_v63  ;;  %v1732_v63 = vld [vmem:[%s9228_s27 + $0xec] sm:$0xff] }
 0x300   :  { %v1909_v48 = vpop.f32.mrf.mxu0  ;;  %v6975_v55 = vpop.f32.mrf.mxu1 }
 0x301   :  { %9330 = vst [vmem:[#allocation103_spill] sm:$0xff] %v6975_v55  ;;  %v6993_v23 = vpop.f32.mrf.mxu3  ;;  %v7000_v14 = vpop.f32.mrf.mxu2 }
 0x302   :  { %9334 = vst [vmem:[#allocation107_spill] sm:$0xff] %v7000_v14  ;;  %v1220_v14 = vadd.f32 %v6627_v3, %v6119_v8 }
 0x303   :  { %4992 = vmatmul.msk.f32.gmra.mxu0 %vm172_vm0, %v1731_v41  ;;  %5024 = vmatmul.msk.f32.gmra.mxu1 %vm172_vm0, %v1731_v41  ;;  %v1733_v41 = vld [vmem:[%s9228_s27 + $0xf4] sm:$0xff] }
 0x308   :  { %v1912_v13 = vpop.f32.mrf.mxu0  ;;  %v6986_v49 = vpop.f32.mrf.mxu1 }
 0x309   :  { %9332 = vst [vmem:[#allocation105_spill] sm:$0xff] %v6986_v49  ;;  %v1224_v49 = vadd.f32 %v6673_v4, %v6147_v34 }
 0x30b   :  { %4993 = vmatmul.msk.f32.gmra.mxu0 %vm172_vm0, %v1732_v63  ;;  %5025 = vmatmul.msk.f32.gmra.mxu1 %vm172_vm0, %v1732_v63  ;;  %v1222_v63 = vadd.f32 %v6659_v5, %v6133_v20  ;;  %v1667_v43 = vadd.f32 %v1472_v59, %v1224_v49  ;;  %v1663_v59 = vadd.f32 %v6920_v29, %v1220_v14  ;;  %v7026_v49 = vperm.slane %v7013_v17, 0 }
 0x30d   :  { %v1665_v34 = vadd.f32 %v1469_v15, %v1222_v63 }
 0x30f   :  { %v2108_v5 = vadd.f32 %v1912_v13, %v1665_v34  ;;  %v1214_v13 = vadd.f32 %v6534_v37, %v5960_v45 }
 0x310   :  { %v1915_v55 = vpop.f32.mrf.mxu0  ;;  %v6995_v52 = vpop.f32.mrf.mxu1 }
 0x311   :  { %9333 = vst [vmem:[#allocation106_spill] sm:$0xff] %v6995_v52  ;;  %v1226_v52 = vadd.f32 %v6687_v28, %v6161_v50  ;;  %v2110_v11 = vadd.f32 %v1915_v55, %v1667_v43  ;;  %v1734_v50 = vld [vmem:[%s9228_s27 + $0xfc] sm:$0xf]  ;;  %v1216_v43 = vadd.f32 %v6557_v33, %v6019_v12  ;;  %v7033_v55 = vpop.f32.mrf.mxu2 }
 0x313   :  { %4994 = vmatmul.msk.f32.gmra.mxu0 %vm172_vm0, %v1733_v41  ;;  %5026 = vmatmul.msk.f32.gmra.mxu1 %vm172_vm0, %v1733_v41  ;;  %v1669_v4 = vadd.f32 %v1475_v44, %v1226_v52  ;;  %v1218_v41 = vadd.f32 %v6595_v7, %v6069_v42  ;;  %v7031_v42 = vpop.f32.mrf.mxu3  ;;  %v2106_v7 = vadd.f32 %v1909_v48, %v1663_v59 }
 0x314   :  { %9336 = vst [vmem:[#allocation108_spill] sm:$0xff] %v7031_v42  ;;  %v2180_v3 = vadd.f32 %v7026_v49, %v2110_v11  ;;  %v1659_v12 = vadd.f32 %v6892_v40, %v1216_v43  ;;  %v1212_v48 = vadd.f32 %v6517_v1, %v5922_v25  ;;  %v1657_v11 = vadd.f32 %v6874_v57, %v1214_v13  ;;  %v9403_v42 = vld [vmem:[#allocation78_spill] sm:$0xff] }
 0x315   :  { %v1661_v52 = vadd.f32 %v6905_v36, %v1218_v41  ;;  %v2178_v36 = vadd.f32 %v7026_v49, %v2108_v5  ;;  %v2176_v14 = vadd.f32 %v7026_v49, %v2106_v7  ;;  %v2094_v41 = vadd.f32 %v6909_v27, %v6497_v54 }
 0x316   :  { %v2102_v33 = vadd.f32 %v6953_v0, %v1659_v12  ;;  %v2244_v15 = vmax.f32 %v2180_v3, 0.0  ;;  %v2100_v40 = vadd.f32 %v6944_v56, %v1657_v11  ;;  %v2090_v43 = vadd.f32 %v6885_v2, %v6465_v38 }
 0x317   :  { %v2242_v25 = vmax.f32 %v2178_v36, 0.0  ;;  %v2240_v0 = vmax.f32 %v2176_v14, 0.0  ;;  %v2164_v27 = vadd.f32 %v7026_v49, %v2094_v41  ;;  %v1227_v13 = vadd.f32 %v6689_v60, %v6163_v51  ;;  %v9344_v14 = vld [vmem:[#allocation101_spill] sm:$0xff]  ;;  %v9351_v41 = vld [vmem:[#allocation4_spill] sm:$0xff] }
 0x318   :  { %v1918_v9 = vpop.f32.mrf.mxu0  ;;  %v7019_v20 = vpop.f32.mrf.mxu1  ;;  %v2172_v1 = vadd.f32 %v7026_v49, %v2102_v33  ;;  %v2160_v2 = vadd.f32 %v7026_v49, %v2090_v43 }
 0x319   :  { %v2112_v8 = vadd.f32 %v1918_v9, %v1669_v4  ;;  %v2104_v9 = vadd.f32 %v1906_v26, %v1661_v52  ;;  %v1655_v26 = vadd.f32 %v6863_v18, %v1212_v48  ;;  %v7059_v34 = vpop.f32.mrf.mxu2  ;;  %v2096_v4 = vadd.f32 %v6922_v31, %v6513_v62 }
 0x31a   :  { %v2170_v18 = vadd.f32 %v7026_v49, %v2100_v40  ;;  %v2088_v52 = vadd.f32 %v6876_v32, %v6449_v30  ;;  %v2228_v38 = vmax.f32 %v2164_v27, 0.0  ;;  %v2084_v30 = vadd.f32 %v6854_v58, %v6417_v19 }
 0x31b   :  { %v2182_v28 = vadd.f32 %v7026_v49, %v2112_v8  ;;  %4995 = vmatmul.msk.f32.gmra.mxu0 %vm172_vm0, %v1734_v50  ;;  %5027 = vmatmul.msk.f32.gmra.mxu1 %vm172_vm0, %v1734_v50  ;;  %v2174_v37 = vadd.f32 %v7026_v49, %v2104_v9  ;;  %v2098_v57 = vadd.f32 %v6933_v47, %v1655_v26  ;;  %v7057_v63 = vpop.f32.mrf.mxu3  ;;  %v2236_v50 = vmax.f32 %v2172_v1, 0.0  ;;  %v9350_v1 = vld [vmem:[#allocation105_spill] sm:$0xff] }
 0x31c   :  { %9338 = vst [vmem:[#allocation110_spill] sm:$0xff] %v7057_v63  ;;  %v2092_v8 = vadd.f32 %v6896_v61, %v6481_v46  ;;  %v2166_v31 = vadd.f32 %v7026_v49, %v2096_v4  ;;  %v2234_v62 = vmax.f32 %v2170_v18, 0.0  ;;  %v2086_v46 = vadd.f32 %v6865_v16, %v6433_v22 }
 0x31d   :  { %v2246_v29 = vmax.f32 %v2182_v28, 0.0  ;;  %v2238_v56 = vmax.f32 %v2174_v37, 0.0  ;;  %v2168_v47 = vadd.f32 %v7026_v49, %v2098_v57  ;;  %v2158_v9 = vadd.f32 %v7026_v49, %v2088_v52  ;;  %v9348_v37 = vld [vmem:[#allocation99_spill] sm:$0xff] }
 0x31e   :  { %v2162_v7 = vadd.f32 %v7026_v49, %v2092_v8  ;;  %v2230_v3 = vmax.f32 %v2166_v31, 0.0  ;;  %v1225_v16 = vadd.f32 %v6675_v6, %v6149_v35  ;;  %v1670_v22 = vadd.f32 %v6993_v23, %v1227_v13  ;;  %v9342_v6 = vld [vmem:[#allocation6_spill] sm:$0xff]  ;;  %v9343_v23 = vld [vmem:[#allocation51_spill] sm:$0xff]  ;;  %v9353_v8 = vld [vmem:[#allocation96_spill] sm:$0xff] }
 0x31f   :  { %2358 = vmatpush.msra.mxu2 %v2246_v29  ;;  %v2232_v54 = vmax.f32 %v2168_v47, 0.0  ;;  %v2082_v29 = vadd.f32 %v6845_v24, %v6401_v53  ;;  %v2156_v51 = vadd.f32 %v7026_v49, %v2086_v46  ;;  %v2224_v60 = vmax.f32 %v2160_v2, 0.0  ;;  %v9352_v47 = vld [vmem:[#allocation49_spill] sm:$0xff]  ;;  %v9356_v52 = vld [vmem:[#allocation3_spill] sm:$0xff]  ;;  %v9358_v2 = vld [vmem:[#allocation94_spill] sm:$0xff] }
 0x320   :  { %v7048_v44 = vpop.f32.mrf.mxu0  ;;  %v7050_v45 = vpop.f32.mrf.mxu1  ;;  %v2226_v36 = vmax.f32 %v2162_v7, 0.0  ;;  %v1223_v48 = vadd.f32 %v6661_v10, %v6135_v21  ;;  %v1668_v58 = vadd.f32 %v6982_v39, %v1225_v16  ;;  %v2113_v19 = vadd.f32 %v7019_v20, %v1670_v22  ;;  %v9346_v39 = vld [vmem:[#allocation5_spill] sm:$0xff]  ;;  %v9347_v20 = vld [vmem:[#allocation50_spill] sm:$0xff]  ;;  %v9357_v7 = vld [vmem:[#allocation48_spill] sm:$0xff] }
 0x321   :  { %9337 = vst [vmem:[#allocation109_spill] sm:$0xff] %v7050_v45  ;;  %2359 = vmatpush.msra.mxu2 %v2244_v15  ;;  %v7082_v61 = vpop.f32.mrf.mxu2  ;;  %v2154_v11 = vadd.f32 %v7026_v49, %v2084_v30  ;;  %v2222_v35 = vmax.f32 %v2158_v9, 0.0  ;;  %v1221_v33 = vadd.f32 %v9343_v23, %v9342_v6  ;;  %v7111_v24 = vperm.slane %v7013_v17, 1  ;;  %v9345_v15 = vld [vmem:[#allocation106_spill] sm:$0xff]  ;;  %v9359_v13 = vld [vmem:[#allocation100_spill] sm:$0xff]  ;;  %v9361_v22 = vld [vmem:[#allocation47_spill] sm:$0xff] }
 0x322   :  { %v1666_v53 = vadd.f32 %v9344_v14, %v1223_v48  ;;  %v2111_v26 = vadd.f32 %v9345_v15, %v1668_v58  ;;  %v2152_v21 = vadd.f32 %v7026_v49, %v2082_v29  ;;  %v2220_v10 = vmax.f32 %v2156_v51, 0.0  ;;  %v9360_v16 = vld [vmem:[#allocation2_spill] sm:$0xff]  ;;  %v9362_v51 = vld [vmem:[#allocation92_spill] sm:$0xff]  ;;  %v9365_v23 = vld [vmem:[#allocation97_spill] sm:$0xff] }
 0x323   :  { %2360 = vmatpush.msra.mxu2 %v2242_v25  ;;  %v7080_v28 = vpop.f32.mrf.mxu3  ;;  %v1219_v40 = vadd.f32 %v9347_v20, %v9346_v39  ;;  %v1664_v25 = vadd.f32 %v9348_v37, %v1221_v33  ;;  %v2183_v4 = vadd.f32 %v7111_v24, %v2113_v19  ;;  %v1213_v29 = vadd.f32 %v9361_v22, %v9360_v16  ;;  %v9363_v48 = vld [vmem:[#allocation98_spill] sm:$0xff]  ;;  %v9379_v22 = vld [vmem:[#allocation87_spill] sm:$0xff] }
 0x324   :  { %9340 = vst [vmem:[#allocation112_spill] sm:$0xff] %v7080_v28  ;;  %v2181_v27 = vadd.f32 %v7111_v24, %v2111_v26  ;;  %v2216_v46 = vmax.f32 %v2152_v21, 0.0  ;;  %v9367_v21 = vld [vmem:[#allocation95_spill] sm:$0xff]  ;;  %v9368_v37 = vld [vmem:[#allocation46_spill] sm:$0xff] }
 0x325   :  { %2361 = vmatpush.msra.mxu2 %v2240_v0  ;;  %v2109_v0 = vadd.f32 %v9350_v1, %v1666_v53  ;;  %v1662_v31 = vadd.f32 %v9353_v8, %v1219_v40  ;;  %v9378_v16 = vld [vmem:[#allocation42_spill] sm:$0xff]  ;;  %v9406_v28 = vld [vmem:[#allocation31_spill] sm:$0xff] }
 0x326   :  { %v7293_v45 = vld [vmem:[%s9197_s3 + $0xa0] sm:$0xff] }
 0x327   :  { %2362 = vmatpush.msra.mxu2 %v2238_v56  ;;  %v2218_v56 = vmax.f32 %v2154_v11, 0.0  ;;  %v2105_v30 = vadd.f32 %v9359_v13, %v1662_v31  ;;  %v2179_v9 = vadd.f32 %v7111_v24, %v2109_v0  ;;  %v2245_v11 = vmax.f32 %v2181_v27, 0.0  ;;  %v9374_v27 = vld [vmem:[#allocation89_spill] sm:$0xff]  ;;  %9401 = vst [vmem:[#allocation92_spill] sm:$0xff] %v7293_v45 }
 0x328   :  { %v7067_v59 = vpop.f32.mrf.mxu0  ;;  %v7069_v5 = vpop.f32.mrf.mxu1 }
 0x329   :  { %9339 = vst [vmem:[#allocation111_spill] sm:$0xff] %v7069_v5  ;;  %2363 = vmatpush.msra.mxu2 %v2236_v50  ;;  %v7124_v17 = vpop.f32.mrf.mxu2  ;;  %v1217_v50 = vadd.f32 %v9352_v47, %v9351_v41  ;;  %v2175_v14 = vadd.f32 %v7111_v24, %v2105_v30  ;;  %v2243_v15 = vmax.f32 %v2179_v9, 0.0  ;;  %v7162_v41 = vld [vmem:[%s9197_s3] sm:$0xff]  ;;  %v9371_v47 = vld [vmem:[#allocation45_spill] sm:$0xff] }
 0x32a   :  { %v9402_v5 = vld [vmem:[#allocation33_spill] sm:$0xff] }
 0x32b   :  { %2364 = vmatpush.msra.mxu2 %v2234_v62  ;;  %v7118_v57 = vpop.f32.mrf.mxu3  ;;  %v9354_v62 = vld [vmem:[#allocation103_spill] sm:$0xff] }
 0x32c   :  { %9349 = vst [vmem:[#allocation6_spill] sm:$0xff] %v7118_v57  ;;  %v2107_v43 = vadd.f32 %v9354_v62, %v1664_v25  ;;  %v9369_v25 = vld [vmem:[#allocation93_spill] sm:$0xff] }
 0x32d   :  { %2365 = vmatpush.msra.mxu2 %v2232_v54  ;;  %v2097_v1 = vadd.f32 %v9369_v25, %v9368_v37  ;;  %v9385_v37 = vld [vmem:[#allocation39_spill] sm:$0xff]  ;;  %v9386_v25 = vld [vmem:[#allocation84_spill] sm:$0xff] }
 0x32e   :  { %v2177_v19 = vadd.f32 %v7111_v24, %v2107_v43  ;;  %v9373_v43 = vld [vmem:[#allocation44_spill] sm:$0xff] }
 0x32f   :  { %2366 = vmatpush.msra.mxu2 %v2230_v3  ;;  %v1215_v3 = vadd.f32 %v9357_v7, %v9356_v52  ;;  %v2093_v52 = vadd.f32 %v9374_v27, %v9373_v43  ;;  %v2167_v7 = vadd.f32 %v7111_v24, %v2097_v1  ;;  %v2083_v1 = vadd.f32 %v9386_v25, %v9385_v37 }
 0x330   :  { %v7089_v12 = vpop.f32.mrf.mxu0  ;;  %v7091_v32 = vpop.f32.mrf.mxu1  ;;  %v2241_v20 = vmax.f32 %v2177_v19, 0.0  ;;  %v9380_v19 = vld [vmem:[#allocation41_spill] sm:$0xff] }
 0x331   :  { %9341 = vst [vmem:[#allocation113_spill] sm:$0xff] %v7091_v32  ;;  %2367 = vmatpush.msra.mxu2 %v2228_v38  ;;  %v1660_v38 = vadd.f32 %v9358_v2, %v1217_v50  ;;  %v7152_v40 = vpop.f32.mrf.mxu2  ;;  %v9372_v50 = vld [vmem:[#allocation91_spill] sm:$0xff]  ;;  %v1254_v32 = vadd.f32 %v9403_v42, %v9402_v5  ;;  %v9411_v5 = vld [vmem:[#allocation72_spill] sm:$0xff] }
 0x332   :  { %v2095_v8 = vadd.f32 %v9372_v50, %v9371_v47  ;;  %v9375_v2 = vld [vmem:[#allocation43_spill] sm:$0xff] }
 0x333   :  { %2368 = vmatpush.msra.mxu2 %v2226_v36  ;;  %v2247_v36 = vmax.f32 %v2183_v4, 0.0  ;;  %v2103_v58 = vadd.f32 %v9363_v48, %v1660_v38  ;;  %v7148_v26 = vpop.f32.mrf.mxu3  ;;  %v9376_v38 = vld [vmem:[#allocation88_spill] sm:$0xff]  ;;  %v9410_v42 = vld [vmem:[#allocation27_spill] sm:$0xff] }
 0x334   :  { %9366 = vst [vmem:[#allocation101_spill] sm:$0xff] %v7148_v26  ;;  %v2091_v13 = vadd.f32 %v9376_v38, %v9375_v2  ;;  %v2165_v30 = vadd.f32 %v7111_v24, %v2095_v8  ;;  %v7184_v48 = vld [vmem:[%s9197_s3 + $0x10] sm:$0xff]  ;;  %v7206_v8 = vld [vmem:[%s9197_s3 + $0x20] sm:$0xff] }
 0x335   :  { %2369 = vmatpush.msra.mxu2 %v2224_v60  ;;  %v1658_v60 = vadd.f32 %v9362_v51, %v1215_v3  ;;  %v2173_v39 = vadd.f32 %v7111_v24, %v2103_v58  ;;  %v2163_v51 = vadd.f32 %v7111_v24, %v2093_v52  ;;  %9387 = vst [vmem:[#allocation99_spill] sm:$0xff] %v7206_v8  ;;  %v7221_v38 = vld [vmem:[%s9197_s3 + $0x30] sm:$0xff] }
 0x336   :  { %9390 = vst [vmem:[#allocation49_spill] sm:$0xff] %v7221_v38 }
 0x337   :  { %2370 = vmatpush.msra.mxu2 %v2222_v35  ;;  %v9364_v35 = vld [vmem:[#allocation90_spill] sm:$0xff]  ;;  %v2101_v33 = vadd.f32 %v9365_v23, %v1658_v60  ;;  %v2237_v62 = vmax.f32 %v2173_v39, 0.0  ;;  %v2231_v60 = vmax.f32 %v2167_v7, 0.0 }
 0x338   :  { %v7122_v18 = vpop.f32.mrf.mxu0  ;;  %v7131_v54 = vpop.f32.mrf.mxu1  ;;  %v1656_v6 = vadd.f32 %v9364_v35, %v1213_v29  ;;  %v2089_v29 = vadd.f32 %v9379_v22, %v9378_v16  ;;  %v7233_v22 = vld [vmem:[%s9197_s3 + $0x40] sm:$0xff] }
 0x339   :  { %2371 = vmatpush.msra.mxu2 %v2220_v10  ;;  %9355 = vst [vmem:[#allocation51_spill] sm:$0xff] %v7131_v54  ;;  %v2171_v0 = vadd.f32 %v7111_v24, %v2101_v33  ;;  %v7186_v58 = vpop.f32.mrf.mxu2  ;;  %v2229_v33 = vmax.f32 %v2165_v30, 0.0 }
 0x33a   :  { %v2099_v10 = vadd.f32 %v9367_v21, %v1656_v6  ;;  %v2161_v6 = vadd.f32 %v7111_v24, %v2091_v13  ;;  %9392 = vst [vmem:[#allocation103_spill] sm:$0xff] %v7233_v22 }
 0x33b   :  { %2372 = vmatpush.msra.mxu2 %v2218_v56  ;;  %v2239_v56 = vmax.f32 %v2175_v14, 0.0  ;;  %v9383_v14 = vld [vmem:[#allocation40_spill] sm:$0xff] }
 0x33c   :  { %v2169_v31 = vadd.f32 %v7111_v24, %v2099_v10  ;;  %v2159_v10 = vadd.f32 %v7111_v24, %v2089_v29 }
 0x33d   :  { %2373 = vmatpush.msra.mxu2 %v2216_v46  ;;  %v2235_v46 = vmax.f32 %v2171_v0, 0.0 }
 0x33e   :  { %2374 = vmatmul.f32.vlgmr.msra.gmra.mxu2 %v7162_v41  ;;  %v2233_v9 = vmax.f32 %v2169_v31, 0.0  ;;  %v2223_v50 = vmax.f32 %v2159_v10, 0.0  ;;  %v7261_v10 = vld [vmem:[%s9197_s3 + $0x70] sm:$0xff] }
 0x33f   :  { %2476 = vmatpush.msrb.mxu2 %v2247_v36  ;;  %v7176_v36 = vpop.f32.mrf.mxu3  ;;  %9396 = vst [vmem:[#allocation100_spill] sm:$0xff] %v7261_v10 }
 0x340   :  { %v7146_v53 = vpop.f32.mrf.mxu0  ;;  %v7157_v4 = vpop.f32.mrf.mxu1  ;;  %9377 = vst [vmem:[#allocation5_spill] sm:$0xff] %v7176_v36  ;;  %v9409_v36 = vld [vmem:[#allocation74_spill] sm:$0xff] }
 0x341   :  { %2477 = vmatpush.msrb.mxu2 %v2245_v11  ;;  %9370 = vst [vmem:[#allocation106_spill] sm:$0xff] %v7157_v4  ;;  %v9381_v11 = vld [vmem:[#allocation86_spill] sm:$0xff]  ;;  %v7212_v27 = vpop.f32.mrf.mxu2  ;;  %v9407_v4 = vld [vmem:[#allocation76_spill] sm:$0xff] }
 0x342   :  { %v2087_v35 = vadd.f32 %v9381_v11, %v9380_v19  ;;  %v7245_v11 = vld [vmem:[%s9197_s3 + $0x50] sm:$0xff] }
 0x343   :  { %2478 = vmatpush.msrb.mxu2 %v2243_v15  ;;  %v9384_v15 = vld [vmem:[#allocation85_spill] sm:$0xff]  ;;  %9394 = vst [vmem:[#allocation48_spill] sm:$0xff] %v7245_v11 }
 0x344   :  { %v2085_v21 = vadd.f32 %v9384_v15, %v9383_v14  ;;  %v2157_v0 = vadd.f32 %v7111_v24, %v2087_v35 }
 0x345   :  { %2479 = vmatpush.msrb.mxu2 %v2241_v20  ;;  %v2227_v20 = vmax.f32 %v2163_v51, 0.0 }
 0x346   :  { %2377 = vmatmul.f32.gmra.mxu2 %v7184_v48  ;;  %v2155_v47 = vadd.f32 %v7111_v24, %v2085_v21  ;;  %v2221_v43 = vmax.f32 %v2157_v0, 0.0  ;;  %v7271_v0 = vld [vmem:[%s9197_s3 + $0x80] sm:$0xff] }
 0x347   :  { %2480 = vmatpush.msrb.mxu2 %v2239_v56  ;;  %v2225_v56 = vmax.f32 %v2161_v6, 0.0  ;;  %v7209_v31 = vpop.f32.mrf.mxu3  ;;  %9397 = vst [vmem:[#allocation2_spill] sm:$0xff] %v7271_v0 }
 0x348   :  { %v7171_v3 = vpop.f32.mrf.mxu0  ;;  %v7192_v23 = vpop.f32.mrf.mxu1  ;;  %9388 = vst [vmem:[#allocation105_spill] sm:$0xff] %v7209_v31 }
 0x349   :  { %2481 = vmatpush.msrb.mxu2 %v2237_v62  ;;  %9382 = vst [vmem:[#allocation50_spill] sm:$0xff] %v7192_v23  ;;  %v2153_v62 = vadd.f32 %v7111_v24, %v2083_v1 }
 0x34b   :  { %2482 = vmatpush.msrb.mxu2 %v2235_v46  ;;  %v2219_v46 = vmax.f32 %v2155_v47, 0.0  ;;  %v2217_v2 = vmax.f32 %v2153_v62, 0.0 }
 0x34d   :  { %2483 = vmatpush.msrb.mxu2 %v2233_v9  ;;  %v1508_v9 = vpop.f32.mrf.mxu2 }
 0x34e   :  { %2380 = vmatmul.f32.gmra.mxu2 %v7206_v8 }
 0x34f   :  { %2484 = vmatpush.msrb.mxu2 %v2231_v60  ;;  %v7224_v13 = vpop.f32.mrf.mxu3 }
 0x350   :  { %v7197_v39 = vpop.f32.mrf.mxu0  ;;  %v7214_v52 = vpop.f32.mrf.mxu1 }
 0x351   :  { %2485 = vmatpush.msrb.mxu2 %v2229_v33  ;;  %9389 = vst [vmem:[#allocation4_spill] sm:$0xff] %v7214_v52  ;;  %v7253_v33 = vld [vmem:[%s9197_s3 + $0x60] sm:$0xff]  ;;  %v9408_v52 = vld [vmem:[#allocation29_spill] sm:$0xff] }
 0x352   :  { %9395 = vst [vmem:[#allocation94_spill] sm:$0xff] %v7253_v33  ;;  %v1250_v8 = vadd.f32 %v9409_v36, %v9408_v52  ;;  %v9415_v52 = vld [vmem:[#allocation68_spill] sm:$0xff] }
 0x353   :  { %2486 = vmatpush.msrb.mxu2 %v2227_v20 }
 0x355   :  { %2487 = vmatpush.msrb.mxu2 %v2225_v56  ;;  %v1511_v60 = vpop.f32.mrf.mxu2 }
 0x356   :  { %2383 = vmatmul.f32.gmra.mxu2 %v7221_v38  ;;  %v9404_v38 = vld [vmem:[#allocation37_spill] sm:$0xff] }
 0x357   :  { %2488 = vmatpush.msrb.mxu2 %v2223_v50  ;;  %v7238_v51 = vpop.f32.mrf.mxu3 }
 0x358   :  { %v7216_v7 = vpop.f32.mrf.mxu0  ;;  %v7228_v16 = vpop.f32.mrf.mxu1 }
 0x359   :  { %2489 = vmatpush.msrb.mxu2 %v2221_v43  ;;  %9391 = vst [vmem:[#allocation96_spill] sm:$0xff] %v7228_v16  ;;  %v7281_v43 = vld [vmem:[%s9197_s3 + $0x90] sm:$0xff] }
 0x35a   :  { %9398 = vst [vmem:[#allocation47_spill] sm:$0xff] %v7281_v43 }
 0x35b   :  { %2490 = vmatpush.msrb.mxu2 %v2219_v46 }
 0x35d   :  { %2491 = vmatpush.msrb.mxu2 %v2217_v2  ;;  %v1514_v14 = vpop.f32.mrf.mxu2 }
 0x35e   :  { %2386 = vmatmul.f32.gmra.mxu2 %v7233_v22 }
 0x35f   :  { %v7248_v6 = vpop.f32.mrf.mxu3 }
 0x360   :  { %v7226_v30 = vpop.f32.mrf.mxu0  ;;  %v7240_v19 = vpop.f32.mrf.mxu1 }
 0x361   :  { %9393 = vst [vmem:[#allocation3_spill] sm:$0xff] %v7240_v19 }
 0x365   :  { %v1517_v37 = vpop.f32.mrf.mxu2 }
 0x366   :  { %2389 = vmatmul.f32.gmra.mxu2 %v7245_v11 }
 0x367   :  { %v7264_v20 = vpop.f32.mrf.mxu3 }
 0x368   :  { %v7236_v29 = vpop.f32.mrf.mxu0  ;;  %v7256_v15 = vpop.f32.mrf.mxu1 }
 0x36d   :  { %v1520_v50 = vpop.f32.mrf.mxu2 }
 0x36e   :  { %2392 = vmatmul.f32.gmra.mxu2 %v7253_v33  ;;  %v9400_v33 = vld [vmem:[#allocation80_spill] sm:$0xff] }
 0x36f   :  { %v7274_v56 = vpop.f32.mrf.mxu3 }
 0x370   :  { %v1951_v35 = vpop.f32.mrf.mxu0  ;;  %v7266_v25 = vpop.f32.mrf.mxu1 }
 0x376   :  { %2395 = vmatmul.f32.gmra.mxu2 %v7261_v10  ;;  %v9399_v10 = vld [vmem:[#allocation35_spill] sm:$0xff] }
 0x377   :  { %v7284_v2 = vpop.f32.mrf.mxu3  ;;  %v1256_v11 = vadd.f32 %v9400_v33, %v9399_v10  ;;  %v1252_v33 = vadd.f32 %v9407_v4, %v9406_v28  ;;  %v1697_v10 = vadd.f32 %v1517_v37, %v1254_v32  ;;  %v9412_v28 = vld [vmem:[#allocation25_spill] sm:$0xff]  ;;  %v9413_v32 = vld [vmem:[#allocation70_spill] sm:$0xff]  ;;  %v7315_v4 = vld [vmem:[%s9197_s3 + $0xb0] sm:$0xff] }
 0x378   :  { %v1954_v21 = vpop.f32.mrf.mxu0  ;;  %v7276_v62 = vpop.f32.mrf.mxu1 }
 0x379   :  { %v1699_v63 = vadd.f32 %v1520_v50, %v1256_v11  ;;  %v1695_v16 = vadd.f32 %v1514_v14, %v1252_v33  ;;  %v1248_v11 = vadd.f32 %v9411_v5, %v9410_v42  ;;  %v1693_v50 = vadd.f32 %v1511_v60, %v1250_v8  ;;  %v9418_v33 = vld [vmem:[#allocation19_spill] sm:$0xff] }
 0x37e   :  { %2398 = vmatmul.f32.gmra.mxu2 %v7271_v0  ;;  %v1523_v0 = vpop.f32.mrf.mxu2 }
 0x380   :  { %v1957_v1 = vpop.f32.mrf.mxu0  ;;  %v7288_v22 = vpop.f32.mrf.mxu1 }
 0x386   :  { %2401 = vmatmul.f32.gmra.mxu2 %v7281_v43  ;;  %v9405_v43 = vld [vmem:[#allocation82_spill] sm:$0xff] }
 0x387   :  { %v1258_v54 = vadd.f32 %v9405_v43, %v9404_v38  ;;  %v2138_v38 = vadd.f32 %v1957_v1, %v1695_v16 }
 0x388   :  { %v1960_v47 = vpop.f32.mrf.mxu0  ;;  %v7321_v60 = vpop.f32.mrf.mxu1 }
 0x389   :  { %v1701_v57 = vadd.f32 %v1523_v0, %v1258_v54  ;;  %v2140_v31 = vadd.f32 %v1960_v47, %v1697_v10  ;;  %v1246_v54 = vadd.f32 %v9413_v32, %v9412_v28  ;;  %v2208_v37 = vadd.f32 %v7026_v49, %v2138_v38  ;;  %v9419_v10 = vld [vmem:[#allocation64_spill] sm:$0xff]  ;;  %v9421_v38 = vld [vmem:[#allocation62_spill] sm:$0xff]  ;;  %v9422_v32 = vld [vmem:[#allocation15_spill] sm:$0xff] }
 0x38b   :  { %v2210_v36 = vadd.f32 %v7026_v49, %v2140_v31 }
 0x38e   :  { %2404 = vmatmul.f32.gmra.mxu2 %v7293_v45 }
 0x390   :  { %v1963_v46 = vpop.f32.mrf.mxu0 }
 0x391   :  { %v2142_v23 = vadd.f32 %v1963_v46, %v1699_v63  ;;  %v7310_v63 = vpop.f32.mrf.mxu3  ;;  %v2274_v46 = vmax.f32 %v2210_v36, 0.0 }
 0x393   :  { %v2212_v43 = vadd.f32 %v7026_v49, %v2142_v23  ;;  %v9414_v23 = vld [vmem:[#allocation23_spill] sm:$0xff] }
 0x394   :  { %v1244_v16 = vadd.f32 %v9415_v52, %v9414_v23  ;;  %v9424_v52 = vld [vmem:[#allocation13_spill] sm:$0xff] }
 0x395   :  { %v2276_v1 = vmax.f32 %v2212_v43, 0.0 }
 0x396   :  { %2407 = vmatmul.f32.gmra.mxu2 %v7315_v4 }
 0x398   :  { %v1966_v26 = vpop.f32.mrf.mxu0 }
 0x399   :  { %v2144_v19 = vadd.f32 %v1966_v26, %v1701_v57  ;;  %v1691_v57 = vadd.f32 %v1508_v9, %v1248_v11  ;;  %v2136_v26 = vadd.f32 %v1954_v21, %v1693_v50  ;;  %v9416_v9 = vld [vmem:[#allocation21_spill] sm:$0xff]  ;;  %v9417_v21 = vld [vmem:[#allocation66_spill] sm:$0xff]  ;;  %v2272_v11 = vmax.f32 %v2208_v37, 0.0 }
 0x39a   :  { %v1242_v0 = vadd.f32 %v9417_v21, %v9416_v9  ;;  %v9420_v50 = vld [vmem:[#allocation17_spill] sm:$0xff]  ;;  %v9426_v21 = vld [vmem:[#allocation11_spill] sm:$0xff] }
 0x39b   :  { %v2214_v45 = vadd.f32 %v7026_v49, %v2144_v19  ;;  %v1689_v19 = vadd.f32 %v7212_v27, %v1246_v54  ;;  %v2134_v14 = vadd.f32 %v1951_v35, %v1691_v57  ;;  %v2206_v47 = vadd.f32 %v7026_v49, %v2136_v26  ;;  %v9423_v54 = vld [vmem:[#allocation60_spill] sm:$0xff]  ;;  %v1633_v26 = vpop.f32.mrf.mxu3 }
 0x39c   :  { %v1240_v27 = vadd.f32 %v9419_v10, %v9418_v33  ;;  %v1685_v35 = vadd.f32 %v7152_v40, %v1242_v0  ;;  %v1236_v57 = vadd.f32 %v9423_v54, %v9422_v32  ;;  %v9429_v33 = vld [vmem:[#allocation54_spill] sm:$0xff]  ;;  %v9430_v10 = vld [vmem:[#allocation107_spill] sm:$0xff] }
 0x39d   :  { %v2278_v8 = vmax.f32 %v2214_v45, 0.0  ;;  %v1687_v45 = vadd.f32 %v7186_v58, %v1244_v16  ;;  %v2132_v31 = vadd.f32 %v7236_v29, %v1689_v19  ;;  %v2204_v5 = vadd.f32 %v7026_v49, %v2134_v14  ;;  %v7341_v29 = vld [vmem:[%s9197_s3 + $0xc0] sm:$0xff]  ;;  %v2076_v19 = vpop.f32.mrf.mxu1  ;;  %v9436_v54 = vld [vmem:[#allocation83_spill] sm:$0xff] }
 0x39e   :  { %v1238_v58 = vadd.f32 %v9421_v38, %v9420_v50  ;;  %v1683_v43 = vadd.f32 %v7124_v17, %v1240_v27  ;;  %v2128_v28 = vadd.f32 %v7216_v7, %v1685_v35  ;;  %2410 = vmatmul.f32.gmra.mxu2 %v7341_v29  ;;  %v9425_v7 = vld [vmem:[#allocation58_spill] sm:$0xff]  ;;  %v1679_v14 = vadd.f32 %v7059_v34, %v1236_v57  ;;  %v9433_v50 = vld [vmem:[#allocation104_spill] sm:$0xff] }
 0x39f   :  { %5028 = vmatpush.msk.msra.mxu3 %vm2351_vm1, %v2278_v8  ;;  %v2130_v42 = vadd.f32 %v7226_v30, %v1687_v45  ;;  %v2202_v40 = vadd.f32 %v7026_v49, %v2132_v31  ;;  %v2270_v30 = vmax.f32 %v2206_v47, 0.0  ;;  %v2268_v17 = vmax.f32 %v2204_v5, 0.0  ;;  %v9432_v5 = vld [vmem:[#allocation52_spill] sm:$0xff]  ;;  %v9435_v32 = vld [vmem:[#allocation38_spill] sm:$0xff] }
 0x3a0   :  { %v1681_v36 = vadd.f32 %v7082_v61, %v1238_v58  ;;  %v2126_v8 = vadd.f32 %v7197_v39, %v1683_v43  ;;  %v1234_v16 = vadd.f32 %v9425_v7, %v9424_v52  ;;  %v9427_v61 = vld [vmem:[#allocation56_spill] sm:$0xff]  ;;  %v2122_v45 = vadd.f32 %v7146_v53, %v1679_v14  ;;  %v9438_v52 = vld [vmem:[#allocation81_spill] sm:$0xff] }
 0x3a1   :  { %2418 = vmatpush.msra.mxu3 %v2276_v1  ;;  %v2200_v23 = vadd.f32 %v7026_v49, %v2130_v42  ;;  %v2198_v1 = vadd.f32 %v7026_v49, %v2128_v28  ;;  %v2266_v9 = vmax.f32 %v2202_v40, 0.0  ;;  %v1232_v0 = vadd.f32 %v9427_v61, %v9426_v21  ;;  %v9431_v42 = vld [vmem:[#allocation7_spill] sm:$0xff]  ;;  %v9434_v40 = vld [vmem:[#allocation102_spill] sm:$0xff] }
 0x3a2   :  { %v2124_v37 = vadd.f32 %v7171_v3, %v1681_v36  ;;  %v1677_v39 = vadd.f32 %v7033_v55, %v1234_v16  ;;  %v2196_v31 = vadd.f32 %v7026_v49, %v2126_v8  ;;  %v7367_v3 = vld [vmem:[%s9197_s3 + $0xd0] sm:$0xff]  ;;  %v2192_v43 = vadd.f32 %v7026_v49, %v2122_v45  ;;  %v9440_v21 = vld [vmem:[#allocation79_spill] sm:$0xff] }
 0x3a3   :  { %2419 = vmatpush.msra.mxu3 %v2274_v46  ;;  %v2264_v47 = vmax.f32 %v2200_v23, 0.0  ;;  %v9428_v46 = vld [vmem:[#allocation9_spill] sm:$0xff]  ;;  %v1675_v27 = vadd.f32 %v9430_v10, %v1232_v0  ;;  %v2262_v53 = vmax.f32 %v2198_v1, 0.0  ;;  %v1259_v57 = vadd.f32 %v9436_v54, %v9435_v32 }
 0x3a4   :  { %v1230_v34 = vadd.f32 %v9429_v33, %v9428_v46  ;;  %v2120_v35 = vadd.f32 %v7122_v18, %v1677_v39  ;;  %v2194_v55 = vadd.f32 %v7026_v49, %v2124_v37  ;;  %v2260_v28 = vmax.f32 %v2196_v31, 0.0  ;;  %v1636_v18 = vpop.f32.mrf.mxu3  ;;  %v9441_v31 = vld [vmem:[#allocation32_spill] sm:$0xff] }
 0x3a5   :  { %2420 = vmatpush.msra.mxu3 %v2272_v11  ;;  %v1228_v11 = vadd.f32 %v9432_v5, %v9431_v42  ;;  %v2118_v58 = vadd.f32 %v7089_v12, %v1675_v27  ;;  %v2079_v12 = vpop.f32.mrf.mxu1  ;;  %v1702_v16 = vadd.f32 %v1636_v18, %v1259_v57  ;;  %v2256_v1 = vmax.f32 %v2192_v43, 0.0  ;;  %v9443_v27 = vld [vmem:[#allocation30_spill] sm:$0xff]  ;;  %v9445_v5 = vld [vmem:[#allocation28_spill] sm:$0xff]  ;;  %v9450_v18 = vld [vmem:[#allocation69_spill] sm:$0xff] }
 0x3a6   :  { %2413 = vmatmul.f32.gmra.mxu2 %v7367_v3  ;;  %v1673_v38 = vadd.f32 %v9433_v50, %v1230_v34  ;;  %v2190_v8 = vadd.f32 %v7026_v49, %v2120_v35  ;;  %v2258_v23 = vmax.f32 %v2194_v55, 0.0  ;;  %v9444_v35 = vld [vmem:[#allocation75_spill] sm:$0xff] }
 0x3a7   :  { %2421 = vmatpush.msra.mxu3 %v2270_v30  ;;  %v1671_v30 = vadd.f32 %v9434_v40, %v1228_v11  ;;  %v2188_v37 = vadd.f32 %v7026_v49, %v2118_v58  ;;  %v2145_v39 = vadd.f32 %v2079_v12, %v1702_v16  ;;  %v9446_v11 = vld [vmem:[#allocation73_spill] sm:$0xff]  ;;  %v9448_v58 = vld [vmem:[#allocation71_spill] sm:$0xff]  ;;  %v9453_v12 = vld [vmem:[#allocation20_spill] sm:$0xff] }
 0x3a8   :  { %v2116_v36 = vadd.f32 %v7067_v59, %v1673_v38  ;;  %v2254_v45 = vmax.f32 %v2190_v8, 0.0  ;;  %v1249_v50 = vadd.f32 %v9446_v11, %v9445_v5  ;;  %v9452_v8 = vld [vmem:[#allocation67_spill] sm:$0xff]  ;;  %v9467_v5 = vld [vmem:[#allocation101_spill] sm:$0xff] }
 0x3a9   :  { %2422 = vmatpush.msra.mxu3 %v2268_v17  ;;  %v9437_v17 = vld [vmem:[#allocation36_spill] sm:$0xff]  ;;  %v2114_v14 = vadd.f32 %v7048_v44, %v1671_v30  ;;  %v2252_v10 = vmax.f32 %v2188_v37, 0.0  ;;  %v2215_v42 = vadd.f32 %v7111_v24, %v2145_v39 }
 0x3aa   :  { %v1257_v7 = vadd.f32 %v9438_v52, %v9437_v17  ;;  %v2186_v59 = vadd.f32 %v7026_v49, %v2116_v36  ;;  %v9449_v30 = vld [vmem:[#allocation24_spill] sm:$0xff]  ;;  %v9451_v36 = vld [vmem:[#allocation22_spill] sm:$0xff] }
 0x3ab   :  { %2423 = vmatpush.msra.mxu3 %v2266_v9  ;;  %v9439_v9 = vld [vmem:[#allocation34_spill] sm:$0xff]  ;;  %v2184_v33 = vadd.f32 %v7026_v49, %v2114_v14  ;;  %v1245_v32 = vadd.f32 %v9450_v18, %v9449_v30  ;;  %v9455_v14 = vld [vmem:[#allocation3_spill] sm:$0xff]  ;;  %v9459_v39 = vld [vmem:[#allocation96_spill] sm:$0xff] }
 0x3ac   :  { %v1255_v61 = vadd.f32 %v9440_v21, %v9439_v9  ;;  %v1700_v0 = vadd.f32 %v1633_v26, %v1257_v7  ;;  %v1251_v26 = vadd.f32 %v9444_v35, %v9443_v27  ;;  %v9457_v21 = vld [vmem:[#allocation63_spill] sm:$0xff]  ;;  %v9464_v27 = vld [vmem:[#allocation4_spill] sm:$0xff] }
 0x3ad   :  { %2424 = vmatpush.msra.mxu3 %v2264_v47  ;;  %v9442_v47 = vld [vmem:[#allocation77_spill] sm:$0xff]  ;;  %v2248_v38 = vmax.f32 %v2184_v33, 0.0  ;;  %v7465_v18 = vld [vmem:[%s9197_s3 + $0x28] sm:$0xff] }
 0x3ae   :  { %2492 = vmatmul.f32.vlgmr.msrb.gmra.mxu2 %v7162_v41  ;;  %v1253_v46 = vadd.f32 %v9442_v47, %v9441_v31  ;;  %v1698_v44 = vadd.f32 %v7310_v63, %v1255_v61  ;;  %v2143_v34 = vadd.f32 %v2076_v19, %v1700_v0  ;;  %v2250_v41 = vmax.f32 %v2186_v59, 0.0  ;;  %v9458_v0 = vld [vmem:[#allocation105_spill] sm:$0xff]  ;;  %v9460_v47 = vld [vmem:[#allocation99_spill] sm:$0xff] }
 0x3af   :  { %2425 = vmatpush.msra.mxu3 %v2262_v53  ;;  %v1694_v63 = vadd.f32 %v7274_v56, %v1251_v26 }
 0x3b0   :  { %v1696_v55 = vadd.f32 %v7284_v2, %v1253_v46  ;;  %v2141_v53 = vadd.f32 %v7321_v60, %v1698_v44  ;;  %v2213_v19 = vadd.f32 %v7111_v24, %v2143_v34  ;;  %v7408_v2 = vld [vmem:[%s9197_s3 + $0x8] sm:$0xff]  ;;  %v9447_v60 = vld [vmem:[#allocation26_spill] sm:$0xff]  ;;  %v9461_v46 = vld [vmem:[#allocation16_spill] sm:$0xff] }
 0x3b1   :  { %2426 = vmatpush.msra.mxu3 %v2260_v28  ;;  %v1247_v43 = vadd.f32 %v9448_v58, %v9447_v60  ;;  %v1692_v28 = vadd.f32 %v7264_v20, %v1249_v50  ;;  %v2137_v40 = vadd.f32 %v7276_v62, %v1694_v63  ;;  %v9462_v44 = vld [vmem:[#allocation61_spill] sm:$0xff]  ;;  %v9468_v50 = vld [vmem:[#allocation50_spill] sm:$0xff] }
 0x3b2   :  { %v2139_v49 = vadd.f32 %v7288_v22, %v1696_v55  ;;  %v2211_v56 = vadd.f32 %v7111_v24, %v2141_v53  ;;  %v2279_v22 = vmax.f32 %v2215_v42, 0.0  ;;  %v2277_v62 = vmax.f32 %v2213_v19, 0.0  ;;  %v9463_v34 = vld [vmem:[#allocation5_spill] sm:$0xff]  ;;  %v9465_v53 = vld [vmem:[#allocation14_spill] sm:$0xff]  ;;  %v9466_v42 = vld [vmem:[#allocation59_spill] sm:$0xff] }
 0x3b3   :  { %2427 = vmatpush.msra.mxu3 %v2258_v23  ;;  %v1690_v54 = vadd.f32 %v7248_v6, %v1247_v43  ;;  %v2135_v57 = vadd.f32 %v7266_v25, %v1692_v28  ;;  %v1243_v23 = vadd.f32 %v9452_v8, %v9451_v36  ;;  %v2207_v52 = vadd.f32 %v7111_v24, %v2137_v40  ;;  %v9454_v6 = vld [vmem:[#allocation65_spill] sm:$0xff]  ;;  %v9471_v43 = vld [vmem:[#allocation6_spill] sm:$0xff]  ;;  %v9476_v36 = vld [vmem:[#allocation51_spill] sm:$0xff] }
 0x3b4   :  { %v2209_v20 = vadd.f32 %v7111_v24, %v2139_v49  ;;  %v2275_v7 = vmax.f32 %v2211_v56, 0.0  ;;  %v1241_v16 = vadd.f32 %v9454_v6, %v9453_v12  ;;  %v1237_v33 = vadd.f32 %v9462_v44, %v9461_v46  ;;  %v9470_v60 = vld [vmem:[#allocation57_spill] sm:$0xff]  ;;  %v9472_v40 = vld [vmem:[#allocation106_spill] sm:$0xff] }
 0x3b5   :  { %2428 = vmatpush.msra.mxu3 %v2256_v1  ;;  %v2133_v17 = vadd.f32 %v7256_v15, %v1690_v54  ;;  %v1686_v25 = vadd.f32 %v7224_v13, %v1243_v23  ;;  %v2205_v1 = vadd.f32 %v7111_v24, %v2135_v57  ;;  %v9456_v15 = vld [vmem:[#allocation18_spill] sm:$0xff]  ;;  %v2271_v31 = vmax.f32 %v2207_v52, 0.0  ;;  %v9474_v54 = vld [vmem:[#allocation55_spill] sm:$0xff]  ;;  %v9478_v52 = vld [vmem:[#allocation8_spill] sm:$0xff] }
 0x3b6   :  { %2495 = vmatmul.f32.gmra.mxu2 %v7184_v48  ;;  %v1688_v48 = vadd.f32 %v7238_v51, %v1245_v32  ;;  %v2273_v9 = vmax.f32 %v2209_v20, 0.0  ;;  %v7437_v51 = vld [vmem:[%s9197_s3 + $0x18] sm:$0xff]  ;;  %v1239_v61 = vadd.f32 %v9457_v21, %v9456_v15  ;;  %v1684_v59 = vadd.f32 %v9458_v0, %v1241_v16  ;;  %v9473_v32 = vld [vmem:[#allocation10_spill] sm:$0xff]  ;;  %v9475_v20 = vld [vmem:[#allocation112_spill] sm:$0xff] }
 0x3b7   :  { %2429 = vmatpush.msra.mxu3 %v2254_v45  ;;  %v2129_v45 = vadd.f32 %v9459_v39, %v1686_v25  ;;  %v2203_v13 = vadd.f32 %v7111_v24, %v2133_v17  ;;  %v2269_v55 = vmax.f32 %v2205_v1, 0.0  ;;  %v1680_v11 = vadd.f32 %v9467_v5, %v1237_v33  ;;  %v9477_v17 = vld [vmem:[#allocation49_spill] sm:$0xff]  ;;  %v9480_v6 = vld [vmem:[#allocation110_spill] sm:$0xff]  ;;  %v9483_v21 = vld [vmem:[#allocation111_spill] sm:$0xff] }
 0x3b8   :  { %v2131_v37 = vadd.f32 %v9455_v14, %v1688_v48  ;;  %v2127_v35 = vadd.f32 %v9464_v27, %v1684_v59  ;;  %v1231_v57 = vadd.f32 %v9474_v54, %v9473_v32  ;;  %v9481_v25 = vld [vmem:[#allocation113_spill] sm:$0xff]  ;;  %v9485_v33 = vld [vmem:[#allocation103_spill] sm:$0xff] }
 0x3b9   :  { %2430 = vmatpush.msra.mxu3 %v2252_v10  ;;  %v1682_v10 = vadd.f32 %v9463_v34, %v1239_v61  ;;  %v2199_v49 = vadd.f32 %v7111_v24, %v2129_v45  ;;  %v2267_v19 = vmax.f32 %v2203_v13, 0.0  ;;  %v2123_v56 = vadd.f32 %v9472_v40, %v1680_v11  ;;  %v9484_v39 = vld [vmem:[#allocation109_spill] sm:$0xff]  ;;  %v9489_v11 = vld [vmem:[#allocation2_spill] sm:$0xff]  ;;  %v7555_v40 = vld [vmem:[%s9197_s3 + $0xa8] sm:$0xff] }
 0x3ba   :  { %v2201_v26 = vadd.f32 %v7111_v24, %v2131_v37  ;;  %v1674_v16 = vadd.f32 %v9480_v6, %v1231_v57  ;;  %v7522_v5 = vld [vmem:[%s9197_s3 + $0x78] sm:$0xff]  ;;  %v2603_v32 = vld [vmem:[%s9198_s4 + $0x48] sm:$0xff]  ;;  %v2602_v57 = vld [vmem:[%s9198_s4 + $0x40] sm:$0xff] }
 0x3bb   :  { %2431 = vmatpush.msra.mxu3 %v2250_v41  ;;  %v1235_v41 = vadd.f32 %v9466_v42, %v9465_v53  ;;  %v2125_v63 = vadd.f32 %v9468_v50, %v1682_v10  ;;  %v2263_v48 = vmax.f32 %v2199_v49, 0.0  ;;  %v2193_v37 = vadd.f32 %v7111_v24, %v2123_v56  ;;  %v9487_v53 = vld [vmem:[#allocation94_spill] sm:$0xff]  ;;  %v7514_v42 = vld [vmem:[%s9197_s3 + $0x68] sm:$0xff] }
 0x3bc   :  { %v2265_v30 = vmax.f32 %v2201_v26, 0.0  ;;  %v2117_v61 = vadd.f32 %v9483_v21, %v1674_v16  ;;  %v7498_v26 = vld [vmem:[%s9197_s3 + $0x48] sm:$0xff]  ;;  %v2606_v56 = vld [vmem:[%s9198_s4 + $0x60] sm:$0xff] }
 0x3bd   :  { %2432 = vmatpush.msra.mxu3 %v2248_v38  ;;  %v9469_v38 = vld [vmem:[#allocation12_spill] sm:$0xff]  ;;  %v1678_v28 = vadd.f32 %v9471_v43, %v1235_v41  ;;  %v2195_v23 = vadd.f32 %v7111_v24, %v2125_v63  ;;  %v7530_v50 = vld [vmem:[%s9197_s3 + $0x88] sm:$0xff] }
 0x3be   :  { %5029 = vmatmul.msk.f32.vlgmr.msra.gmra.mxu3 %vm2308_vm2, %v7408_v2  ;;  %2498 = vmatmul.f32.gmra.mxu2 %v9460_v47  ;;  %v1233_v58 = vadd.f32 %v9470_v60, %v9469_v38  ;;  %v7488_v47 = vld [vmem:[%s9197_s3 + $0x38] sm:$0xff]  ;;  %v2187_v46 = vadd.f32 %v7111_v24, %v2117_v61  ;;  %v9488_v41 = vld [vmem:[#allocation100_spill] sm:$0xff]  ;;  %v9490_v63 = vld [vmem:[#allocation47_spill] sm:$0xff] }
 0x3bf   :  { %5043 = vmatpush.msk.msrb.mxu3 %vm2351_vm1, %v2279_v22  ;;  %v2197_v22 = vadd.f32 %v7111_v24, %v2127_v35  ;;  %v2121_v8 = vadd.f32 %v9476_v36, %v1678_v28  ;;  %v2259_v59 = vmax.f32 %v2195_v23, 0.0  ;;  %v9491_v38 = vld [vmem:[#allocation92_spill] sm:$0xff]  ;;  %v2609_v60 = vld [vmem:[%s9198_s4 + $0x78] sm:$0xff]  ;;  %v2607_v28 = vld [vmem:[%s9198_s4 + $0x68] sm:$0xff] }
 0x3c0   :  { %v2251_v27 = vmax.f32 %v2187_v46, 0.0  ;;  %2658 = vmatpush.msra.mxu2 %v2609_v60  ;;  %v2599_v36 = vld [vmem:[%s9198_s4 + $0x28] sm:$0xff] }
 0x3c1   :  { %2536 = vmatpush.msrb.mxu3 %v2277_v62  ;;  %v1676_v62 = vadd.f32 %v9475_v20, %v1233_v58  ;;  %v2261_v1 = vmax.f32 %v2197_v22, 0.0  ;;  %v2191_v0 = vadd.f32 %v7111_v24, %v2121_v8  ;;  %v2375_v49 = vpop.f32.mrf.mxu2  ;;  %v2608_v58 = vld [vmem:[%s9198_s4 + $0x70] sm:$0xff]  ;;  %v2605_v22 = vld [vmem:[%s9198_s4 + $0x58] sm:$0xff]  ;;  %v2598_v8 = vld [vmem:[%s9198_s4 + $0x20] sm:$0xff] }
 0x3c2   :  { %2659 = vmatpush.msra.mxu2 %v2608_v58  ;;  %v2601_v20 = vld [vmem:[%s9198_s4 + $0x38] sm:$0xff] }
 0x3c3   :  { %2537 = vmatpush.msrb.mxu3 %v2275_v7  ;;  %v9479_v7 = vld [vmem:[#allocation53_spill] sm:$0xff]  ;;  %v2119_v14 = vadd.f32 %v9481_v25, %v1676_v62  ;;  %v2255_v44 = vmax.f32 %v2191_v0, 0.0  ;;  %v2600_v62 = vld [vmem:[%s9198_s4 + $0x30] sm:$0xff] }
 0x3c4   :  { %v1229_v12 = vadd.f32 %v9479_v7, %v9478_v52  ;;  %2660 = vmatpush.msra.mxu2 %v2607_v28  ;;  %v2595_v52 = vld [vmem:[%s9198_s4 + $0x8] sm:$0xff]  ;;  %v2594_v7 = vld [vmem:[%s9198_s4] sm:$0xff] }
 0x3c5   :  { %2538 = vmatpush.msrb.mxu3 %v2273_v9  ;;  %v9482_v9 = vld [vmem:[#allocation108_spill] sm:$0xff]  ;;  %v2189_v13 = vadd.f32 %v7111_v24, %v2119_v14 }
 0x3c6   :  { %5030 = vmatmul.msk.f32.gmra.mxu3 %vm2308_vm2, %v7437_v51  ;;  %2501 = vmatmul.f32.gmra.mxu2 %v9477_v17  ;;  %v1672_v15 = vadd.f32 %v9482_v9, %v1229_v12  ;;  %v2596_v17 = vld [vmem:[%s9198_s4 + $0x10] sm:$0xff] }
 0x3c7   :  { %2539 = vmatpush.msrb.mxu3 %v2271_v31  ;;  %v2257_v31 = vmax.f32 %v2193_v37, 0.0  ;;  %v2253_v10 = vmax.f32 %v2189_v13, 0.0  ;;  %2661 = vmatpush.msra.mxu2 %v2606_v56 }
 0x3c8   :  { %v2115_v45 = vadd.f32 %v9484_v39, %v1672_v15 }
 0x3c9   :  { %2540 = vmatpush.msrb.mxu3 %v2269_v55  ;;  %v9486_v55 = vld [vmem:[#allocation48_spill] sm:$0xff]  ;;  %v2378_v43 = vpop.f32.mrf.mxu2  ;;  %2662 = vmatpush.msra.mxu2 %v2605_v22 }
 0x3ca   :  { %v2185_v34 = vadd.f32 %v7111_v24, %v2115_v45  ;;  %v7506_v24 = vld [vmem:[%s9197_s3 + $0x58] sm:$0xff] }
 0x3cb   :  { %2541 = vmatpush.msrb.mxu3 %v2267_v19  ;;  %v7538_v19 = vld [vmem:[%s9197_s3 + $0x98] sm:$0xff] }
 0x3cc   :  { %v2249_v35 = vmax.f32 %v2185_v34, 0.0 }
 0x3cd   :  { %2542 = vmatpush.msrb.mxu3 %v2265_v30  ;;  %v2604_v30 = vld [vmem:[%s9198_s4 + $0x50] sm:$0xff] }
 0x3ce   :  { %5031 = vmatmul.msk.f32.gmra.mxu3 %vm2308_vm2, %v7465_v18  ;;  %2504 = vmatmul.f32.gmra.mxu2 %v9485_v33 }
 0x3cf   :  { %2543 = vmatpush.msrb.mxu3 %v2263_v48  ;;  %2663 = vmatpush.msra.mxu2 %v2604_v30  ;;  %v2597_v48 = vld [vmem:[%s9198_s4 + $0x18] sm:$0xff] }
 0x3d1   :  { %2544 = vmatpush.msrb.mxu3 %v2261_v1  ;;  %2664 = vmatpush.msra.mxu2 %v2603_v32  ;;  %v2381_v54 = vpop.f32.mrf.mxu2 }
 0x3d3   :  { %2545 = vmatpush.msrb.mxu3 %v2259_v59  ;;  %2665 = vmatpush.msra.mxu2 %v2602_v57 }
 0x3d5   :  { %2546 = vmatpush.msrb.mxu3 %v2257_v31  ;;  %2666 = vmatpush.msra.mxu2 %v2601_v20 }
 0x3d6   :  { %5032 = vmatmul.msk.f32.gmra.mxu3 %vm2308_vm2, %v7488_v47  ;;  %2507 = vmatmul.f32.gmra.mxu2 %v9486_v55 }
 0x3d7   :  { %2547 = vmatpush.msrb.mxu3 %v2255_v44  ;;  %2667 = vmatpush.msra.mxu2 %v2600_v62 }
 0x3d9   :  { %2548 = vmatpush.msrb.mxu3 %v2253_v10  ;;  %2668 = vmatpush.msra.mxu2 %v2599_v36  ;;  %v2384_v23 = vpop.f32.mrf.mxu2 }
 0x3db   :  { %2549 = vmatpush.msrb.mxu3 %v2251_v27  ;;  %2669 = vmatpush.msra.mxu2 %v2598_v8 }
 0x3dd   :  { %2550 = vmatpush.msrb.mxu3 %v2249_v35  ;;  %2670 = vmatpush.msra.mxu2 %v2597_v48 }
 0x3de   :  { %5033 = vmatmul.msk.f32.gmra.mxu3 %vm2308_vm2, %v7498_v26  ;;  %2510 = vmatmul.f32.gmra.mxu2 %v9487_v53  ;;  %v2613_v53 = vld [vmem:[%s9198_s4 + $0x98] sm:$0xff] }
 0x3df   :  { %2671 = vmatpush.msra.mxu2 %v2596_v17 }
 0x3e1   :  { %2672 = vmatpush.msra.mxu2 %v2595_v52  ;;  %v2387_v12 = vpop.f32.mrf.mxu2 }
 0x3e3   :  { %2673 = vmatpush.msra.mxu2 %v2594_v7 }
 0x3e6   :  { %5034 = vmatmul.msk.f32.gmra.mxu3 %vm2308_vm2, %v7506_v24  ;;  %2513 = vmatmul.f32.gmra.mxu2 %v9488_v41 }
 0x3e9   :  { %v2390_v6 = vpop.f32.mrf.mxu2 }
 0x3ee   :  { %5035 = vmatmul.msk.f32.gmra.mxu3 %vm2308_vm2, %v7514_v42  ;;  %2516 = vmatmul.f32.gmra.mxu2 %v9489_v11  ;;  %v2611_v11 = vld [vmem:[%s9198_s4 + $0x88] sm:$0xff] }
 0x3f1   :  { %v2393_v16 = vpop.f32.mrf.mxu2 }
 0x3f6   :  { %5036 = vmatmul.msk.f32.gmra.mxu3 %vm2308_vm2, %v7522_v5  ;;  %2519 = vmatmul.f32.gmra.mxu2 %v9490_v63  ;;  %v2610_v63 = vld [vmem:[%s9198_s4 + $0x80] sm:$0xff] }
 0x3f9   :  { %v2396_v37 = vpop.f32.mrf.mxu2 }
 0x3fe   :  { %5037 = vmatmul.msk.f32.gmra.mxu3 %vm2308_vm2, %v7530_v50  ;;  %2522 = vmatmul.f32.gmra.mxu2 %v9491_v38 }
 0x406   :  { %5038 = vmatmul.msk.f32.gmra.mxu3 %vm2308_vm2, %v7538_v19  ;;  %2525 = vmatmul.f32.gmra.mxu2 %v7315_v4  ;;  %v7575_v4 = vld [vmem:[%s9197_s3 + $0xb8] sm:$0xff] }
 0x40e   :  { %5039 = vmatmul.msk.f32.gmra.mxu3 %vm2308_vm2, %v7555_v40  ;;  %2528 = vmatmul.f32.gmra.mxu2 %v7341_v29  ;;  %v7595_v29 = vld [vmem:[%s9197_s3 + $0xc8] sm:$0xff] }
 0x416   :  { %5040 = vmatmul.msk.f32.gmra.mxu3 %vm2308_vm2, %v7575_v4  ;;  %2531 = vmatmul.f32.gmra.mxu2 %v7367_v3  ;;  %v7615_v3 = vld [vmem:[%s9197_s3 + $0xd8] sm:$0xff] }
 0x41e   :  { %5041 = vmatmul.msk.f32.gmra.mxu3 %vm2308_vm2, %v7595_v29 }
 0x426   :  { %5042 = vmatmul.msk.f32.gmra.mxu3 %vm2308_vm2, %v7615_v3 }
 0x42e   :  { %5044 = vmatmul.msk.f32.vlgmr.msrb.gmra.mxu3 %vm2308_vm2, %v7408_v2 }
 0x436   :  { %5045 = vmatmul.msk.f32.gmra.mxu3 %vm2308_vm2, %v7437_v51  ;;  %v2399_v51 = vpop.f32.mrf.mxu2 }
 0x43e   :  { %5046 = vmatmul.msk.f32.gmra.mxu3 %vm2308_vm2, %v7465_v18  ;;  %v2402_v61 = vpop.f32.mrf.mxu2 }
 0x441   :  { %v2434_v25 = vpop.f32.mrf.mxu3 }
 0x442   :  { %v2435_v14 = vadd.f32 %v2434_v25, %v2375_v49 }
 0x444   :  { %2674 = vmatmul.f32.vlgmr.msra.gmra.mxu2 %v2435_v14 }
 0x446   :  { %5047 = vmatmul.msk.f32.gmra.mxu3 %vm2308_vm2, %v7488_v47  ;;  %v2405_v39 = vpop.f32.mrf.mxu2 }
 0x449   :  { %v2437_v1 = vpop.f32.mrf.mxu3 }
 0x44a   :  { %v2438_v9 = vadd.f32 %v2437_v1, %v2378_v43 }
 0x44c   :  { %2677 = vmatmul.f32.gmra.mxu2 %v2438_v9 }
 0x44e   :  { %5048 = vmatmul.msk.f32.gmra.mxu3 %vm2308_vm2, %v7498_v26  ;;  %v2408_v31 = vpop.f32.mrf.mxu2 }
 0x451   :  { %v2440_v2 = vpop.f32.mrf.mxu3 }
 0x452   :  { %v2441_v15 = vadd.f32 %v2440_v2, %v2381_v54 }
 0x454   :  { %2680 = vmatmul.f32.gmra.mxu2 %v2441_v15 }
 0x456   :  { %5049 = vmatmul.msk.f32.gmra.mxu3 %vm2308_vm2, %v7506_v24  ;;  %v2411_v34 = vpop.f32.mrf.mxu2  ;;  %v2614_v24 = vld [vmem:[%s9198_s4 + $0xa0] sm:$0xff] }
 0x457   :  { %2728 = vmatpush.msra.mxu3 %v2614_v24  ;;  %v2787_v24 = vld [vmem:[%s9199_s5 + $0x58] sm:$0xff] }
 0x459   :  { %v2443_v18 = vpop.f32.mrf.mxu3  ;;  %2729 = vmatpush.msra.mxu3 %v2613_v53  ;;  %v5086_v53 = vld [vmem:[%s9199_s5 + $0x120] sm:$0xff] }
 0x45a   :  { %v2444_v21 = vadd.f32 %v2443_v18, %v2384_v23  ;;  %v2797_v18 = vld [vmem:[%s9199_s5 + $0xa8] sm:$0xf] }
 0x45c   :  { %2683 = vmatmul.f32.gmra.mxu2 %v2444_v21  ;;  %v5093_v21 = vld [vmem:[%s9199_s5 + $0x158] sm:$0xf] }
 0x45d   :  { %5109 = vmatpush.msk.msrb.mxu1 %vm2351_vm1, %v5093_v21 }
 0x45e   :  { %5050 = vmatmul.msk.f32.gmra.mxu3 %vm2308_vm2, %v7514_v42  ;;  %v2414_v35 = vpop.f32.mrf.mxu2  ;;  %v2612_v42 = vld [vmem:[%s9198_s4 + $0x90] sm:$0xff] }
 0x45f   :  { %2730 = vmatpush.msra.mxu3 %v2612_v42  ;;  %v5087_v42 = vld [vmem:[%s9199_s5 + $0x128] sm:$0xff] }
 0x461   :  { %v2446_v0 = vpop.f32.mrf.mxu3  ;;  %2731 = vmatpush.msra.mxu3 %v2611_v11  ;;  %v2782_v11 = vld [vmem:[%s9199_s5 + $0x30] sm:$0xff] }
 0x462   :  { %v2447_v59 = vadd.f32 %v2446_v0, %v2387_v12  ;;  %v2795_v0 = vld [vmem:[%s9199_s5 + $0x98] sm:$0xff] }
 0x463   :  { %2732 = vmatpush.msra.mxu3 %v2610_v63 }
 0x464   :  { %2686 = vmatmul.f32.gmra.mxu2 %v2447_v59  ;;  %v2792_v59 = vld [vmem:[%s9199_s5 + $0x80] sm:$0xff] }
 0x465   :  { %5139 = vmatpush.msk.msrb.mxu3 %vm2351_vm1, %v2797_v18 }
 0x466   :  { %5051 = vmatmul.msk.f32.gmra.mxu3 %vm2308_vm2, %v7522_v5  ;;  %v2493_v41 = vpop.f32.mrf.mxu2 }
 0x467   :  { %3115 = vmatpush.msrb.mxu3 %v2795_v0 }
 0x469   :  { %v2449_v45 = vpop.f32.mrf.mxu3 }
 0x46a   :  { %v2450_v13 = vadd.f32 %v2449_v45, %v2390_v6 }
 0x46c   :  { %2689 = vmatmul.f32.gmra.mxu2 %v2450_v13  ;;  %v5092_v13 = vld [vmem:[%s9199_s5 + $0x150] sm:$0xf] }
 0x46d   :  { %5094 = vmatpush.msk.msrb.mxu0 %vm2351_vm1, %v5092_v13 }
 0x46e   :  { %5052 = vmatmul.msk.f32.gmra.mxu3 %vm2308_vm2, %v7530_v50  ;;  %v2496_v49 = vpop.f32.mrf.mxu2 }
 0x471   :  { %v2452_v47 = vpop.f32.mrf.mxu3 }
 0x472   :  { %v2453_v46 = vadd.f32 %v2452_v47, %v2393_v16  ;;  %v2791_v47 = vld [vmem:[%s9199_s5 + $0x78] sm:$0xff] }
 0x474   :  { %2692 = vmatmul.f32.gmra.mxu2 %v2453_v46 }
 0x476   :  { %5053 = vmatmul.msk.f32.gmra.mxu3 %vm2308_vm2, %v7538_v19  ;;  %v2499_v43 = vpop.f32.mrf.mxu2 }
 0x479   :  { %v2455_v44 = vpop.f32.mrf.mxu3 }
 0x47a   :  { %v2456_v33 = vadd.f32 %v2455_v44, %v2396_v37  ;;  %v5090_v44 = vld [vmem:[%s9199_s5 + $0x140] sm:$0xff] }
 0x47b   :  { %2904 = vmatpush.msrb.mxu0 %v5090_v44 }
 0x47c   :  { %2695 = vmatmul.f32.gmra.mxu2 %v2456_v33  ;;  %v5091_v33 = vld [vmem:[%s9199_s5 + $0x148] sm:$0xff] }
 0x47d   :  { %2963 = vmatpush.msrb.mxu1 %v5091_v33 }
 0x47e   :  { %5054 = vmatmul.msk.f32.gmra.mxu3 %vm2308_vm2, %v7555_v40  ;;  %v2502_v56 = vpop.f32.mrf.mxu2 }
 0x481   :  { %v2458_v10 = vpop.f32.mrf.mxu3 }
 0x482   :  { %v2459_v27 = vadd.f32 %v2458_v10, %v2399_v51  ;;  %v2796_v51 = vld [vmem:[%s9199_s5 + $0xa0] sm:$0xf] }
 0x483   :  { %5124 = vmatpush.msk.msrb.mxu2 %vm2351_vm1, %v2796_v51  ;;  %v2788_v10 = vld [vmem:[%s9199_s5 + $0x60] sm:$0xff] }
 0x484   :  { %2698 = vmatmul.f32.gmra.mxu2 %v2459_v27  ;;  %v2789_v27 = vld [vmem:[%s9199_s5 + $0x68] sm:$0xff] }
 0x486   :  { %5055 = vmatmul.msk.f32.gmra.mxu3 %vm2308_vm2, %v7575_v4  ;;  %v2505_v4 = vpop.f32.mrf.mxu2 }
 0x489   :  { %v2461_v26 = vpop.f32.mrf.mxu3 }
 0x48a   :  { %v2462_v55 = vadd.f32 %v2461_v26, %v2402_v61  ;;  %v2794_v61 = vld [vmem:[%s9199_s5 + $0x90] sm:$0xff]  ;;  %v5089_v26 = vld [vmem:[%s9199_s5 + $0x138] sm:$0xff] }
 0x48b   :  { %3056 = vmatpush.msrb.mxu2 %v2794_v61  ;;  %2964 = vmatpush.msrb.mxu1 %v5089_v26 }
 0x48c   :  { %2701 = vmatmul.f32.gmra.mxu2 %v2462_v55  ;;  %v2786_v55 = vld [vmem:[%s9199_s5 + $0x50] sm:$0xff] }
 0x48d   :  { %3057 = vmatpush.msrb.mxu2 %v2792_v59  ;;  %2965 = vmatpush.msrb.mxu1 %v5087_v42 }
 0x48e   :  { %5056 = vmatmul.msk.f32.gmra.mxu3 %vm2308_vm2, %v7595_v29  ;;  %v2508_v62 = vpop.f32.mrf.mxu2 }
 0x491   :  { %v2464_v5 = vpop.f32.mrf.mxu3 }
 0x492   :  { %v2465_v50 = vadd.f32 %v2464_v5, %v2405_v39  ;;  %v2793_v39 = vld [vmem:[%s9199_s5 + $0x88] sm:$0xff] }
 0x493   :  { %3116 = vmatpush.msrb.mxu3 %v2793_v39  ;;  %v2785_v5 = vld [vmem:[%s9199_s5 + $0x48] sm:$0xff] }
 0x494   :  { %2704 = vmatmul.f32.gmra.mxu2 %v2465_v50  ;;  %v2783_v50 = vld [vmem:[%s9199_s5 + $0x38] sm:$0xff] }
 0x495   :  { %3117 = vmatpush.msrb.mxu3 %v2791_v47 }
 0x496   :  { %5057 = vmatmul.msk.f32.gmra.mxu3 %vm2308_vm2, %v7615_v3  ;;  %v2511_v8 = vpop.f32.mrf.mxu2 }
 0x497   :  { %3118 = vmatpush.msrb.mxu3 %v2789_v27 }
 0x499   :  { %v2467_v19 = vpop.f32.mrf.mxu3  ;;  %3119 = vmatpush.msrb.mxu3 %v2787_v24 }
 0x49a   :  { %v2468_v38 = vadd.f32 %v2467_v19, %v2408_v31  ;;  %v2790_v31 = vld [vmem:[%s9199_s5 + $0x70] sm:$0xff] }
 0x49b   :  { %3058 = vmatpush.msrb.mxu2 %v2790_v31  ;;  %3120 = vmatpush.msrb.mxu3 %v2785_v5 }
 0x49c   :  { %2707 = vmatmul.f32.gmra.mxu2 %v2468_v38  ;;  %v2780_v38 = vld [vmem:[%s9199_s5 + $0x20] sm:$0xff] }
 0x49d   :  { %3059 = vmatpush.msrb.mxu2 %v2788_v10  ;;  %3121 = vmatpush.msrb.mxu3 %v2783_v50 }
 0x49e   :  { %v2514_v17 = vpop.f32.mrf.mxu2 }
 0x49f   :  { %3060 = vmatpush.msrb.mxu2 %v2786_v55 }
 0x4a1   :  { %v2470_v60 = vpop.f32.mrf.mxu3 }
 0x4a2   :  { %v2471_v58 = vadd.f32 %v2470_v60, %v2411_v34  ;;  %v2781_v60 = vld [vmem:[%s9199_s5 + $0x28] sm:$0xff] }
 0x4a3   :  { %3122 = vmatpush.msrb.mxu3 %v2781_v60 }
 0x4a4   :  { %2710 = vmatmul.f32.gmra.mxu2 %v2471_v58 }
 0x4a6   :  { %v2517_v12 = vpop.f32.mrf.mxu2 }
 0x4a9   :  { %v2473_v28 = vpop.f32.mrf.mxu3 }
 0x4aa   :  { %v2474_v40 = vadd.f32 %v2473_v28, %v2414_v35  ;;  %v5088_v35 = vld [vmem:[%s9199_s5 + $0x130] sm:$0xff] }
 0x4ab   :  { %2905 = vmatpush.msrb.mxu0 %v5088_v35 }
 0x4ac   :  { %2713 = vmatmul.f32.gmra.mxu2 %v2474_v40  ;;  %v2778_v40 = vld [vmem:[%s9199_s5 + $0x10] sm:$0xff] }
 0x4ad   :  { %2906 = vmatpush.msrb.mxu0 %v5086_v53 }
 0x4ae   :  { %v2520_v14 = vpop.f32.mrf.mxu2 }
 0x4b1   :  { %v2552_v22 = vpop.f32.mrf.mxu3 }
 0x4b2   :  { %v2553_v30 = vadd.f32 %v2552_v22, %v2493_v41  ;;  %v2784_v41 = vld [vmem:[%s9199_s5 + $0x40] sm:$0xff]  ;;  %v5084_v22 = vld [vmem:[%s9199_s5 + $0x110] sm:$0xff] }
 0x4b3   :  { %3061 = vmatpush.msrb.mxu2 %v2784_v41  ;;  %2907 = vmatpush.msrb.mxu0 %v5084_v22 }
 0x4b4   :  { %5058 = vmatmul.msk.f32.vlgmr.msra.gmra.mxu3 %vm2615_vm3, %v2553_v30  ;;  %v5085_v30 = vld [vmem:[%s9199_s5 + $0x118] sm:$0xff] }
 0x4b5   :  { %3062 = vmatpush.msrb.mxu2 %v2782_v11  ;;  %2966 = vmatpush.msrb.mxu1 %v5085_v30 }
 0x4b6   :  { %v2523_v9 = vpop.f32.mrf.mxu2 }
 0x4b7   :  { %3063 = vmatpush.msrb.mxu2 %v2780_v38 }
 0x4b9   :  { %v2555_v32 = vpop.f32.mrf.mxu3  ;;  %3064 = vmatpush.msrb.mxu2 %v2778_v40 }
 0x4ba   :  { %v2556_v54 = vadd.f32 %v2555_v32, %v2496_v49  ;;  %v2776_v32 = vld [vmem:[%s9199_s5] sm:$0xff] }
 0x4bb   :  { %3065 = vmatpush.msrb.mxu2 %v2776_v32 }
 0x4bc   :  { %5059 = vmatmul.msk.f32.gmra.mxu3 %vm2615_vm3, %v2556_v54  ;;  %v2777_v54 = vld [vmem:[%s9199_s5 + $0x8] sm:$0xff] }
 0x4be   :  { %v2526_v45 = vpop.f32.mrf.mxu2 }
 0x4c1   :  { %v2558_v57 = vpop.f32.mrf.mxu3 }
 0x4c2   :  { %v2559_v20 = vadd.f32 %v2558_v57, %v2499_v43  ;;  %v5082_v57 = vld [vmem:[%s9199_s5 + $0x100] sm:$0xff] }
 0x4c3   :  { %2908 = vmatpush.msrb.mxu0 %v5082_v57 }
 0x4c4   :  { %5060 = vmatmul.msk.f32.gmra.mxu3 %vm2615_vm3, %v2559_v20  ;;  %v5083_v20 = vld [vmem:[%s9199_s5 + $0x108] sm:$0xff] }
 0x4c5   :  { %2967 = vmatpush.msrb.mxu1 %v5083_v20 }
 0x4c6   :  { %v2529_v49 = vpop.f32.mrf.mxu2 }
 0x4c9   :  { %v2561_v36 = vpop.f32.mrf.mxu3 }
 0x4ca   :  { %v2562_v29 = vadd.f32 %v2561_v36, %v2502_v56  ;;  %v2779_v56 = vld [vmem:[%s9199_s5 + $0x18] sm:$0xff]  ;;  %v5080_v36 = vld [vmem:[%s9199_s5 + $0xf0] sm:$0xff] }
 0x4cb   :  { %3123 = vmatpush.msrb.mxu3 %v2779_v56  ;;  %2909 = vmatpush.msrb.mxu0 %v5080_v36 }
 0x4cc   :  { %5061 = vmatmul.msk.f32.gmra.mxu3 %vm2615_vm3, %v2562_v29  ;;  %v5081_v29 = vld [vmem:[%s9199_s5 + $0xf8] sm:$0xff] }
 0x4cd   :  { %3124 = vmatpush.msrb.mxu3 %v2777_v54  ;;  %2968 = vmatpush.msrb.mxu1 %v5081_v29 }
 0x4ce   :  { %v2532_v28 = vpop.f32.mrf.mxu2 }
 0x4d1   :  { %v2564_v23 = vpop.f32.mrf.mxu3 }
 0x4d2   :  { %v2565_v48 = vadd.f32 %v2564_v23, %v2505_v4  ;;  %v5079_v23 = vld [vmem:[%s9199_s5 + $0xe8] sm:$0xff] }
 0x4d3   :  { %2969 = vmatpush.msrb.mxu1 %v5079_v23 }
 0x4d4   :  { %5062 = vmatmul.msk.f32.gmra.mxu3 %vm2615_vm3, %v2565_v48 }
 0x4d6   :  { %v2675_v48 = vpop.f32.mrf.mxu2 }
 0x4d9   :  { %v2567_v52 = vpop.f32.mrf.mxu3 }
 0x4da   :  { %v2568_v3 = vadd.f32 %v2567_v52, %v2508_v62  ;;  %v5077_v52 = vld [vmem:[%s9199_s5 + $0xd8] sm:$0xff] }
 0x4db   :  { %2970 = vmatpush.msrb.mxu1 %v5077_v52 }
 0x4dc   :  { %5063 = vmatmul.msk.f32.gmra.mxu3 %vm2615_vm3, %v2568_v3  ;;  %v5074_v3 = vld [vmem:[%s9199_s5 + $0xc0] sm:$0xff] }
 0x4e1   :  { %v2570_v7 = vpop.f32.mrf.mxu3 }
 0x4e2   :  { %v2571_v6 = vadd.f32 %v2570_v7, %v2511_v8  ;;  %v5078_v8 = vld [vmem:[%s9199_s5 + $0xe0] sm:$0xff]  ;;  %v5075_v7 = vld [vmem:[%s9199_s5 + $0xc8] sm:$0xff] }
 0x4e3   :  { %2910 = vmatpush.msrb.mxu0 %v5078_v8  ;;  %2971 = vmatpush.msrb.mxu1 %v5075_v7 }
 0x4e4   :  { %5064 = vmatmul.msk.f32.gmra.mxu3 %vm2615_vm3, %v2571_v6  ;;  %v5073_v6 = vld [vmem:[%s9199_s5 + $0xb8] sm:$0xff] }
 0x4e5   :  { %2972 = vmatpush.msrb.mxu1 %v5073_v6 }
 0x4e9   :  { %v2573_v16 = vpop.f32.mrf.mxu3 }
 0x4ea   :  { %v2574_v25 = vadd.f32 %v2573_v16, %v2514_v17  ;;  %v5076_v17 = vld [vmem:[%s9199_s5 + $0xd0] sm:$0xff]  ;;  %v2678_v16 = vpop.f32.mrf.mxu2 }
 0x4eb   :  { %2911 = vmatpush.msrb.mxu0 %v5076_v17 }
 0x4ec   :  { %5065 = vmatmul.msk.f32.gmra.mxu3 %vm2615_vm3, %v2574_v25 }
 0x4ed   :  { %2912 = vmatpush.msrb.mxu0 %v5074_v3 }
 0x4f1   :  { %v2576_v37 = vpop.f32.mrf.mxu3 }
 0x4f2   :  { %v2577_v1 = vadd.f32 %v2576_v37, %v2517_v12  ;;  %v5072_v12 = vld [vmem:[%s9199_s5 + $0xb0] sm:$0xff]  ;;  %v2681_v25 = vpop.f32.mrf.mxu2 }
 0x4f3   :  { %2913 = vmatpush.msrb.mxu0 %v5072_v12 }
 0x4f4   :  { %5066 = vmatmul.msk.f32.gmra.mxu3 %vm2615_vm3, %v2577_v1 }
 0x4f9   :  { %v2579_v2 = vpop.f32.mrf.mxu3 }
 0x4fa   :  { %v2580_v15 = vadd.f32 %v2579_v2, %v2520_v14  ;;  %v2684_v1 = vpop.f32.mrf.mxu2 }
 0x4fc   :  { %5067 = vmatmul.msk.f32.gmra.mxu3 %vm2615_vm3, %v2580_v15 }
 0x501   :  { %v2582_v46 = vpop.f32.mrf.mxu3 }
 0x502   :  { %v2583_v34 = vadd.f32 %v2582_v46, %v2523_v9  ;;  %v2687_v46 = vpop.f32.mrf.mxu2 }
 0x504   :  { %5068 = vmatmul.msk.f32.gmra.mxu3 %vm2615_vm3, %v2583_v34 }
 0x509   :  { %v2585_v63 = vpop.f32.mrf.mxu3 }
 0x50a   :  { %v2586_v19 = vadd.f32 %v2585_v63, %v2526_v45  ;;  %v2690_v41 = vpop.f32.mrf.mxu2 }
 0x50c   :  { %5069 = vmatmul.msk.f32.gmra.mxu3 %vm2615_vm3, %v2586_v19 }
 0x511   :  { %v2588_v58 = vpop.f32.mrf.mxu3 }
 0x512   :  { %v2589_v43 = vadd.f32 %v2588_v58, %v2529_v49  ;;  %v2693_v40 = vpop.f32.mrf.mxu2 }
 0x514   :  { %5070 = vmatmul.msk.f32.gmra.mxu3 %vm2615_vm3, %v2589_v43 }
 0x519   :  { %v2591_v4 = vpop.f32.mrf.mxu3 }
 0x51a   :  { %v2592_v62 = vadd.f32 %v2591_v4, %v2532_v28  ;;  %v2696_v17 = vpop.f32.mrf.mxu2 }
 0x51c   :  { %5071 = vmatmul.msk.f32.gmra.mxu3 %vm2615_vm3, %v2592_v62 }
 0x537   :  { %v2734_v14 = vpop.f32.mrf.mxu3 }
 0x538   :  { %v2735_v37 = vadd.f32 %v2734_v14, %v2675_v48 }
 0x53a   :  { %5125 = vmatmul.msk.f32.vlgmr.msrb.gmra.mxu2 %vm2863_vm4, %v2735_v37  ;;  %5140 = vmatmul.msk.f32.vlgmr.msrb.gmra.mxu3 %vm2863_vm4, %v2735_v37  ;;  %v2836_v15 = vrot.slane %v2735_v37, 1  ;;  %v3423_v51 = vrot.slane %v2735_v37, 3  ;;  %v3192_v18 = vrot.slane %v2735_v37, 2  ;;  %v3653_v21 = vrot.slane %v2735_v37, 4 }
 0x53f   :  { %v2737_v9 = vpop.f32.mrf.mxu3 }
 0x540   :  { %v2738_v2 = vadd.f32 %v2737_v9, %v2678_v16 }
 0x542   :  { %5126 = vmatmul.msk.f32.gmra.mxu2 %vm2863_vm4, %v2738_v2  ;;  %5141 = vmatmul.msk.f32.gmra.mxu3 %vm2863_vm4, %v2738_v2  ;;  %v2837_v61 = vrot.slane %v2738_v2, 1  ;;  %v3424_v0 = vrot.slane %v2738_v2, 3  ;;  %v3193_v59 = vrot.slane %v2738_v2, 2  ;;  %v3654_v39 = vrot.slane %v2738_v2, 4 }
 0x544   :  { %v2838_v45 = vsel %vm2835_vm5, %v2836_v15, %v2837_v61  ;;  %v7821_v13 = vsel %vm3422_vm6, %v3423_v51, %v3424_v0  ;;  %v7824_v31 = vsel %vm3191_vm7, %v3192_v18, %v3193_v59  ;;  %v7827_v47 = vsel %vm2351_vm1, %v3653_v21, %v3654_v39  ;;  %v2699_v18 = vpop.f32.mrf.mxu2 }
 0x545   :  { %5095 = vmatmul.msk.f32.vlgmr.msrb.gmra.mxu0 %vm2863_vm4, %v2838_v45  ;;  %5110 = vmatmul.msk.f32.vlgmr.msrb.gmra.mxu1 %vm2863_vm4, %v2838_v45 }
 0x547   :  { %v2740_v44 = vpop.f32.mrf.mxu3 }
 0x548   :  { %v2741_v33 = vadd.f32 %v2740_v44, %v2681_v25 }
 0x54a   :  { %5127 = vmatmul.msk.f32.gmra.mxu2 %vm2863_vm4, %v2741_v33  ;;  %5142 = vmatmul.msk.f32.gmra.mxu3 %vm2863_vm4, %v2741_v33  ;;  %v2839_v34 = vrot.slane %v2741_v33, 1  ;;  %v3426_v10 = vrot.slane %v2741_v33, 3  ;;  %v3195_v27 = vrot.slane %v2741_v33, 2  ;;  %v3656_v35 = vrot.slane %v2741_v33, 4 }
 0x54c   :  { %v2840_v26 = vsel %vm2835_vm5, %v2837_v61, %v2839_v34  ;;  %v7835_v55 = vsel %vm3422_vm6, %v3424_v0, %v3426_v10  ;;  %v7838_v24 = vsel %vm3191_vm7, %v3193_v59, %v3195_v27  ;;  %v7841_v53 = vsel %vm2351_vm1, %v3654_v39, %v3656_v35 }
 0x54d   :  { %5096 = vmatmul.msk.f32.gmra.mxu0 %vm2863_vm4, %v2840_v26  ;;  %5111 = vmatmul.msk.f32.gmra.mxu1 %vm2863_vm4, %v2840_v26  ;;  %v2702_v26 = vpop.f32.mrf.mxu2 }
 0x54f   :  { %v2743_v42 = vpop.f32.mrf.mxu3 }
 0x550   :  { %v2744_v5 = vadd.f32 %v2743_v42, %v2684_v1  ;;  %v5224_v42 = vld [vmem:[%s9199_s5 + $0x2a0] sm:$0xff] }
 0x552   :  { %5128 = vmatmul.msk.f32.gmra.mxu2 %vm2863_vm4, %v2744_v5  ;;  %5143 = vmatmul.msk.f32.gmra.mxu3 %vm2863_vm4, %v2744_v5  ;;  %v2841_v11 = vrot.slane %v2744_v5, 1  ;;  %v3428_v50 = vrot.slane %v2744_v5, 3  ;;  %v3197_v63 = vrot.slane %v2744_v5, 2  ;;  %v3658_v49 = vrot.slane %v2744_v5, 4 }
 0x554   :  { %v2842_v19 = vsel %vm2835_vm5, %v2839_v34, %v2841_v11  ;;  %v7849_v38 = vsel %vm3422_vm6, %v3426_v10, %v3428_v50  ;;  %v7852_v60 = vsel %vm3191_vm7, %v3195_v27, %v3197_v63  ;;  %v7855_v58 = vsel %vm2351_vm1, %v3656_v35, %v3658_v49  ;;  %v5226_v10 = vld [vmem:[%s9199_s5 + $0x2b0] sm:$0xf]  ;;  %v5227_v27 = vld [vmem:[%s9199_s5 + $0x2b8] sm:$0xf] }
 0x555   :  { %5097 = vmatmul.msk.f32.gmra.mxu0 %vm2863_vm4, %v2842_v19  ;;  %5112 = vmatmul.msk.f32.gmra.mxu1 %vm2863_vm4, %v2842_v19 }
 0x556   :  { %5228 = vmatpush.msk.msra.mxu2 %vm2351_vm1, %v5226_v10  ;;  %5243 = vmatpush.msk.msra.mxu3 %vm2351_vm1, %v5227_v27  ;;  %v5168_v27 = vld [vmem:[%s9199_s5 + $0x1d0] sm:$0xff] }
 0x557   :  { %v2746_v43 = vpop.f32.mrf.mxu3 }
 0x558   :  { %v2747_v28 = vadd.f32 %v2746_v43, %v2687_v46  ;;  %3490 = vmatpush.msra.mxu2 %v5224_v42 }
 0x55a   :  { %5129 = vmatmul.msk.f32.gmra.mxu2 %vm2863_vm4, %v2747_v28  ;;  %5144 = vmatmul.msk.f32.gmra.mxu3 %vm2863_vm4, %v2747_v28  ;;  %v2843_v56 = vrot.slane %v2747_v28, 1  ;;  %v3430_v22 = vrot.slane %v2747_v28, 3  ;;  %v3199_v30 = vrot.slane %v2747_v28, 2  ;;  %v3660_v32 = vrot.slane %v2747_v28, 4  ;;  %v5220_v28 = vld [vmem:[%s9199_s5 + $0x280] sm:$0xff] }
 0x55c   :  { %v2844_v4 = vsel %vm2835_vm5, %v2841_v11, %v2843_v56  ;;  %v7863_v54 = vsel %vm3422_vm6, %v3428_v50, %v3430_v22  ;;  %v7866_v57 = vsel %vm3191_vm7, %v3197_v63, %v3199_v30  ;;  %v7869_v20 = vsel %vm2351_vm1, %v3658_v49, %v3660_v32  ;;  %v5222_v11 = vld [vmem:[%s9199_s5 + $0x290] sm:$0xff]  ;;  %v5223_v50 = vld [vmem:[%s9199_s5 + $0x298] sm:$0xff] }
 0x55d   :  { %5098 = vmatmul.msk.f32.gmra.mxu0 %vm2863_vm4, %v2844_v4  ;;  %5113 = vmatmul.msk.f32.gmra.mxu1 %vm2863_vm4, %v2844_v4  ;;  %v5218_v4 = vld [vmem:[%s9199_s5 + $0x270] sm:$0xff] }
 0x55e   :  { %3491 = vmatpush.msra.mxu2 %v5222_v11  ;;  %v5166_v11 = vld [vmem:[%s9199_s5 + $0x1c0] sm:$0xff] }
 0x55f   :  { %v2749_v62 = vpop.f32.mrf.mxu3 }
 0x560   :  { %v2750_v36 = vadd.f32 %v2749_v62, %v2690_v41  ;;  %v5225_v41 = vld [vmem:[%s9199_s5 + $0x2a8] sm:$0xff]  ;;  %v5219_v62 = vld [vmem:[%s9199_s5 + $0x278] sm:$0xff]  ;;  %3492 = vmatpush.msra.mxu2 %v5220_v28 }
 0x561   :  { %3549 = vmatpush.msra.mxu3 %v5225_v41  ;;  %v5210_v41 = vld [vmem:[%s9199_s5 + $0x230] sm:$0xff] }
 0x562   :  { %5130 = vmatmul.msk.f32.gmra.mxu2 %vm2863_vm4, %v2750_v36  ;;  %5145 = vmatmul.msk.f32.gmra.mxu3 %vm2863_vm4, %v2750_v36  ;;  %v2845_v29 = vrot.slane %v2750_v36, 1  ;;  %v3432_v8 = vrot.slane %v2750_v36, 3  ;;  %v3201_v23 = vrot.slane %v2750_v36, 2  ;;  %v3662_v48 = vrot.slane %v2750_v36, 4 }
 0x563   :  { %3550 = vmatpush.msra.mxu3 %v5223_v50  ;;  %3493 = vmatpush.msra.mxu2 %v5218_v4  ;;  %v5167_v50 = vld [vmem:[%s9199_s5 + $0x1c8] sm:$0xff] }
 0x564   :  { %v2846_v52 = vsel %vm2835_vm5, %v2843_v56, %v2845_v29  ;;  %v7877_v3 = vsel %vm3422_vm6, %v3430_v22, %v3432_v8  ;;  %v7880_v7 = vsel %vm3191_vm7, %v3199_v30, %v3201_v23  ;;  %v7883_v12 = vsel %vm2351_vm1, %v3660_v32, %v3662_v48 }
 0x565   :  { %5099 = vmatmul.msk.f32.gmra.mxu0 %vm2863_vm4, %v2846_v52  ;;  %5114 = vmatmul.msk.f32.gmra.mxu1 %vm2863_vm4, %v2846_v52  ;;  %v2705_v52 = vpop.f32.mrf.mxu2 }
 0x567   :  { %v2752_v6 = vpop.f32.mrf.mxu3 }
 0x568   :  { %v2753_v16 = vadd.f32 %v2752_v6, %v2693_v40  ;;  %v5221_v40 = vld [vmem:[%s9199_s5 + $0x288] sm:$0xff] }
 0x569   :  { %3551 = vmatpush.msra.mxu3 %v5221_v40  ;;  %v5208_v40 = vld [vmem:[%s9199_s5 + $0x220] sm:$0xff] }
 0x56a   :  { %5131 = vmatmul.msk.f32.gmra.mxu2 %vm2863_vm4, %v2753_v16  ;;  %5146 = vmatmul.msk.f32.gmra.mxu3 %vm2863_vm4, %v2753_v16  ;;  %v2847_v25 = vrot.slane %v2753_v16, 1  ;;  %v3434_v14 = vrot.slane %v2753_v16, 3  ;;  %v3203_v37 = vrot.slane %v2753_v16, 2  ;;  %v3664_v1 = vrot.slane %v2753_v16, 4  ;;  %v5172_v16 = vld [vmem:[%s9199_s5 + $0x1f0] sm:$0xff] }
 0x56b   :  { %3552 = vmatpush.msra.mxu3 %v5219_v62  ;;  %v5164_v62 = vld [vmem:[%s9199_s5 + $0x1b0] sm:$0xff] }
 0x56c   :  { %v2848_v9 = vsel %vm2835_vm5, %v2845_v29, %v2847_v25  ;;  %v7891_v2 = vsel %vm3422_vm6, %v3432_v8, %v3434_v14  ;;  %v7894_v15 = vsel %vm3191_vm7, %v3201_v23, %v3203_v37  ;;  %v7897_v51 = vsel %vm2351_vm1, %v3662_v48, %v3664_v1  ;;  %v5216_v29 = vld [vmem:[%s9199_s5 + $0x260] sm:$0xff]  ;;  %v5217_v23 = vld [vmem:[%s9199_s5 + $0x268] sm:$0xff] }
 0x56d   :  { %5100 = vmatmul.msk.f32.gmra.mxu0 %vm2863_vm4, %v2848_v9  ;;  %5115 = vmatmul.msk.f32.gmra.mxu1 %vm2863_vm4, %v2848_v9  ;;  %v5174_v48 = vld [vmem:[%s9199_s5 + $0x200] sm:$0xf]  ;;  %v5215_v9 = vld [vmem:[%s9199_s5 + $0x258] sm:$0xff]  ;;  %v2708_v28 = vpop.f32.mrf.mxu2 }
 0x56e   :  { %5176 = vmatpush.msk.msra.mxu0 %vm2351_vm1, %v5174_v48  ;;  %3494 = vmatpush.msra.mxu2 %v5216_v29  ;;  %v5207_v48 = vld [vmem:[%s9199_s5 + $0x218] sm:$0xff] }
 0x56f   :  { %v2755_v21 = vpop.f32.mrf.mxu3  ;;  %3553 = vmatpush.msra.mxu3 %v5217_v23  ;;  %v5206_v23 = vld [vmem:[%s9199_s5 + $0x210] sm:$0xff] }
 0x570   :  { %v2756_v61 = vadd.f32 %v2755_v21, %v2696_v17  ;;  %v5175_v17 = vld [vmem:[%s9199_s5 + $0x208] sm:$0xf]  ;;  %3259 = vmatpush.msra.mxu0 %v5172_v16 }
 0x571   :  { %5191 = vmatpush.msk.msra.mxu1 %vm2351_vm1, %v5175_v17  ;;  %3554 = vmatpush.msra.mxu3 %v5215_v9 }
 0x572   :  { %5132 = vmatmul.msk.f32.gmra.mxu2 %vm2863_vm4, %v2756_v61  ;;  %5147 = vmatmul.msk.f32.gmra.mxu3 %vm2863_vm4, %v2756_v61  ;;  %v2849_v0 = vrot.slane %v2756_v61, 1  ;;  %v3436_v59 = vrot.slane %v2756_v61, 3  ;;  %v3205_v39 = vrot.slane %v2756_v61, 2  ;;  %v3666_v45 = vrot.slane %v2756_v61, 4  ;;  %v5170_v61 = vld [vmem:[%s9199_s5 + $0x1e0] sm:$0xff] }
 0x573   :  { %3260 = vmatpush.msra.mxu0 %v5170_v61  ;;  %v5158_v61 = vld [vmem:[%s9199_s5 + $0x180] sm:$0xff] }
 0x574   :  { %v2850_v46 = vsel %vm2835_vm5, %v2847_v25, %v2849_v0  ;;  %v7905_v44 = vsel %vm3422_vm6, %v3434_v14, %v3436_v59  ;;  %v7908_v33 = vsel %vm3191_vm7, %v3203_v37, %v3205_v39  ;;  %v7911_v34 = vsel %vm2351_vm1, %v3664_v1, %v3666_v45  ;;  %v5173_v25 = vld [vmem:[%s9199_s5 + $0x1f8] sm:$0xff]  ;;  %v5214_v1 = vld [vmem:[%s9199_s5 + $0x250] sm:$0xff] }
 0x575   :  { %5101 = vmatmul.msk.f32.gmra.mxu0 %vm2863_vm4, %v2850_v46  ;;  %5116 = vmatmul.msk.f32.gmra.mxu1 %vm2863_vm4, %v2850_v46  ;;  %v5213_v46 = vld [vmem:[%s9199_s5 + $0x248] sm:$0xff] }
 0x576   :  { %3318 = vmatpush.msra.mxu1 %v5173_v25  ;;  %3495 = vmatpush.msra.mxu2 %v5214_v1 }
 0x577   :  { %v2758_v35 = vpop.f32.mrf.mxu3  ;;  %3555 = vmatpush.msra.mxu3 %v5213_v46  ;;  %3261 = vmatpush.msra.mxu0 %v5168_v27 }
 0x578   :  { %v2759_v5 = vadd.f32 %v2758_v35, %v2699_v18  ;;  %v5169_v35 = vld [vmem:[%s9199_s5 + $0x1d8] sm:$0xff] }
 0x579   :  { %3262 = vmatpush.msra.mxu0 %v5166_v11 }
 0x57a   :  { %5133 = vmatmul.msk.f32.gmra.mxu2 %vm2863_vm4, %v2759_v5  ;;  %5148 = vmatmul.msk.f32.gmra.mxu3 %vm2863_vm4, %v2759_v5  ;;  %v2851_v63 = vrot.slane %v2759_v5, 1  ;;  %v3438_v49 = vrot.slane %v2759_v5, 3  ;;  %v3207_v19 = vrot.slane %v2759_v5, 2  ;;  %v3668_v43 = vrot.slane %v2759_v5, 4  ;;  %v5211_v5 = vld [vmem:[%s9199_s5 + $0x238] sm:$0xff] }
 0x57b   :  { %3556 = vmatpush.msra.mxu3 %v5211_v5  ;;  %3263 = vmatpush.msra.mxu0 %v5164_v62 }
 0x57c   :  { %v2852_v56 = vsel %vm2835_vm5, %v2849_v0, %v2851_v63  ;;  %v7945_v22 = vsel %vm3422_vm6, %v3436_v59, %v3438_v49  ;;  %v7948_v30 = vsel %vm3191_vm7, %v3205_v39, %v3207_v19  ;;  %v7951_v32 = vsel %vm2351_vm1, %v3666_v45, %v3668_v43  ;;  %v5171_v0 = vld [vmem:[%s9199_s5 + $0x1e8] sm:$0xff]  ;;  %v5212_v45 = vld [vmem:[%s9199_s5 + $0x240] sm:$0xff] }
 0x57d   :  { %5102 = vmatmul.msk.f32.gmra.mxu0 %vm2863_vm4, %v2852_v56  ;;  %5117 = vmatmul.msk.f32.gmra.mxu1 %vm2863_vm4, %v2852_v56  ;;  %v5209_v56 = vld [vmem:[%s9199_s5 + $0x228] sm:$0xff] }
 0x57e   :  { %3319 = vmatpush.msra.mxu1 %v5171_v0  ;;  %3496 = vmatpush.msra.mxu2 %v5212_v45  ;;  %v5159_v0 = vld [vmem:[%s9199_s5 + $0x188] sm:$0xff] }
 0x57f   :  { %v2761_v36 = vpop.f32.mrf.mxu3  ;;  %3557 = vmatpush.msra.mxu3 %v5209_v56 }
 0x580   :  { %v7964_v8 = vadd.f32 %v2761_v36, %v2702_v26  ;;  %3320 = vmatpush.msra.mxu1 %v5169_v35  ;;  %3497 = vmatpush.msra.mxu2 %v5210_v41  ;;  %v5165_v36 = vld [vmem:[%s9199_s5 + $0x1b8] sm:$0xff] }
 0x581   :  { %3558 = vmatpush.msra.mxu3 %v5207_v48  ;;  %v5157_v41 = vld [vmem:[%s9199_s5 + $0x178] sm:$0xff] }
 0x582   :  { %5134 = vmatmul.msk.f32.gmra.mxu2 %vm2863_vm4, %v7964_v8  ;;  %5149 = vmatmul.msk.f32.gmra.mxu3 %vm2863_vm4, %v7964_v8  ;;  %v2853_v6 = vrot.slane %v7964_v8, 1  ;;  %v3440_v14 = vrot.slane %v7964_v8, 3  ;;  %v3209_v37 = vrot.slane %v7964_v8, 2  ;;  %v3670_v18 = vrot.slane %v7964_v8, 4 }
 0x583   :  { %3321 = vmatpush.msra.mxu1 %v5167_v50  ;;  %3498 = vmatpush.msra.mxu2 %v5208_v40  ;;  %v5154_v50 = vld [vmem:[%s9199_s5 + $0x160] sm:$0xff] }
 0x584   :  { %v2854_v21 = vsel %vm2835_vm5, %v2851_v63, %v2853_v6  ;;  %v8005_v59 = vsel %vm3422_vm6, %v3438_v49, %v3440_v14  ;;  %v8008_v39 = vsel %vm3191_vm7, %v3207_v19, %v3209_v37  ;;  %v8019_v10 = vsel %vm2351_vm1, %v3668_v43, %v3670_v18 }
 0x585   :  { %5103 = vmatmul.msk.f32.gmra.mxu0 %vm2863_vm4, %v2854_v21  ;;  %5118 = vmatmul.msk.f32.gmra.mxu1 %vm2863_vm4, %v2854_v21 }
 0x586   :  { %3322 = vmatpush.msra.mxu1 %v5165_v36  ;;  %3499 = vmatpush.msra.mxu2 %v5206_v23 }
 0x587   :  { %v2764_v26 = vpop.f32.mrf.mxu3 }
 0x588   :  { %v2765_v42 = vadd.f32 %v2764_v26, %v2705_v52  ;;  %v5162_v52 = vld [vmem:[%s9199_s5 + $0x1a0] sm:$0xff]  ;;  %v2711_v26 = vpop.f32.mrf.mxu2 }
 0x589   :  { %3264 = vmatpush.msra.mxu0 %v5162_v52 }
 0x58a   :  { %5135 = vmatmul.msk.f32.gmra.mxu2 %vm2863_vm4, %v2765_v42  ;;  %5150 = vmatmul.msk.f32.gmra.mxu3 %vm2863_vm4, %v2765_v42  ;;  %v2855_v63 = vrot.slane %v2765_v42, 1  ;;  %v3442_v49 = vrot.slane %v2765_v42, 3  ;;  %v3211_v19 = vrot.slane %v2765_v42, 2  ;;  %v3672_v43 = vrot.slane %v2765_v42, 4  ;;  %v5156_v42 = vld [vmem:[%s9199_s5 + $0x170] sm:$0xff] }
 0x58c   :  { %v2856_v4 = vsel %vm2835_vm5, %v2853_v6, %v2855_v63  ;;  %v8055_v29 = vsel %vm3422_vm6, %v3440_v14, %v3442_v49  ;;  %v8058_v8 = vsel %vm3191_vm7, %v3209_v37, %v3211_v19  ;;  %v8069_v17 = vsel %vm2351_vm1, %v3670_v18, %v3672_v43  ;;  %v5163_v6 = vld [vmem:[%s9199_s5 + $0x1a8] sm:$0xff]  ;;  %v5160_v14 = vld [vmem:[%s9199_s5 + $0x190] sm:$0xff]  ;;  %v5161_v37 = vld [vmem:[%s9199_s5 + $0x198] sm:$0xff] }
 0x58d   :  { %5104 = vmatmul.msk.f32.gmra.mxu0 %vm2863_vm4, %v2856_v4  ;;  %5119 = vmatmul.msk.f32.gmra.mxu1 %vm2863_vm4, %v2856_v4 }
 0x58e   :  { %3323 = vmatpush.msra.mxu1 %v5163_v6  ;;  %3265 = vmatpush.msra.mxu0 %v5160_v14 }
 0x58f   :  { %v2767_v16 = vpop.f32.mrf.mxu3 }
 0x590   :  { %v2768_v25 = vadd.f32 %v2767_v16, %v2708_v28  ;;  %3324 = vmatpush.msra.mxu1 %v5161_v37  ;;  %3266 = vmatpush.msra.mxu0 %v5158_v61  ;;  %v2714_v36 = vpop.f32.mrf.mxu2 }
 0x592   :  { %5136 = vmatmul.msk.f32.gmra.mxu2 %vm2863_vm4, %v2768_v25  ;;  %5151 = vmatmul.msk.f32.gmra.mxu3 %vm2863_vm4, %v2768_v25  ;;  %v2857_v1 = vrot.slane %v2768_v25, 1  ;;  %v3444_v9 = vrot.slane %v2768_v25, 3  ;;  %v3213_v18 = vrot.slane %v2768_v25, 2  ;;  %v3674_v21 = vrot.slane %v2768_v25, 4 }
 0x593   :  { %3325 = vmatpush.msra.mxu1 %v5159_v0  ;;  %3267 = vmatpush.msra.mxu0 %v5156_v42 }
 0x594   :  { %v2858_v45 = vsel %vm2835_vm5, %v2855_v63, %v2857_v1  ;;  %v8093_v46 = vsel %vm3422_vm6, %v3442_v49, %v3444_v9  ;;  %v8096_v27 = vsel %vm3191_vm7, %v3211_v19, %v3213_v18  ;;  %v8099_v35 = vsel %vm2351_vm1, %v3672_v43, %v3674_v21  ;;  %v5155_v63 = vld [vmem:[%s9199_s5 + $0x168] sm:$0xff] }
 0x595   :  { %5105 = vmatmul.msk.f32.gmra.mxu0 %vm2863_vm4, %v2858_v45  ;;  %5120 = vmatmul.msk.f32.gmra.mxu1 %vm2863_vm4, %v2858_v45 }
 0x596   :  { %3326 = vmatpush.msra.mxu1 %v5157_v41  ;;  %3268 = vmatpush.msra.mxu0 %v5154_v50  ;;  %v5277_v41 = vld [vmem:[%s9199_s5 + $0x358] sm:$0xff] }
 0x597   :  { %v2770_v5 = vpop.f32.mrf.mxu3 }
 0x598   :  { %v2771_v11 = vadd.f32 %v2770_v5, %v2711_v26  ;;  %3327 = vmatpush.msra.mxu1 %v5155_v63  ;;  %v5272_v63 = vld [vmem:[%s9199_s5 + $0x330] sm:$0xff] }
 0x59a   :  { %5137 = vmatmul.msk.f32.gmra.mxu2 %vm2863_vm4, %v2771_v11  ;;  %5152 = vmatmul.msk.f32.gmra.mxu3 %vm2863_vm4, %v2771_v11  ;;  %v2859_v49 = vrot.slane %v2771_v11, 1  ;;  %v3446_v19 = vrot.slane %v2771_v11, 3  ;;  %v3215_v43 = vrot.slane %v2771_v11, 2  ;;  %v3676_v28 = vrot.slane %v2771_v11, 4  ;;  %v5274_v11 = vld [vmem:[%s9199_s5 + $0x340] sm:$0xff] }
 0x59c   :  { %v2860_v40 = vsel %vm2835_vm5, %v2857_v1, %v2859_v49  ;;  %v8119_v56 = vsel %vm3422_vm6, %v3444_v9, %v3446_v19  ;;  %v8122_v4 = vsel %vm3191_vm7, %v3213_v18, %v3215_v43  ;;  %v8125_v62 = vsel %vm2351_vm1, %v3674_v21, %v3676_v28 }
 0x59d   :  { %5106 = vmatmul.msk.f32.gmra.mxu0 %vm2863_vm4, %v2860_v40  ;;  %5121 = vmatmul.msk.f32.gmra.mxu1 %vm2863_vm4, %v2860_v40  ;;  %v5268_v40 = vld [vmem:[%s9199_s5 + $0x310] sm:$0xff] }
 0x59f   :  { %v2773_v23 = vpop.f32.mrf.mxu3 }
 0x5a0   :  { %v2774_v48 = vadd.f32 %v2773_v23, %v2714_v36  ;;  %v5269_v36 = vld [vmem:[%s9199_s5 + $0x318] sm:$0xff] }
 0x5a2   :  { %5138 = vmatmul.msk.f32.gmra.mxu2 %vm2863_vm4, %v2774_v48  ;;  %5153 = vmatmul.msk.f32.gmra.mxu3 %vm2863_vm4, %v2774_v48  ;;  %v2861_v52 = vrot.slane %v2774_v48, 1  ;;  %v8131_v6 = vrot.slane %v2774_v48, 3  ;;  %v8133_v16 = vrot.slane %v2774_v48, 2  ;;  %v8135_v25 = vrot.slane %v2774_v48, 4 }
 0x5a4   :  { %v2862_v14 = vsel %vm2835_vm5, %v2859_v49, %v2861_v52  ;;  %v8140_v37 = vsel %vm3422_vm6, %v3446_v19, %v8131_v6  ;;  %v8144_v1 = vsel %vm3191_vm7, %v3215_v43, %v8133_v16  ;;  %v8148_v9 = vsel %vm2351_vm1, %v3676_v28, %v8135_v25  ;;  %v5273_v49 = vld [vmem:[%s9199_s5 + $0x338] sm:$0xff]  ;;  %v5270_v19 = vld [vmem:[%s9199_s5 + $0x320] sm:$0xff] }
 0x5a5   :  { %5107 = vmatmul.msk.f32.gmra.mxu0 %vm2863_vm4, %v2862_v14  ;;  %5122 = vmatmul.msk.f32.gmra.mxu1 %vm2863_vm4, %v2862_v14  ;;  %v5264_v14 = vld [vmem:[%s9199_s5 + $0x2f0] sm:$0xff] }
 0x5aa   :  { %5229 = vmatmul.msk.f32.vlgmr.msra.gmra.mxu2 %vm2863_vm4, %v7821_v13  ;;  %5244 = vmatmul.msk.f32.vlgmr.msra.gmra.mxu3 %vm2863_vm4, %v7821_v13 }
 0x5ad   :  { %5108 = vmatmul.msk.f32.gmra.mxu0 %vm2863_vm4, %v2861_v52  ;;  %5123 = vmatmul.msk.f32.gmra.mxu1 %vm2863_vm4, %v2861_v52  ;;  %v5267_v52 = vld [vmem:[%s9199_s5 + $0x308] sm:$0xff] }
 0x5b2   :  { %5230 = vmatmul.msk.f32.gmra.mxu2 %vm2863_vm4, %v7835_v55  ;;  %5245 = vmatmul.msk.f32.gmra.mxu3 %vm2863_vm4, %v7835_v55 }
 0x5b5   :  { %5177 = vmatmul.msk.f32.vlgmr.msra.gmra.mxu0 %vm2863_vm4, %v7824_v31  ;;  %5192 = vmatmul.msk.f32.vlgmr.msra.gmra.mxu1 %vm2863_vm4, %v7824_v31 }
 0x5ba   :  { %5231 = vmatmul.msk.f32.gmra.mxu2 %vm2863_vm4, %v7849_v38  ;;  %5246 = vmatmul.msk.f32.gmra.mxu3 %vm2863_vm4, %v7849_v38 }
 0x5bd   :  { %v8170_v13 = vpop.f32.mrf.mxu3  ;;  %5178 = vmatmul.msk.f32.gmra.mxu0 %vm2863_vm4, %v7838_v24  ;;  %5193 = vmatmul.msk.f32.gmra.mxu1 %vm2863_vm4, %v7838_v24  ;;  %v8282_v5 = vpop.f32.mrf.mxu2 }
 0x5c2   :  { %v8176_v55 = vpop.f32.mrf.mxu0  ;;  %v8178_v18 = vpop.f32.mrf.mxu1  ;;  %5232 = vmatmul.msk.f32.gmra.mxu2 %vm2863_vm4, %v7863_v54  ;;  %5247 = vmatmul.msk.f32.gmra.mxu3 %vm2863_vm4, %v7863_v54 }
 0x5c5   :  { %v8184_v31 = vpop.f32.mrf.mxu3  ;;  %5179 = vmatmul.msk.f32.gmra.mxu0 %vm2863_vm4, %v7852_v60  ;;  %5194 = vmatmul.msk.f32.gmra.mxu1 %vm2863_vm4, %v7852_v60  ;;  %v8322_v23 = vpop.f32.mrf.mxu2 }
 0x5ca   :  { %v8190_v38 = vpop.f32.mrf.mxu0  ;;  %v8192_v24 = vpop.f32.mrf.mxu1  ;;  %5233 = vmatmul.msk.f32.gmra.mxu2 %vm2863_vm4, %v7877_v3  ;;  %5248 = vmatmul.msk.f32.gmra.mxu3 %vm2863_vm4, %v7877_v3 }
 0x5cd   :  { %v8198_v21 = vpop.f32.mrf.mxu3  ;;  %5180 = vmatmul.msk.f32.gmra.mxu0 %vm2863_vm4, %v7866_v57  ;;  %5195 = vmatmul.msk.f32.gmra.mxu1 %vm2863_vm4, %v7866_v57 }
 0x5d2   :  { %v8204_v54 = vpop.f32.mrf.mxu0  ;;  %v8206_v60 = vpop.f32.mrf.mxu1  ;;  %5234 = vmatmul.msk.f32.gmra.mxu2 %vm2863_vm4, %v7891_v2  ;;  %5249 = vmatmul.msk.f32.gmra.mxu3 %vm2863_vm4, %v7891_v2 }
 0x5d5   :  { %v8212_v61 = vpop.f32.mrf.mxu3  ;;  %5181 = vmatmul.msk.f32.gmra.mxu0 %vm2863_vm4, %v7880_v7  ;;  %5196 = vmatmul.msk.f32.gmra.mxu1 %vm2863_vm4, %v7880_v7 }
 0x5da   :  { %v8218_v3 = vpop.f32.mrf.mxu0  ;;  %v8220_v57 = vpop.f32.mrf.mxu1  ;;  %5235 = vmatmul.msk.f32.gmra.mxu2 %vm2863_vm4, %v7905_v44  ;;  %5250 = vmatmul.msk.f32.gmra.mxu3 %vm2863_vm4, %v7905_v44 }
 0x5dd   :  { %v8226_v0 = vpop.f32.mrf.mxu3  ;;  %5182 = vmatmul.msk.f32.gmra.mxu0 %vm2863_vm4, %v7894_v15  ;;  %5197 = vmatmul.msk.f32.gmra.mxu1 %vm2863_vm4, %v7894_v15 }
 0x5e2   :  { %v8232_v2 = vpop.f32.mrf.mxu0  ;;  %v8234_v7 = vpop.f32.mrf.mxu1  ;;  %5236 = vmatmul.msk.f32.gmra.mxu2 %vm2863_vm4, %v7945_v22  ;;  %5251 = vmatmul.msk.f32.gmra.mxu3 %vm2863_vm4, %v7945_v22  ;;  %v5279_v22 = vld [vmem:[%s9199_s5 + $0x368] sm:$0xf] }
 0x5e3   :  { %5295 = vmatpush.msk.msrb.mxu1 %vm2351_vm1, %v5279_v22 }
 0x5e5   :  { %v8240_v45 = vpop.f32.mrf.mxu3  ;;  %5183 = vmatmul.msk.f32.gmra.mxu0 %vm2863_vm4, %v7908_v33  ;;  %5198 = vmatmul.msk.f32.gmra.mxu1 %vm2863_vm4, %v7908_v33  ;;  %v5278_v33 = vld [vmem:[%s9199_s5 + $0x360] sm:$0xf] }
 0x5e6   :  { %5280 = vmatpush.msk.msrb.mxu0 %vm2351_vm1, %v5278_v33  ;;  %3779 = vmatpush.msrb.mxu1 %v5277_v41  ;;  %v5263_v41 = vld [vmem:[%s9199_s5 + $0x2e8] sm:$0xff] }
 0x5ea   :  { %v8246_v44 = vpop.f32.mrf.mxu0  ;;  %v8248_v15 = vpop.f32.mrf.mxu1  ;;  %5237 = vmatmul.msk.f32.gmra.mxu2 %vm2863_vm4, %v8005_v59  ;;  %5252 = vmatmul.msk.f32.gmra.mxu3 %vm2863_vm4, %v8005_v59 }
 0x5ed   :  { %v8254_v26 = vpop.f32.mrf.mxu3  ;;  %5184 = vmatmul.msk.f32.gmra.mxu0 %vm2863_vm4, %v7948_v30  ;;  %5199 = vmatmul.msk.f32.gmra.mxu1 %vm2863_vm4, %v7948_v30  ;;  %v5276_v30 = vld [vmem:[%s9199_s5 + $0x350] sm:$0xff] }
 0x5ee   :  { %3720 = vmatpush.msrb.mxu0 %v5276_v30  ;;  %v5262_v30 = vld [vmem:[%s9199_s5 + $0x2e0] sm:$0xff] }
 0x5f0   :  { %3721 = vmatpush.msrb.mxu0 %v5274_v11 }
 0x5f2   :  { %v8268_v59 = vpop.f32.mrf.mxu0  ;;  %v8270_v42 = vpop.f32.mrf.mxu1  ;;  %5238 = vmatmul.msk.f32.gmra.mxu2 %vm2863_vm4, %v8055_v29  ;;  %5253 = vmatmul.msk.f32.gmra.mxu3 %vm2863_vm4, %v8055_v29  ;;  %v5275_v29 = vld [vmem:[%s9199_s5 + $0x348] sm:$0xff] }
 0x5f3   :  { %3780 = vmatpush.msrb.mxu1 %v5275_v29  ;;  %3722 = vmatpush.msrb.mxu0 %v5272_v63  ;;  %v5261_v29 = vld [vmem:[%s9199_s5 + $0x2d8] sm:$0xff]  ;;  %v8368_v63 = vpop.f32.mrf.mxu2 }
 0x5f5   :  { %v8290_v50 = vpop.f32.mrf.mxu3  ;;  %5185 = vmatmul.msk.f32.gmra.mxu0 %vm2863_vm4, %v8008_v39  ;;  %5200 = vmatmul.msk.f32.gmra.mxu1 %vm2863_vm4, %v8008_v39  ;;  %v5271_v39 = vld [vmem:[%s9199_s5 + $0x328] sm:$0xff] }
 0x5f6   :  { %3781 = vmatpush.msrb.mxu1 %v5273_v49  ;;  %3723 = vmatpush.msrb.mxu0 %v5270_v19  ;;  %v5258_v49 = vld [vmem:[%s9199_s5 + $0x2c0] sm:$0xff] }
 0x5f8   :  { %3782 = vmatpush.msrb.mxu1 %v5271_v39  ;;  %3724 = vmatpush.msrb.mxu0 %v5268_v40 }
 0x5fa   :  { %v8308_v43 = vpop.f32.mrf.mxu0  ;;  %v8310_v28 = vpop.f32.mrf.mxu1  ;;  %5239 = vmatmul.msk.f32.gmra.mxu2 %vm2863_vm4, %v8093_v46  ;;  %5254 = vmatmul.msk.f32.gmra.mxu3 %vm2863_vm4, %v8093_v46  ;;  %v5266_v46 = vld [vmem:[%s9199_s5 + $0x300] sm:$0xff] }
 0x5fb   :  { %3783 = vmatpush.msrb.mxu1 %v5269_v36  ;;  %3725 = vmatpush.msrb.mxu0 %v5266_v46  ;;  %v8390_v36 = vpop.f32.mrf.mxu2 }
 0x5fd   :  { %v8324_v48 = vpop.f32.mrf.mxu3  ;;  %5186 = vmatmul.msk.f32.gmra.mxu0 %vm2863_vm4, %v8058_v8  ;;  %5201 = vmatmul.msk.f32.gmra.mxu1 %vm2863_vm4, %v8058_v8  ;;  %v5265_v8 = vld [vmem:[%s9199_s5 + $0x2f8] sm:$0xff] }
 0x5fe   :  { %9492 = vst [vmem:[#allocation98_spill] sm:$0xff] %v8324_v48  ;;  %3784 = vmatpush.msrb.mxu1 %v5267_v52  ;;  %3726 = vmatpush.msrb.mxu0 %v5264_v14 }
 0x600   :  { %3785 = vmatpush.msrb.mxu1 %v5265_v8  ;;  %3727 = vmatpush.msrb.mxu0 %v5262_v30 }
 0x602   :  { %v8342_v33 = vpop.f32.mrf.mxu0  ;;  %v8344_v22 = vpop.f32.mrf.mxu1  ;;  %5240 = vmatmul.msk.f32.gmra.mxu2 %vm2863_vm4, %v8119_v56  ;;  %5255 = vmatmul.msk.f32.gmra.mxu3 %vm2863_vm4, %v8119_v56  ;;  %v5260_v56 = vld [vmem:[%s9199_s5 + $0x2d0] sm:$0xff] }
 0x603   :  { %9493 = vst [vmem:[#allocation90_spill] sm:$0xff] %v8342_v33  ;;  %3786 = vmatpush.msrb.mxu1 %v5263_v41  ;;  %3728 = vmatpush.msrb.mxu0 %v5260_v56 }
 0x604   :  { %9494 = vst [vmem:[#allocation97_spill] sm:$0xff] %v8344_v22 }
 0x605   :  { %v8356_v11 = vpop.f32.mrf.mxu3  ;;  %5187 = vmatmul.msk.f32.gmra.mxu0 %vm2863_vm4, %v8096_v27  ;;  %5202 = vmatmul.msk.f32.gmra.mxu1 %vm2863_vm4, %v8096_v27  ;;  %v5259_v27 = vld [vmem:[%s9199_s5 + $0x2c8] sm:$0xff] }
 0x606   :  { %9495 = vst [vmem:[#allocation95_spill] sm:$0xff] %v8356_v11  ;;  %3787 = vmatpush.msrb.mxu1 %v5261_v29  ;;  %3729 = vmatpush.msrb.mxu0 %v5258_v49 }
 0x608   :  { %3788 = vmatpush.msrb.mxu1 %v5259_v27 }
 0x60a   :  { %v8376_v19 = vpop.f32.mrf.mxu0  ;;  %v8378_v39 = vpop.f32.mrf.mxu1  ;;  %5241 = vmatmul.msk.f32.gmra.mxu2 %vm2863_vm4, %v8140_v37  ;;  %5256 = vmatmul.msk.f32.gmra.mxu3 %vm2863_vm4, %v8140_v37 }
 0x60b   :  { %9496 = vst [vmem:[#allocation46_spill] sm:$0xff] %v8376_v19 }
 0x60c   :  { %9497 = vst [vmem:[#allocation93_spill] sm:$0xff] %v8378_v39 }
 0x60d   :  { %v8384_v40 = vpop.f32.mrf.mxu3  ;;  %5188 = vmatmul.msk.f32.gmra.mxu0 %vm2863_vm4, %v8122_v4  ;;  %5203 = vmatmul.msk.f32.gmra.mxu1 %vm2863_vm4, %v8122_v4 }
 0x60e   :  { %9498 = vst [vmem:[#allocation45_spill] sm:$0xff] %v8384_v40 }
 0x612   :  { %v8392_v46 = vpop.f32.mrf.mxu0  ;;  %v8394_v52 = vpop.f32.mrf.mxu1  ;;  %5242 = vmatmul.msk.f32.gmra.mxu2 %vm2863_vm4, %v8131_v6  ;;  %5257 = vmatmul.msk.f32.gmra.mxu3 %vm2863_vm4, %v8131_v6 }
 0x613   :  { %9499 = vst [vmem:[#allocation91_spill] sm:$0xff] %v8392_v46  ;;  %v8416_v6 = vpop.f32.mrf.mxu2 }
 0x614   :  { %9500 = vst [vmem:[#allocation44_spill] sm:$0xff] %v8394_v52 }
 0x615   :  { %v8400_v37 = vpop.f32.mrf.mxu3  ;;  %5189 = vmatmul.msk.f32.gmra.mxu0 %vm2863_vm4, %v8144_v1  ;;  %5204 = vmatmul.msk.f32.gmra.mxu1 %vm2863_vm4, %v8144_v1 }
 0x616   :  { %9501 = vst [vmem:[#allocation89_spill] sm:$0xff] %v8400_v37 }
 0x61a   :  { %v8406_v4 = vpop.f32.mrf.mxu0  ;;  %v8408_v14 = vpop.f32.mrf.mxu1 }
 0x61b   :  { %9502 = vst [vmem:[#allocation43_spill] sm:$0xff] %v8406_v4  ;;  %v8432_v49 = vpop.f32.mrf.mxu2 }
 0x61c   :  { %9503 = vst [vmem:[#allocation88_spill] sm:$0xff] %v8408_v14 }
 0x61d   :  { %v8410_v8 = vpop.f32.mrf.mxu3  ;;  %5190 = vmatmul.msk.f32.gmra.mxu0 %vm2863_vm4, %v8133_v16  ;;  %5205 = vmatmul.msk.f32.gmra.mxu1 %vm2863_vm4, %v8133_v16 }
 0x61e   :  { %9504 = vst [vmem:[#allocation42_spill] sm:$0xff] %v8410_v8 }
 0x622   :  { %v8418_v30 = vpop.f32.mrf.mxu0  ;;  %v8420_v41 = vpop.f32.mrf.mxu1 }
 0x623   :  { %v8444_v39 = vpop.f32.mrf.mxu2 }
 0x625   :  { %v8422_v56 = vpop.f32.mrf.mxu3  ;;  %5281 = vmatmul.msk.f32.vlgmr.msrb.gmra.mxu0 %vm2863_vm4, %v7827_v47  ;;  %5296 = vmatmul.msk.f32.vlgmr.msrb.gmra.mxu1 %vm2863_vm4, %v7827_v47 }
 0x626   :  { %9505 = vst [vmem:[#allocation87_spill] sm:$0xff] %v8422_v56 }
 0x62a   :  { %v8428_v1 = vpop.f32.mrf.mxu0  ;;  %v8430_v29 = vpop.f32.mrf.mxu1 }
 0x62b   :  { %9506 = vst [vmem:[#allocation41_spill] sm:$0xff] %v8428_v1 }
 0x62c   :  { %9507 = vst [vmem:[#allocation86_spill] sm:$0xff] %v8430_v29 }
 0x62d   :  { %v8434_v16 = vpop.f32.mrf.mxu3  ;;  %5282 = vmatmul.msk.f32.gmra.mxu0 %vm2863_vm4, %v7841_v53  ;;  %5297 = vmatmul.msk.f32.gmra.mxu1 %vm2863_vm4, %v7841_v53  ;;  %v8460_v53 = vpop.f32.mrf.mxu2 }
 0x632   :  { %v8440_v27 = vpop.f32.mrf.mxu0  ;;  %v8442_v11 = vpop.f32.mrf.mxu1 }
 0x635   :  { %5283 = vmatmul.msk.f32.gmra.mxu0 %vm2863_vm4, %v7855_v58  ;;  %5298 = vmatmul.msk.f32.gmra.mxu1 %vm2863_vm4, %v7855_v58  ;;  %v8450_v47 = vpop.f32.mrf.mxu3  ;;  %v3136_v58 = vadd.f32 %v8212_v61, %v8220_v57  ;;  %v8474_v29 = vpop.f32.mrf.mxu2 }
 0x636   :  { %9508 = vst [vmem:[#allocation40_spill] sm:$0xff] %v8474_v29 }
 0x63a   :  { %v8452_v19 = vpop.f32.mrf.mxu0  ;;  %v8454_v40 = vpop.f32.mrf.mxu1 }
 0x63d   :  { %5284 = vmatmul.msk.f32.gmra.mxu0 %vm2863_vm4, %v7869_v20  ;;  %5299 = vmatmul.msk.f32.gmra.mxu1 %vm2863_vm4, %v7869_v20  ;;  %v8462_v52 = vpop.f32.mrf.mxu3  ;;  %v8488_v61 = vpop.f32.mrf.mxu2 }
 0x63e   :  { %9509 = vst [vmem:[#allocation85_spill] sm:$0xff] %v8488_v61 }
 0x642   :  { %v8464_v46 = vpop.f32.mrf.mxu0  ;;  %v8466_v56 = vpop.f32.mrf.mxu1 }
 0x645   :  { %5285 = vmatmul.msk.f32.gmra.mxu0 %vm2863_vm4, %v7883_v12  ;;  %5300 = vmatmul.msk.f32.gmra.mxu1 %vm2863_vm4, %v7883_v12  ;;  %v3569_v14 = vpop.f32.mrf.mxu3 }
 0x64a   :  { %v8476_v20 = vpop.f32.mrf.mxu0  ;;  %v3338_v1 = vpop.f32.mrf.mxu1 }
 0x64b   :  { %v3378_v37 = vadd.f32 %v3338_v1, %v3136_v58  ;;  %v8498_v58 = vpop.f32.mrf.mxu2 }
 0x64c   :  { %9510 = vst [vmem:[#allocation39_spill] sm:$0xff] %v8498_v58 }
 0x64d   :  { %5286 = vmatmul.msk.f32.gmra.mxu0 %vm2863_vm4, %v7897_v51  ;;  %5301 = vmatmul.msk.f32.gmra.mxu1 %vm2863_vm4, %v7897_v51  ;;  %v8482_v4 = vadd.f32 %v3569_v14, %v3378_v37 }
 0x652   :  { %v8484_v48 = vpop.f32.mrf.mxu0  ;;  %v8486_v12 = vpop.f32.mrf.mxu1 }
 0x655   :  { %5287 = vmatmul.msk.f32.gmra.mxu0 %vm2863_vm4, %v7911_v34  ;;  %5302 = vmatmul.msk.f32.gmra.mxu1 %vm2863_vm4, %v7911_v34  ;;  %v8512_v34 = vpop.f32.mrf.mxu2 }
 0x656   :  { %9511 = vst [vmem:[#allocation84_spill] sm:$0xff] %v8512_v34 }
 0x65a   :  { %v8494_v57 = vpop.f32.mrf.mxu0  ;;  %v8496_v1 = vpop.f32.mrf.mxu1 }
 0x65d   :  { %5288 = vmatmul.msk.f32.gmra.mxu0 %vm2863_vm4, %v7951_v32  ;;  %5303 = vmatmul.msk.f32.gmra.mxu1 %vm2863_vm4, %v7951_v32  ;;  %v8522_v32 = vpop.f32.mrf.mxu2 }
 0x662   :  { %v8504_v51 = vpop.f32.mrf.mxu0  ;;  %v8506_v37 = vpop.f32.mrf.mxu1 }
 0x665   :  { %5289 = vmatmul.msk.f32.gmra.mxu0 %vm2863_vm4, %v8019_v10  ;;  %5304 = vmatmul.msk.f32.gmra.mxu1 %vm2863_vm4, %v8019_v10 }
 0x66a   :  { %v8514_v14 = vpop.f32.mrf.mxu0  ;;  %v8516_v61 = vpop.f32.mrf.mxu1 }
 0x66b   :  { %9512 = vst [vmem:[#allocation35_spill] sm:$0xff] %v8514_v14  ;;  %v8536_v14 = vpop.f32.mrf.mxu2 }
 0x66c   :  { %9513 = vst [vmem:[#allocation80_spill] sm:$0xff] %v8516_v61 }
 0x66d   :  { %5290 = vmatmul.msk.f32.gmra.mxu0 %vm2863_vm4, %v8069_v17  ;;  %5305 = vmatmul.msk.f32.gmra.mxu1 %vm2863_vm4, %v8069_v17  ;;  %9518 = vst [vmem:[#allocation31_spill] sm:$0xff] %v8536_v14 }
 0x672   :  { %v8524_v58 = vpop.f32.mrf.mxu0  ;;  %v8526_v22 = vpop.f32.mrf.mxu1 }
 0x673   :  { %9514 = vst [vmem:[#allocation33_spill] sm:$0xff] %v8524_v58  ;;  %v3501_v58 = vpop.f32.mrf.mxu2 }
 0x674   :  { %9515 = vst [vmem:[#allocation78_spill] sm:$0xff] %v8526_v22 }
 0x675   :  { %5291 = vmatmul.msk.f32.gmra.mxu0 %vm2863_vm4, %v8099_v35  ;;  %5306 = vmatmul.msk.f32.gmra.mxu1 %vm2863_vm4, %v8099_v35 }
 0x67a   :  { %v8532_v10 = vpop.f32.mrf.mxu0  ;;  %v8534_v61 = vpop.f32.mrf.mxu1 }
 0x67b   :  { %9516 = vst [vmem:[#allocation37_spill] sm:$0xff] %v8532_v10 }
 0x67c   :  { %9517 = vst [vmem:[#allocation82_spill] sm:$0xff] %v8534_v61 }
 0x67d   :  { %5292 = vmatmul.msk.f32.gmra.mxu0 %vm2863_vm4, %v8125_v62  ;;  %5307 = vmatmul.msk.f32.gmra.mxu1 %vm2863_vm4, %v8125_v62  ;;  %v3504_v62 = vpop.f32.mrf.mxu2 }
 0x682   :  { %v8542_v17 = vpop.f32.mrf.mxu0  ;;  %v8544_v22 = vpop.f32.mrf.mxu1 }
 0x683   :  { %9519 = vst [vmem:[#allocation76_spill] sm:$0xff] %v8542_v17 }
 0x684   :  { %9520 = vst [vmem:[#allocation29_spill] sm:$0xff] %v8544_v22 }
 0x685   :  { %5293 = vmatmul.msk.f32.gmra.mxu0 %vm2863_vm4, %v8148_v9  ;;  %5308 = vmatmul.msk.f32.gmra.mxu1 %vm2863_vm4, %v8148_v9  ;;  %v3507_v17 = vpop.f32.mrf.mxu2  ;;  %v3068_v9 = vadd.f32 %v8282_v5, %v8176_v55 }
 0x68a   :  { %v8550_v35 = vpop.f32.mrf.mxu0  ;;  %v8552_v61 = vpop.f32.mrf.mxu1 }
 0x68b   :  { %9521 = vst [vmem:[#allocation74_spill] sm:$0xff] %v8550_v35  ;;  %v3371_v35 = vadd.f32 %v8440_v27, %v3068_v9 }
 0x68c   :  { %9522 = vst [vmem:[#allocation27_spill] sm:$0xff] %v8552_v61  ;;  %v3127_v61 = vadd.f32 %v8170_v13, %v8178_v18 }
 0x68d   :  { %5294 = vmatmul.msk.f32.gmra.mxu0 %vm2863_vm4, %v8135_v25  ;;  %5309 = vmatmul.msk.f32.gmra.mxu1 %vm2863_vm4, %v8135_v25  ;;  %v3602_v29 = vadd.f32 %v3501_v58, %v3371_v35  ;;  %v3510_v8 = vpop.f32.mrf.mxu2 }
 0x68e   :  { %v3372_v25 = vadd.f32 %v8442_v11, %v3127_v61 }
 0x692   :  { %v8558_v10 = vpop.f32.mrf.mxu0  ;;  %v8560_v22 = vpop.f32.mrf.mxu1 }
 0x693   :  { %9523 = vst [vmem:[#allocation72_spill] sm:$0xff] %v8558_v10  ;;  %v3603_v10 = vadd.f32 %v8434_v16, %v3372_v25 }
 0x694   :  { %9524 = vst [vmem:[#allocation25_spill] sm:$0xff] %v8560_v22 }
 0x69a   :  { %v8562_v14 = vpop.f32.mrf.mxu0  ;;  %v8564_v34 = vpop.f32.mrf.mxu1 }
 0x69b   :  { %9525 = vst [vmem:[#allocation70_spill] sm:$0xff] %v8562_v14  ;;  %v3071_v14 = vadd.f32 %v8322_v23, %v8190_v38  ;;  %v3074_v38 = vadd.f32 %v8368_v63, %v8204_v54  ;;  %v3077_v54 = vadd.f32 %v8390_v36, %v8218_v3 }
 0x69c   :  { %9526 = vst [vmem:[#allocation23_spill] sm:$0xff] %v8564_v34  ;;  %v3130_v34 = vadd.f32 %v8184_v31, %v8192_v24  ;;  %v3133_v31 = vadd.f32 %v8198_v21, %v8206_v60 }
 0x69d   :  { %v3373_v13 = vadd.f32 %v8452_v19, %v3071_v14  ;;  %v3513_v19 = vpop.f32.mrf.mxu2  ;;  %v3377_v60 = vadd.f32 %v8476_v20, %v3077_v54 }
 0x69e   :  { %v3374_v18 = vadd.f32 %v8454_v40, %v3130_v34  ;;  %v3572_v40 = vpop.f32.mrf.mxu3 }
 0x69f   :  { %v3604_v11 = vadd.f32 %v3504_v62, %v3373_v13 }
 0x6a0   :  { %v3605_v16 = vadd.f32 %v8450_v47, %v3374_v18 }
 0x6a2   :  { %v3731_v33 = vpop.f32.mrf.mxu0  ;;  %v3790_v22 = vpop.f32.mrf.mxu1 }
 0x6a3   :  { %v8577_v55 = vadd.f32 %v3731_v33, %v3602_v29  ;;  %v8579_v5 = vadd.f32 %v3790_v22, %v3603_v10  ;;  %v3375_v33 = vadd.f32 %v8464_v46, %v3074_v38  ;;  %v3376_v22 = vadd.f32 %v8466_v56, %v3133_v31 }
 0x6a4   :  { %v3608_v10 = vadd.f32 %v3510_v8, %v3377_v60  ;;  %v3086_v38 = vadd.f32 %v8444_v39, %v8268_v59 }
 0x6a5   :  { %9527 = vst [vmem:[#allocation68_spill] sm:$0xff] %v8577_v55  ;;  %v3606_v29 = vadd.f32 %v3507_v17, %v3375_v33  ;;  %v3607_v47 = vadd.f32 %v8462_v52, %v3376_v22  ;;  %v3516_v14 = vpop.f32.mrf.mxu2  ;;  %v3080_v17 = vadd.f32 %v8416_v6, %v8232_v2  ;;  %v3139_v52 = vadd.f32 %v8226_v0, %v8234_v7 }
 0x6a6   :  { %9528 = vst [vmem:[#allocation21_spill] sm:$0xff] %v8579_v5  ;;  %v3575_v46 = vpop.f32.mrf.mxu3  ;;  %v3083_v2 = vadd.f32 %v8432_v49, %v8246_v44  ;;  %v3142_v0 = vadd.f32 %v8240_v45, %v8248_v15  ;;  %v3145_v44 = vadd.f32 %v8254_v26, %v8270_v42  ;;  %v9554_v5 = vld [vmem:[#allocation74_spill] sm:$0xff] }
 0x6a7   :  { %v3379_v36 = vadd.f32 %v8484_v48, %v3080_v17  ;;  %v3380_v20 = vadd.f32 %v8486_v12, %v3139_v52 }
 0x6a8   :  { %v3381_v48 = vadd.f32 %v8494_v57, %v3083_v2  ;;  %v3382_v6 = vadd.f32 %v8496_v1, %v3142_v0  ;;  %v3383_v57 = vadd.f32 %v8504_v51, %v3086_v38  ;;  %v3384_v1 = vadd.f32 %v8506_v37, %v3145_v44  ;;  %v9536_v2 = vld [vmem:[#allocation90_spill] sm:$0xff]  ;;  %v9537_v0 = vld [vmem:[#allocation40_spill] sm:$0xff] }
 0x6a9   :  { %v3610_v8 = vadd.f32 %v3513_v19, %v3379_v36  ;;  %v3611_v13 = vadd.f32 %v3572_v40, %v3380_v20  ;;  %v9542_v44 = vld [vmem:[#allocation88_spill] sm:$0xff] }
 0x6aa   :  { %v3734_v27 = vpop.f32.mrf.mxu0  ;;  %v3793_v61 = vpop.f32.mrf.mxu1  ;;  %v3612_v12 = vadd.f32 %v3516_v14, %v3381_v48  ;;  %v3092_v48 = vadd.f32 %v9537_v0, %v9536_v2  ;;  %v9550_v2 = vld [vmem:[#allocation91_spill] sm:$0xff] }
 0x6ab   :  { %v8588_v24 = vadd.f32 %v3734_v27, %v3604_v11  ;;  %v8590_v23 = vadd.f32 %v3793_v61, %v3605_v16  ;;  %v3613_v16 = vadd.f32 %v3575_v46, %v3382_v6  ;;  %v9538_v6 = vld [vmem:[#allocation97_spill] sm:$0xff]  ;;  %v9551_v0 = vld [vmem:[#allocation39_spill] sm:$0xff] }
 0x6ad   :  { %9529 = vst [vmem:[#allocation66_spill] sm:$0xff] %v8588_v24  ;;  %v3519_v9 = vpop.f32.mrf.mxu2  ;;  %v9557_v24 = vld [vmem:[#allocation85_spill] sm:$0xff] }
 0x6ae   :  { %9530 = vst [vmem:[#allocation19_spill] sm:$0xff] %v8590_v23  ;;  %v3578_v25 = vpop.f32.mrf.mxu3  ;;  %v3614_v33 = vadd.f32 %v3519_v9, %v3383_v57  ;;  %v9556_v23 = vld [vmem:[#allocation46_spill] sm:$0xff] }
 0x6af   :  { %v3615_v22 = vadd.f32 %v3578_v25, %v3384_v1  ;;  %v3089_v25 = vadd.f32 %v8460_v53, %v8308_v43  ;;  %v9543_v43 = vld [vmem:[#allocation89_spill] sm:$0xff]  ;;  %v9545_v1 = vld [vmem:[#allocation31_spill] sm:$0xff] }
 0x6b0   :  { %v3160_v53 = vadd.f32 %v9543_v43, %v9542_v44  ;;  %v9555_v43 = vld [vmem:[#allocation27_spill] sm:$0xff] }
 0x6b2   :  { %v3737_v58 = vpop.f32.mrf.mxu0  ;;  %v3796_v34 = vpop.f32.mrf.mxu1  ;;  %v3394_v55 = vadd.f32 %v9555_v43, %v3160_v53  ;;  %v9567_v43 = vld [vmem:[#allocation78_spill] sm:$0xff] }
 0x6b3   :  { %v8597_v63 = vadd.f32 %v3737_v58, %v3606_v29  ;;  %v8599_v21 = vadd.f32 %v3796_v34, %v3607_v47 }
 0x6b5   :  { %9531 = vst [vmem:[#allocation64_spill] sm:$0xff] %v8597_v63  ;;  %v8627_v49 = vpop.f32.mrf.mxu2 }
 0x6b6   :  { %9532 = vst [vmem:[#allocation17_spill] sm:$0xff] %v8599_v21  ;;  %v8629_v45 = vpop.f32.mrf.mxu3  ;;  %v9559_v21 = vld [vmem:[#allocation95_spill] sm:$0xff] }
 0x6ba   :  { %v3740_v56 = vpop.f32.mrf.mxu0  ;;  %v3799_v35 = vpop.f32.mrf.mxu1 }
 0x6bb   :  { %v8606_v62 = vadd.f32 %v3740_v56, %v3608_v10  ;;  %v8609_v3 = vadd.f32 %v3799_v35, %v8482_v4 }
 0x6bd   :  { %9533 = vst [vmem:[#allocation62_spill] sm:$0xff] %v8606_v62  ;;  %v8641_v26 = vpop.f32.mrf.mxu2 }
 0x6be   :  { %9534 = vst [vmem:[#allocation15_spill] sm:$0xff] %v8609_v3  ;;  %v8643_v42 = vpop.f32.mrf.mxu3  ;;  %v9564_v3 = vld [vmem:[#allocation76_spill] sm:$0xff] }
 0x6c2   :  { %v3743_v18 = vpop.f32.mrf.mxu0  ;;  %v3802_v11 = vpop.f32.mrf.mxu1 }
 0x6c3   :  { %v8617_v7 = vadd.f32 %v3743_v18, %v3610_v8  ;;  %v8619_v4 = vadd.f32 %v3802_v11, %v3611_v13  ;;  %v3148_v8 = vadd.f32 %v8290_v50, %v8310_v28  ;;  %v3104_v13 = vadd.f32 %v8522_v32, %v8418_v30  ;;  %v9535_v18 = vld [vmem:[#allocation42_spill] sm:$0xff]  ;;  %v9544_v28 = vld [vmem:[#allocation41_spill] sm:$0xff] }
 0x6c4   :  { %v3163_v11 = vadd.f32 %v9535_v18, %v8420_v41  ;;  %v3107_v30 = vadd.f32 %v9545_v1, %v9544_v28  ;;  %v9546_v32 = vld [vmem:[#allocation86_spill] sm:$0xff]  ;;  %v3095_v28 = vadd.f32 %v9557_v24, %v9556_v23  ;;  %v9558_v1 = vld [vmem:[#allocation93_spill] sm:$0xff] }
 0x6c5   :  { %v8649_v58 = vpop.f32.mrf.mxu2  ;;  %v3860_v24 = vld [vmem:[%s9200_s6] sm:$0x3] }
 0x6c6   :  { %v8651_v51 = vpop.f32.mrf.mxu3 }
 0x6ca   :  { %v3746_v27 = vpop.f32.mrf.mxu0  ;;  %v3805_v61 = vpop.f32.mrf.mxu1 }
 0x6cb   :  { %v8631_v15 = vadd.f32 %v3746_v27, %v3612_v12  ;;  %v8633_v31 = vadd.f32 %v3805_v61, %v3613_v16  ;;  %v9539_v12 = vld [vmem:[#allocation98_spill] sm:$0xff]  ;;  %v9540_v27 = vld [vmem:[#allocation43_spill] sm:$0xff]  ;;  %v9541_v61 = vld [vmem:[#allocation84_spill] sm:$0xff] }
 0x6cc   :  { %v3151_v16 = vadd.f32 %v9539_v12, %v9538_v6  ;;  %v3101_v38 = vadd.f32 %v9541_v61, %v9540_v27  ;;  %v3098_v6 = vadd.f32 %v9551_v0, %v9550_v2  ;;  %v9552_v12 = vld [vmem:[#allocation44_spill] sm:$0xff]  ;;  %v9553_v27 = vld [vmem:[#allocation45_spill] sm:$0xff] }
 0x6cd   :  { %v3531_v54 = vpop.f32.mrf.mxu2  ;;  %v3157_v61 = vadd.f32 %v9553_v27, %v9552_v12  ;;  %v9563_v2 = vld [vmem:[#allocation80_spill] sm:$0xff]  ;;  %v9565_v27 = vld [vmem:[#allocation29_spill] sm:$0xff] }
 0x6ce   :  { %v3590_v60 = vpop.f32.mrf.mxu3  ;;  %v3393_v44 = vadd.f32 %v9554_v5, %v3101_v38  ;;  %v3386_v0 = vadd.f32 %v9563_v2, %v3148_v8  ;;  %v3391_v12 = vadd.f32 %v9564_v3, %v3098_v6  ;;  %v9566_v38 = vld [vmem:[#allocation33_spill] sm:$0xff]  ;;  %v3388_v62 = vadd.f32 %v9567_v43, %v3151_v16 }
 0x6cf   :  { %v3392_v5 = vadd.f32 %v9565_v27, %v3157_v61  ;;  %v3387_v53 = vadd.f32 %v9566_v38, %v3092_v48  ;;  %v8706_v2 = vperm.slane %v3860_v24, 0  ;;  %v8708_v16 = vperm.slane %v3860_v24, 1 }
 0x6d0   :  { %v3622_v27 = vadd.f32 %v3531_v54, %v3391_v12  ;;  %v3617_v12 = vadd.f32 %v8629_v45, %v3386_v0 }
 0x6d1   :  { %v3623_v38 = vadd.f32 %v3590_v60, %v3392_v5  ;;  %v3618_v60 = vadd.f32 %v8641_v26, %v3387_v53 }
 0x6d2   :  { %v3749_v19 = vpop.f32.mrf.mxu0  ;;  %v3808_v40 = vpop.f32.mrf.mxu1 }
 0x6d3   :  { %v8637_v59 = vadd.f32 %v3749_v19, %v3614_v33  ;;  %v8639_v39 = vadd.f32 %v3808_v40, %v3615_v22  ;;  %v9547_v33 = vld [vmem:[#allocation87_spill] sm:$0xff]  ;;  %v9548_v22 = vld [vmem:[#allocation72_spill] sm:$0xff]  ;;  %v9549_v40 = vld [vmem:[#allocation25_spill] sm:$0xff] }
 0x6d4   :  { %v3166_v41 = vadd.f32 %v9547_v33, %v9546_v32  ;;  %v3395_v19 = vadd.f32 %v9548_v22, %v3104_v13  ;;  %v3396_v18 = vadd.f32 %v9549_v40, %v3163_v11  ;;  %v3154_v32 = vadd.f32 %v9559_v21, %v9558_v1  ;;  %v9560_v33 = vld [vmem:[#allocation70_spill] sm:$0xff]  ;;  %v9561_v22 = vld [vmem:[#allocation23_spill] sm:$0xff] }
 0x6d5   :  { %v3534_v35 = vpop.f32.mrf.mxu2  ;;  %v3397_v13 = vadd.f32 %v9560_v33, %v3107_v30  ;;  %v9562_v40 = vld [vmem:[#allocation35_spill] sm:$0xff]  ;;  %v9568_v30 = vld [vmem:[#allocation37_spill] sm:$0xff]  ;;  %v9569_v1 = vld [vmem:[#allocation82_spill] sm:$0xff] }
 0x6d6   :  { %v3593_v17 = vpop.f32.mrf.mxu3  ;;  %v3398_v11 = vadd.f32 %v9561_v22, %v3166_v41  ;;  %v3385_v63 = vadd.f32 %v9562_v40, %v3089_v25  ;;  %v3389_v41 = vadd.f32 %v9568_v30, %v3095_v28  ;;  %v3390_v25 = vadd.f32 %v9569_v1, %v3154_v32 }
 0x6d7   :  { %v3624_v22 = vadd.f32 %v3534_v35, %v3393_v44  ;;  %v3625_v3 = vadd.f32 %v3593_v17, %v3394_v55  ;;  %v3878_v1 = vadd.f32 %v8706_v2, %v8637_v59  ;;  %v3874_v59 = vadd.f32 %v8706_v2, %v8617_v7 }
 0x6d8   :  { %v3620_v43 = vadd.f32 %v8649_v58, %v3389_v41  ;;  %v3621_v55 = vadd.f32 %v8651_v51, %v3390_v25  ;;  %v3879_v25 = vadd.f32 %v8708_v16, %v8639_v39  ;;  %v3875_v39 = vadd.f32 %v8708_v16, %v8619_v4 }
 0x6da   :  { %v8645_v29 = vpop.f32.mrf.mxu0  ;;  %v8647_v47 = vpop.f32.mrf.mxu1 }
 0x6dd   :  { %v3537_v20 = vpop.f32.mrf.mxu2 }
 0x6de   :  { %v3596_v9 = vpop.f32.mrf.mxu3  ;;  %v3626_v23 = vadd.f32 %v3537_v20, %v3395_v19 }
 0x6df   :  { %v3627_v21 = vadd.f32 %v3596_v9, %v3396_v18 }
 0x6e2   :  { %v8653_v37 = vpop.f32.mrf.mxu0  ;;  %v8655_v34 = vpop.f32.mrf.mxu1 }
 0x6e3   :  { %v3848_v5 = vadd.f32 %v8653_v37, %v3618_v60  ;;  %v9577_v60 = vld [vmem:[#allocation21_spill] sm:$0xff] }
 0x6e5   :  { %v3540_v33 = vpop.f32.mrf.mxu2  ;;  %v3882_v0 = vadd.f32 %v8706_v2, %v3848_v5  ;;  %v4025_v5 = vld [vmem:[%s9202_s8 + $0x60] sm:$0xff] }
 0x6e6   :  { %v3599_v8 = vpop.f32.mrf.mxu3  ;;  %v3628_v40 = vadd.f32 %v3540_v33, %v3397_v13 }
 0x6e7   :  { %v3629_v48 = vadd.f32 %v3599_v8, %v3398_v11  ;;  %v3616_v11 = vadd.f32 %v8627_v49, %v3385_v63  ;;  %v3847_v63 = vadd.f32 %v8647_v47, %v3617_v12  ;;  %v3910_v33 = vmax.f32 %v3882_v0, 0.0  ;;  %v4026_v12 = vld [vmem:[%s9202_s8 + $0x68] sm:$0xff]  ;;  %v3926_v0 = vld [vmem:[%s9201_s7 + $0x20] sm:$0xff] }
 0x6e9   :  { %v3846_v53 = vadd.f32 %v8645_v29, %v3616_v11  ;;  %v3881_v47 = vadd.f32 %v8708_v16, %v3847_v63  ;;  %v3922_v11 = vld [vmem:[%s9201_s7] sm:$0xff]  ;;  %v4020_v63 = vld [vmem:[%s9202_s8 + $0x38] sm:$0xff] }
 0x6ea   :  { %v8657_v14 = vpop.f32.mrf.mxu0  ;;  %v8659_v46 = vpop.f32.mrf.mxu1 }
 0x6eb   :  { %v3851_v58 = vadd.f32 %v8659_v46, %v3621_v55  ;;  %v3880_v29 = vadd.f32 %v8706_v2, %v3846_v53  ;;  %v3924_v53 = vld [vmem:[%s9201_s7 + $0x10] sm:$0xff] }
 0x6ed   :  { %v3885_v45 = vadd.f32 %v8708_v16, %v3851_v58 }
 0x6ef   :  { %v3913_v41 = vmax.f32 %v3885_v45, 0.0  ;;  %v4018_v45 = vld [vmem:[%s9202_s8 + $0x28] sm:$0xff] }
 0x6f2   :  { %v3761_v10 = vpop.f32.mrf.mxu0  ;;  %v3820_v56 = vpop.f32.mrf.mxu1 }
 0x6f3   :  { %v3852_v35 = vadd.f32 %v3761_v10, %v3622_v27  ;;  %v3853_v17 = vadd.f32 %v3820_v56, %v3623_v38  ;;  %v9570_v27 = vld [vmem:[#allocation62_spill] sm:$0xff]  ;;  %v9571_v38 = vld [vmem:[#allocation15_spill] sm:$0xff] }
 0x6fa   :  { %v3764_v52 = vpop.f32.mrf.mxu0  ;;  %v3823_v36 = vpop.f32.mrf.mxu1 }
 0x6fb   :  { %v3854_v19 = vadd.f32 %v3764_v52, %v3624_v22  ;;  %v3855_v18 = vadd.f32 %v3823_v36, %v3625_v3  ;;  %v3619_v52 = vadd.f32 %v8643_v42, %v3388_v62  ;;  %v3850_v36 = vadd.f32 %v8657_v14, %v3620_v43  ;;  %v9574_v43 = vld [vmem:[#allocation66_spill] sm:$0xff] }
 0x6fc   :  { %v3886_v62 = vadd.f32 %v8706_v2, %v3852_v35  ;;  %v3887_v42 = vadd.f32 %v8708_v16, %v3853_v17  ;;  %v3876_v22 = vadd.f32 %v8706_v2, %v8631_v15  ;;  %v3877_v3 = vadd.f32 %v8708_v16, %v8633_v31  ;;  %v9575_v35 = vld [vmem:[#allocation19_spill] sm:$0xff] }
 0x6fd   :  { %v3888_v51 = vadd.f32 %v8706_v2, %v3854_v19  ;;  %v3889_v10 = vadd.f32 %v8708_v16, %v3855_v18  ;;  %v3849_v26 = vadd.f32 %v8655_v34, %v3619_v52  ;;  %v3884_v49 = vadd.f32 %v8706_v2, %v3850_v36  ;;  %v9572_v19 = vld [vmem:[#allocation64_spill] sm:$0xff]  ;;  %v9573_v18 = vld [vmem:[#allocation17_spill] sm:$0xff] }
 0x6fe   :  { %v3872_v15 = vadd.f32 %v8706_v2, %v9570_v27  ;;  %v3873_v31 = vadd.f32 %v8708_v16, %v9571_v38  ;;  %v3870_v7 = vadd.f32 %v8706_v2, %v9572_v19  ;;  %v3871_v4 = vadd.f32 %v8708_v16, %v9573_v18 }
 0x6ff   :  { %v3916_v37 = vmax.f32 %v3888_v51, 0.0  ;;  %v3917_v34 = vmax.f32 %v3889_v10, 0.0  ;;  %v3883_v24 = vadd.f32 %v8708_v16, %v3849_v26  ;;  %v3912_v30 = vmax.f32 %v3884_v49, 0.0  ;;  %v3923_v26 = vld [vmem:[%s9201_s7 + $0x8] sm:$0xff]  ;;  %v4019_v49 = vld [vmem:[%s9202_s8 + $0x30] sm:$0xff] }
 0x700   :  { %v3868_v55 = vadd.f32 %v8706_v2, %v9574_v43  ;;  %v3869_v17 = vadd.f32 %v8708_v16, %v9575_v35  ;;  %v3867_v52 = vadd.f32 %v8708_v16, %v9577_v60  ;;  %v3898_v36 = vmax.f32 %v3870_v7, 0.0  ;;  %v4113_v35 = vld [vmem:[%s9203_s9] sm:$0xff]  ;;  %v4170_v60 = vld [vmem:[%s9204_s10 + $0x28] sm:$0xff] }
 0x701   :  { %v3911_v8 = vmax.f32 %v3883_v24, 0.0  ;;  %v3899_v58 = vmax.f32 %v3871_v4, 0.0  ;;  %v4016_v24 = vld [vmem:[%s9202_s8 + $0x18] sm:$0xff] }
 0x702   :  { %v3767_v57 = vpop.f32.mrf.mxu0  ;;  %v3826_v50 = vpop.f32.mrf.mxu1  ;;  %v3896_v51 = vmax.f32 %v3868_v55, 0.0  ;;  %v3897_v10 = vmax.f32 %v3869_v17, 0.0  ;;  %v4174_v17 = vld [vmem:[%s9204_s10 + $0x48] sm:$0xff] }
 0x703   :  { %v3856_v6 = vadd.f32 %v3767_v57, %v3626_v23  ;;  %v3857_v61 = vadd.f32 %v3826_v50, %v3627_v21  ;;  %v3914_v23 = vmax.f32 %v3886_v62, 0.0  ;;  %v3915_v21 = vmax.f32 %v3887_v42, 0.0  ;;  %v4024_v62 = vld [vmem:[%s9202_s8 + $0x58] sm:$0xff]  ;;  %v4023_v42 = vld [vmem:[%s9202_s8 + $0x50] sm:$0xff] }
 0x705   :  { %v3890_v57 = vadd.f32 %v8706_v2, %v3856_v6  ;;  %v3891_v50 = vadd.f32 %v8708_v16, %v3857_v61  ;;  %v3908_v6 = vmax.f32 %v3880_v29, 0.0  ;;  %v3909_v61 = vmax.f32 %v3881_v47, 0.0  ;;  %v4031_v29 = vld [vmem:[%s9202_s8 + $0x90] sm:$0xff]  ;;  %v4014_v47 = vld [vmem:[%s9202_s8 + $0x8] sm:$0xff] }
 0x707   :  { %v3918_v14 = vmax.f32 %v3890_v57, 0.0  ;;  %v3919_v46 = vmax.f32 %v3891_v50, 0.0  ;;  %v3900_v57 = vmax.f32 %v3872_v15, 0.0  ;;  %v3901_v50 = vmax.f32 %v3873_v31, 0.0 }
 0x70a   :  { %v3770_v20 = vpop.f32.mrf.mxu0  ;;  %v3829_v9 = vpop.f32.mrf.mxu1 }
 0x70b   :  { %v3858_v28 = vadd.f32 %v3770_v20, %v3628_v40  ;;  %v3859_v32 = vadd.f32 %v3829_v9, %v3629_v48  ;;  %v3906_v40 = vmax.f32 %v3878_v1, 0.0  ;;  %v3907_v48 = vmax.f32 %v3879_v25, 0.0  ;;  %v4029_v1 = vld [vmem:[%s9202_s8 + $0x80] sm:$0xff] }
 0x70c   :  { %v3904_v20 = vmax.f32 %v3876_v22, 0.0  ;;  %v3905_v9 = vmax.f32 %v3877_v3, 0.0 }
 0x70d   :  { %v3892_v44 = vadd.f32 %v8706_v2, %v3858_v28  ;;  %v3893_v54 = vadd.f32 %v8708_v16, %v3859_v32  ;;  %v3902_v28 = vmax.f32 %v3874_v59, 0.0  ;;  %v3903_v32 = vmax.f32 %v3875_v39, 0.0  ;;  %v4027_v16 = vld [vmem:[%s9202_s8 + $0x70] sm:$0xff] }
 0x70f   :  { %v3920_v56 = vmax.f32 %v3892_v44, 0.0  ;;  %v3921_v13 = vmax.f32 %v3893_v54, 0.0  ;;  %v9576_v44 = vld [vmem:[#allocation68_spill] sm:$0xff] }
 0x710   :  { %v3866_v54 = vadd.f32 %v8706_v2, %v9576_v44  ;;  %v4028_v2 = vld [vmem:[%s9202_s8 + $0x78] sm:$0xff]  ;;  %v4171_v44 = vld [vmem:[%s9204_s10 + $0x30] sm:$0xff] }
 0x711   :  { %5310 = vmatpush.msk.msrb.mxu2 %vm2351_vm1, %v3920_v56  ;;  %5316 = vmatpush.msk.msrb.mxu3 %vm2351_vm1, %v3921_v13  ;;  %v3895_v13 = vmax.f32 %v3867_v52, 0.0  ;;  %v4169_v52 = vld [vmem:[%s9204_s10 + $0x20] sm:$0xff] }
 0x712   :  { %v3894_v56 = vmax.f32 %v3866_v54, 0.0  ;;  %4049 = vmatpush.msra.mxu0 %v4028_v2  ;;  %v4114_v54 = vld [vmem:[%s9203_s9 + $0x8] sm:$0xff] }
 0x713   :  { %3952 = vmatpush.msrb.mxu2 %v3918_v14  ;;  %3984 = vmatpush.msrb.mxu3 %v3919_v46  ;;  %v4022_v14 = vld [vmem:[%s9202_s8 + $0x48] sm:$0xff]  ;;  %v4021_v46 = vld [vmem:[%s9202_s8 + $0x40] sm:$0xff] }
 0x714   :  { %4050 = vmatpush.msra.mxu0 %v4027_v16 }
 0x715   :  { %3953 = vmatpush.msrb.mxu2 %v3916_v37  ;;  %3985 = vmatpush.msrb.mxu3 %v3917_v34  ;;  %v4017_v37 = vld [vmem:[%s9202_s8 + $0x20] sm:$0xff]  ;;  %v3925_v34 = vld [vmem:[%s9201_s7 + $0x18] sm:$0xff] }
 0x716   :  { %4051 = vmatpush.msra.mxu0 %v4026_v12 }
 0x717   :  { %3954 = vmatpush.msrb.mxu2 %v3914_v23  ;;  %3986 = vmatpush.msrb.mxu3 %v3915_v21  ;;  %v4032_v23 = vld [vmem:[%s9202_s8 + $0x98] sm:$0xff]  ;;  %v4015_v21 = vld [vmem:[%s9202_s8 + $0x10] sm:$0xff] }
 0x718   :  { %4052 = vmatpush.msra.mxu0 %v4025_v5  ;;  %4093 = vmatpush.msra.mxu1 %v4032_v23 }
 0x719   :  { %3955 = vmatpush.msrb.mxu2 %v3912_v30  ;;  %3987 = vmatpush.msrb.mxu3 %v3913_v41  ;;  %v4030_v30 = vld [vmem:[%s9202_s8 + $0x88] sm:$0xff]  ;;  %v4013_v41 = vld [vmem:[%s9202_s8] sm:$0xff] }
 0x71a   :  { %4053 = vmatpush.msra.mxu0 %v4024_v62  ;;  %4094 = vmatpush.msra.mxu1 %v4031_v29  ;;  %v5349_v62 = vld [vmem:[%s9205_s12 + $0x98] sm:$0xff] }
 0x71b   :  { %3956 = vmatpush.msrb.mxu2 %v3910_v33  ;;  %3988 = vmatpush.msrb.mxu3 %v3911_v8 }
 0x71c   :  { %4054 = vmatpush.msra.mxu0 %v4023_v42  ;;  %4095 = vmatpush.msra.mxu1 %v4030_v30  ;;  %v4256_v42 = vld [vmem:[%s9205_s12 + $0x48] sm:$0xff] }
 0x71d   :  { %3957 = vmatpush.msrb.mxu2 %v3908_v6  ;;  %3989 = vmatpush.msrb.mxu3 %v3909_v61 }
 0x71e   :  { %4055 = vmatpush.msra.mxu0 %v4022_v14  ;;  %4096 = vmatpush.msra.mxu1 %v4029_v1  ;;  %v5348_v14 = vld [vmem:[%s9205_s12 + $0x90] sm:$0xff] }
 0x71f   :  { %3958 = vmatpush.msrb.mxu2 %v3906_v40  ;;  %3990 = vmatpush.msrb.mxu3 %v3907_v48 }
 0x720   :  { %4056 = vmatpush.msra.mxu0 %v4021_v46  ;;  %v4255_v46 = vld [vmem:[%s9205_s12 + $0x40] sm:$0xff] }
 0x721   :  { %3959 = vmatpush.msrb.mxu2 %v3904_v20  ;;  %3991 = vmatpush.msrb.mxu3 %v3905_v9 }
 0x722   :  { %4057 = vmatpush.msra.mxu0 %v4020_v63  ;;  %v4254_v63 = vld [vmem:[%s9205_s12 + $0x38] sm:$0xff] }
 0x723   :  { %3960 = vmatpush.msrb.mxu2 %v3902_v28  ;;  %3992 = vmatpush.msrb.mxu3 %v3903_v32 }
 0x724   :  { %4058 = vmatpush.msra.mxu0 %v4019_v49  ;;  %v5346_v49 = vld [vmem:[%s9205_s12 + $0x80] sm:$0xff] }
 0x725   :  { %3961 = vmatpush.msrb.mxu2 %v3900_v57  ;;  %3993 = vmatpush.msrb.mxu3 %v3901_v50  ;;  %v4173_v57 = vld [vmem:[%s9204_s10 + $0x40] sm:$0xff]  ;;  %v4172_v50 = vld [vmem:[%s9204_s10 + $0x38] sm:$0xff] }
 0x726   :  { %4059 = vmatpush.msra.mxu0 %v4018_v45  ;;  %v4253_v45 = vld [vmem:[%s9205_s12 + $0x30] sm:$0xff] }
 0x727   :  { %3962 = vmatpush.msrb.mxu2 %v3898_v36  ;;  %3994 = vmatpush.msrb.mxu3 %v3899_v58  ;;  %v4168_v36 = vld [vmem:[%s9204_s10 + $0x18] sm:$0xff]  ;;  %v4167_v58 = vld [vmem:[%s9204_s10 + $0x10] sm:$0xff] }
 0x728   :  { %4060 = vmatpush.msra.mxu0 %v4017_v37  ;;  %v5345_v37 = vld [vmem:[%s9205_s12 + $0x78] sm:$0xff] }
 0x729   :  { %3963 = vmatpush.msrb.mxu2 %v3896_v51  ;;  %3995 = vmatpush.msrb.mxu3 %v3897_v10  ;;  %v4115_v51 = vld [vmem:[%s9203_s9 + $0x10] sm:$0xff]  ;;  %v4166_v10 = vld [vmem:[%s9204_s10 + $0x8] sm:$0xff] }
 0x72a   :  { %4061 = vmatpush.msra.mxu0 %v4016_v24  ;;  %v4251_v24 = vld [vmem:[%s9205_s12 + $0x20] sm:$0xff] }
 0x72b   :  { %3964 = vmatpush.msrb.mxu2 %v3894_v56  ;;  %3996 = vmatpush.msrb.mxu3 %v3895_v13  ;;  %v4116_v56 = vld [vmem:[%s9203_s9 + $0x18] sm:$0xff]  ;;  %v4117_v13 = vld [vmem:[%s9203_s9 + $0x20] sm:$0xff] }
 0x72c   :  { %5317 = vmatmul.msk.f32.vlgmr.msrb.gmra.mxu3 %vm3927_vm8, %v3922_v11  ;;  %5311 = vmatmul.msk.f32.vlgmr.msrb.gmra.mxu2 %vm3927_vm8, %v3922_v11  ;;  %v4165_v11 = vld [vmem:[%s9204_s10] sm:$0xff] }
 0x72d   :  { %5391 = vmatpush.msra.mxu2 %v4032_v23  ;;  %4062 = vmatpush.msra.mxu0 %v4015_v21  ;;  %v5343_v23 = vld [vmem:[%s9205_s12 + $0x68] sm:$0xff]  ;;  %v4250_v21 = vld [vmem:[%s9205_s12 + $0x18] sm:$0xff] }
 0x72e   :  { %4197 = vmatpush.msra.mxu3 %v4174_v17  ;;  %v5371_v17 = vld [vmem:[%s9205_s12 + $0x110] sm:$0xff] }
 0x72f   :  { %5392 = vmatpush.msra.mxu2 %v4031_v29  ;;  %4063 = vmatpush.msra.mxu0 %v4014_v47  ;;  %v5342_v29 = vld [vmem:[%s9205_s12 + $0x60] sm:$0xff]  ;;  %v4249_v47 = vld [vmem:[%s9205_s12 + $0x10] sm:$0xff] }
 0x730   :  { %4198 = vmatpush.msra.mxu3 %v4173_v57  ;;  %v5385_v57 = vld [vmem:[%s9205_s12 + $0x168] sm:$0xff] }
 0x731   :  { %5393 = vmatpush.msra.mxu2 %v4030_v30  ;;  %4064 = vmatpush.msra.mxu0 %v4013_v41  ;;  %v5341_v30 = vld [vmem:[%s9205_s12 + $0x58] sm:$0xff]  ;;  %v4248_v41 = vld [vmem:[%s9205_s12 + $0x8] sm:$0xff] }
 0x732   :  { %4199 = vmatpush.msra.mxu3 %v4172_v50  ;;  %v5359_v50 = vld [vmem:[%s9205_s12 + $0xc8] sm:$0xff] }
 0x733   :  { %5394 = vmatpush.msra.mxu2 %v4029_v1 }
 0x734   :  { %5318 = vmatmul.msk.f32.gmra.mxu3 %vm3927_vm8, %v3923_v26  ;;  %5312 = vmatmul.msk.f32.gmra.mxu2 %vm3927_vm8, %v3923_v26 }
 0x735   :  { %4200 = vmatpush.msra.mxu3 %v4171_v44  ;;  %v5370_v44 = vld [vmem:[%s9205_s12 + $0x108] sm:$0xff] }
 0x737   :  { %4201 = vmatpush.msra.mxu3 %v4170_v60  ;;  %v5358_v60 = vld [vmem:[%s9205_s12 + $0xc0] sm:$0xff] }
 0x739   :  { %4202 = vmatpush.msra.mxu3 %v4169_v52  ;;  %v5369_v52 = vld [vmem:[%s9205_s12 + $0x100] sm:$0xff] }
 0x73b   :  { %4203 = vmatpush.msra.mxu3 %v4168_v36  ;;  %v5383_v36 = vld [vmem:[%s9205_s12 + $0x158] sm:$0xff] }
 0x73c   :  { %5319 = vmatmul.msk.f32.gmra.mxu3 %vm3927_vm8, %v3924_v53  ;;  %5313 = vmatmul.msk.f32.gmra.mxu2 %vm3927_vm8, %v3924_v53  ;;  %v5347_v53 = vld [vmem:[%s9205_s12 + $0x88] sm:$0xff] }
 0x73d   :  { %4204 = vmatpush.msra.mxu3 %v4167_v58  ;;  %v5357_v58 = vld [vmem:[%s9205_s12 + $0xb8] sm:$0xff] }
 0x73f   :  { %4205 = vmatpush.msra.mxu3 %v4166_v10  ;;  %v5382_v10 = vld [vmem:[%s9205_s12 + $0x150] sm:$0xff] }
 0x741   :  { %4206 = vmatpush.msra.mxu3 %v4165_v11  ;;  %v5381_v11 = vld [vmem:[%s9205_s12 + $0x148] sm:$0xff] }
 0x743   :  { %4325 = vmatpush.msrb.mxu3 %v4256_v42  ;;  %v4538_v42 = vld [vmem:[%s9207_s14 + $0x68] sm:$0xff] }
 0x744   :  { %5320 = vmatmul.msk.f32.gmra.mxu3 %vm3927_vm8, %v3925_v34  ;;  %5314 = vmatmul.msk.f32.gmra.mxu2 %vm3927_vm8, %v3925_v34  ;;  %v4252_v34 = vld [vmem:[%s9205_s12 + $0x28] sm:$0xff] }
 0x745   :  { %4326 = vmatpush.msrb.mxu3 %v4255_v46  ;;  %v4536_v46 = vld [vmem:[%s9207_s14 + $0x58] sm:$0xff] }
 0x747   :  { %4327 = vmatpush.msrb.mxu3 %v4254_v63  ;;  %v4534_v63 = vld [vmem:[%s9207_s14 + $0x48] sm:$0xff] }
 0x749   :  { %4328 = vmatpush.msrb.mxu3 %v4253_v45  ;;  %v4532_v45 = vld [vmem:[%s9207_s14 + $0x38] sm:$0xff] }
 0x74b   :  { %4329 = vmatpush.msrb.mxu3 %v4252_v34 }
 0x74c   :  { %5321 = vmatmul.msk.f32.gmra.mxu3 %vm3927_vm8, %v3926_v0  ;;  %5315 = vmatmul.msk.f32.gmra.mxu2 %vm3927_vm8, %v3926_v0  ;;  %v5344_v0 = vld [vmem:[%s9205_s12 + $0x70] sm:$0xff] }
 0x74d   :  { %4330 = vmatpush.msrb.mxu3 %v4251_v24 }
 0x74f   :  { %4331 = vmatpush.msrb.mxu3 %v4250_v21 }
 0x751   :  { %4332 = vmatpush.msrb.mxu3 %v4249_v47  ;;  %v4529_v47 = vld [vmem:[%s9207_s14 + $0x20] sm:$0xff] }
 0x753   :  { %4333 = vmatpush.msrb.mxu3 %v4248_v41  ;;  %v4527_v41 = vld [vmem:[%s9207_s14 + $0x10] sm:$0xff] }
 0x7af   :  { %v3998_v25 = vpop.f32.mrf.mxu3  ;;  %v3966_v33 = vpop.f32.mrf.mxu2 }
 0x7b0   :  { %4065 = vmatmul.f32.vlgmr.msra.gmra.mxu0 %v3966_v33  ;;  %5322 = vmatmul.msk.f32.vlgmr.msra.gmra.mxu1 %vm4033_vm9, %v3998_v25  ;;  %v5340_v25 = vld [vmem:[%s9205_s12 + $0x50] sm:$0xff]  ;;  %v4247_v33 = vld [vmem:[%s9205_s12] sm:$0xff] }
 0x7b1   :  { %4334 = vmatpush.msrb.mxu3 %v4247_v33  ;;  %v4581_v33 = vld [vmem:[%s9210_s16 + $0x78] sm:$0xff] }
 0x7b7   :  { %v4001_v8 = vpop.f32.mrf.mxu3  ;;  %v3969_v22 = vpop.f32.mrf.mxu2 }
 0x7b8   :  { %4068 = vmatmul.f32.gmra.mxu0 %v3969_v22  ;;  %5323 = vmatmul.msk.f32.gmra.mxu1 %vm4033_vm9, %v4001_v8 }
 0x7bf   :  { %v4004_v3 = vpop.f32.mrf.mxu3  ;;  %v3972_v6 = vpop.f32.mrf.mxu2 }
 0x7c0   :  { %4071 = vmatmul.f32.gmra.mxu0 %v3972_v6  ;;  %5324 = vmatmul.msk.f32.gmra.mxu1 %vm4033_vm9, %v4004_v3 }
 0x7c7   :  { %v4007_v61 = vpop.f32.mrf.mxu3  ;;  %v3975_v59 = vpop.f32.mrf.mxu2 }
 0x7c8   :  { %4074 = vmatmul.f32.gmra.mxu0 %v3975_v59  ;;  %5325 = vmatmul.msk.f32.gmra.mxu1 %vm4033_vm9, %v4007_v61  ;;  %v5338_v61 = vld [vmem:[%s9206_s11 + $0x8] sm:$0xff]  ;;  %v4223_v59 = vld [vmem:[%s9206_s11] sm:$0xff] }
 0x7cf   :  { %v4010_v39 = vpop.f32.mrf.mxu3  ;;  %v3978_v40 = vpop.f32.mrf.mxu2 }
 0x7d0   :  { %5326 = vmatmul.msk.f32.vlgmr.msra.gmra.mxu2 %vm4033_vm9, %v4010_v39  ;;  %4077 = vmatmul.f32.gmra.mxu0 %v3978_v40  ;;  %v5378_v39 = vld [vmem:[%s9206_s11 + $0x20] sm:$0xff]  ;;  %v5363_v40 = vld [vmem:[%s9205_s12 + $0xe8] sm:$0xff] }
 0x82d   :  { %v4066_v48 = vpop.f32.mrf.mxu0  ;;  %v4098_v15 = vpop.f32.mrf.mxu1 }
 0x82e   :  { %v4099_v55 = vadd.f32 %v4098_v15, %v4066_v48  ;;  %v5362_v48 = vld [vmem:[%s9205_s12 + $0xe0] sm:$0xff]  ;;  %v5376_v15 = vld [vmem:[%s9205_s12 + $0x138] sm:$0xff] }
 0x835   :  { %v4069_v27 = vpop.f32.mrf.mxu0  ;;  %v4101_v31 = vpop.f32.mrf.mxu1 }
 0x836   :  { %v4102_v43 = vadd.f32 %v4101_v31, %v4069_v27  ;;  %v5361_v27 = vld [vmem:[%s9205_s12 + $0xd8] sm:$0xff] }
 0x83d   :  { %v4072_v38 = vpop.f32.mrf.mxu0  ;;  %v4104_v9 = vpop.f32.mrf.mxu1 }
 0x83e   :  { %v4105_v32 = vadd.f32 %v4104_v9, %v4072_v38  ;;  %v5389_v38 = vld [vmem:[%s9205_s12 + $0x188] sm:$0xff]  ;;  %v5375_v9 = vld [vmem:[%s9205_s12 + $0x130] sm:$0xff] }
 0x845   :  { %v4075_v20 = vpop.f32.mrf.mxu0  ;;  %v4107_v18 = vpop.f32.mrf.mxu1 }
 0x846   :  { %v4108_v28 = vadd.f32 %v4107_v18, %v4075_v20  ;;  %v5387_v18 = vld [vmem:[%s9205_s12 + $0x178] sm:$0xff] }
 0x84d   :  { %v4078_v19 = vpop.f32.mrf.mxu0 }
 0x853   :  { %v4110_v7 = vpop.f32.mrf.mxu2 }
 0x854   :  { %v4111_v4 = vadd.f32 %v4110_v7, %v4078_v19  ;;  %v5388_v19 = vld [vmem:[%s9205_s12 + $0x180] sm:$0xff]  ;;  %v5374_v7 = vld [vmem:[%s9205_s12 + $0x128] sm:$0xff] }
 0x856   :  { %4144 = vmatpush.msrb.mxu2 %v4111_v4  ;;  %v5373_v4 = vld [vmem:[%s9205_s12 + $0x120] sm:$0xff] }
 0x858   :  { %4145 = vmatpush.msrb.mxu2 %v4108_v28  ;;  %v5386_v28 = vld [vmem:[%s9205_s12 + $0x170] sm:$0xff] }
 0x85a   :  { %4146 = vmatpush.msrb.mxu2 %v4105_v32  ;;  %v5365_v32 = vld [vmem:[%s9206_s11 + $0x18] sm:$0xff] }
 0x85c   :  { %4147 = vmatpush.msrb.mxu2 %v4102_v43  ;;  %v5352_v43 = vld [vmem:[%s9206_s11 + $0x10] sm:$0xff] }
 0x85e   :  { %4148 = vmatpush.msrb.mxu2 %v4099_v55  ;;  %v5372_v55 = vld [vmem:[%s9205_s12 + $0x118] sm:$0xff] }
 0x85f   :  { %5327 = vmatmul.msk.f32.vlgmr.msrb.gmra.mxu2 %vm2615_vm3, %v4113_v35  ;;  %v5360_v35 = vld [vmem:[%s9205_s12 + $0xd0] sm:$0xff] }
 0x860   :  { %4302 = vmatpush.msra.mxu2 %v5349_v62  ;;  %v4539_v62 = vld [vmem:[%s9207_s14 + $0x70] sm:$0xff] }
 0x862   :  { %4303 = vmatpush.msra.mxu2 %v5348_v14  ;;  %v4537_v14 = vld [vmem:[%s9207_s14 + $0x60] sm:$0xff] }
 0x864   :  { %4304 = vmatpush.msra.mxu2 %v5347_v53  ;;  %v4535_v53 = vld [vmem:[%s9207_s14 + $0x50] sm:$0xff] }
 0x866   :  { %4305 = vmatpush.msra.mxu2 %v5346_v49  ;;  %v4533_v49 = vld [vmem:[%s9207_s14 + $0x40] sm:$0xff] }
 0x867   :  { %5328 = vmatmul.msk.f32.gmra.mxu2 %vm2615_vm3, %v4114_v54  ;;  %v5384_v54 = vld [vmem:[%s9205_s12 + $0x160] sm:$0xff] }
 0x868   :  { %4306 = vmatpush.msra.mxu2 %v5345_v37  ;;  %v4531_v37 = vld [vmem:[%s9207_s14 + $0x30] sm:$0xff] }
 0x86a   :  { %4307 = vmatpush.msra.mxu2 %v5344_v0 }
 0x86c   :  { %4308 = vmatpush.msra.mxu2 %v5343_v23 }
 0x86e   :  { %4309 = vmatpush.msra.mxu2 %v5342_v29  ;;  %v4530_v29 = vld [vmem:[%s9207_s14 + $0x28] sm:$0xff] }
 0x86f   :  { %5329 = vmatmul.msk.f32.gmra.mxu2 %vm2615_vm3, %v4115_v51  ;;  %v5368_v51 = vld [vmem:[%s9205_s12 + $0xf8] sm:$0xff] }
 0x870   :  { %4310 = vmatpush.msra.mxu2 %v5341_v30  ;;  %v4528_v30 = vld [vmem:[%s9207_s14 + $0x18] sm:$0xff] }
 0x872   :  { %4311 = vmatpush.msra.mxu2 %v5340_v25  ;;  %v4525_v25 = vld [vmem:[%s9207_s14] sm:$0xff] }
 0x877   :  { %5330 = vmatmul.msk.f32.gmra.mxu2 %vm2615_vm3, %v4116_v56  ;;  %v5356_v56 = vld [vmem:[%s9205_s12 + $0xb0] sm:$0xff] }
 0x87f   :  { %5331 = vmatmul.msk.f32.gmra.mxu2 %vm2615_vm3, %v4117_v13  ;;  %v5367_v13 = vld [vmem:[%s9205_s12 + $0xf0] sm:$0xff] }
 0x8e2   :  { %v4150_v2 = vpop.f32.mrf.mxu2 }
 0x8e3   :  { %5332 = vmatmul.msk.f32.vlgmr.msra.gmra.mxu3 %vm4175_vm10, %v4150_v2  ;;  %v5355_v2 = vld [vmem:[%s9205_s12 + $0xa8] sm:$0xff] }
 0x8ea   :  { %v4153_v16 = vpop.f32.mrf.mxu2 }
 0x8eb   :  { %5333 = vmatmul.msk.f32.gmra.mxu3 %vm4175_vm10, %v4153_v16 }
 0x8f2   :  { %v4156_v12 = vpop.f32.mrf.mxu2 }
 0x8f3   :  { %5334 = vmatmul.msk.f32.gmra.mxu3 %vm4175_vm10, %v4156_v12  ;;  %v5380_v12 = vld [vmem:[%s9205_s12 + $0x140] sm:$0xff] }
 0x8fa   :  { %v4159_v5 = vpop.f32.mrf.mxu2 }
 0x8fb   :  { %5335 = vmatmul.msk.f32.gmra.mxu3 %vm4175_vm10, %v4159_v5  ;;  %v5354_v5 = vld [vmem:[%s9205_s12 + $0xa0] sm:$0xff] }
 0x902   :  { %v4162_v26 = vpop.f32.mrf.mxu2 }
 0x903   :  { %5336 = vmatmul.msk.f32.gmra.mxu3 %vm4175_vm10, %v4162_v26  ;;  %v4540_v26 = vld [vmem:[%s9207_s14 + $0x78] sm:$0xff] }
 0x966   :  { %v4208_v1 = vpop.f32.mrf.mxu3 }
 0x96e   :  { %v4211_v8 = vpop.f32.mrf.mxu3 }
 0x976   :  { %v4214_v22 = vpop.f32.mrf.mxu3 }
 0x97e   :  { %v4217_v3 = vpop.f32.mrf.mxu3 }
 0x986   :  { %v4220_v6 = vpop.f32.mrf.mxu3 }
 0x987   :  { %4273 = vmatpush.msrb.mxu1 %v4220_v6  ;;  %4238 = vmatpush.msrb.mxu0 %v4220_v6 }
 0x988   :  { %4355 = vmatpush.msra.mxu3 %v4220_v6  ;;  %4415 = vmatpush.msrb.mxu2 %v4220_v6 }
 0x989   :  { %4274 = vmatpush.msrb.mxu1 %v4217_v3  ;;  %4239 = vmatpush.msrb.mxu0 %v4217_v3 }
 0x98a   :  { %4356 = vmatpush.msra.mxu3 %v4217_v3  ;;  %4416 = vmatpush.msrb.mxu2 %v4217_v3 }
 0x98b   :  { %4275 = vmatpush.msrb.mxu1 %v4214_v22  ;;  %4240 = vmatpush.msrb.mxu0 %v4214_v22 }
 0x98c   :  { %4357 = vmatpush.msra.mxu3 %v4214_v22  ;;  %4417 = vmatpush.msrb.mxu2 %v4214_v22 }
 0x98d   :  { %4276 = vmatpush.msrb.mxu1 %v4211_v8  ;;  %4241 = vmatpush.msrb.mxu0 %v4211_v8 }
 0x98e   :  { %4358 = vmatpush.msra.mxu3 %v4211_v8  ;;  %4418 = vmatpush.msrb.mxu2 %v4211_v8 }
 0x98f   :  { %4277 = vmatpush.msrb.mxu1 %v4208_v1  ;;  %4242 = vmatpush.msrb.mxu0 %v4208_v1 }
 0x990   :  { %5339 = vmatmul.msk.f32.vlgmr.msrb.gmra.mxu1 %vm2615_vm3, %v5338_v61  ;;  %5337 = vmatmul.msk.f32.vlgmr.msrb.gmra.mxu0 %vm2615_vm3, %v4223_v59  ;;  %v4576_v61 = vld [vmem:[%s9210_s16 + $0x50] sm:$0xff]  ;;  %v4575_v59 = vld [vmem:[%s9210_s16 + $0x48] sm:$0xff] }
 0x991   :  { %4475 = vmatpush.msra.mxu0 %v4220_v6  ;;  %4359 = vmatpush.msra.mxu3 %v4208_v1  ;;  %v4577_v6 = vld [vmem:[%s9210_s16 + $0x58] sm:$0xff] }
 0x992   :  { %4419 = vmatpush.msrb.mxu2 %v4208_v1  ;;  %4384 = vmatpush.msra.mxu1 %v5363_v40  ;;  %v4573_v40 = vld [vmem:[%s9210_s16 + $0x38] sm:$0xff] }
 0x993   :  { %4476 = vmatpush.msra.mxu0 %v4217_v3  ;;  %v4578_v3 = vld [vmem:[%s9210_s16 + $0x60] sm:$0xff] }
 0x994   :  { %4385 = vmatpush.msra.mxu1 %v5362_v48  ;;  %v4572_v48 = vld [vmem:[%s9210_s16 + $0x30] sm:$0xff] }
 0x995   :  { %4477 = vmatpush.msra.mxu0 %v4214_v22  ;;  %v4579_v22 = vld [vmem:[%s9210_s16 + $0x68] sm:$0xff] }
 0x996   :  { %4386 = vmatpush.msra.mxu1 %v5361_v27  ;;  %v4571_v27 = vld [vmem:[%s9210_s16 + $0x28] sm:$0xff] }
 0x997   :  { %4478 = vmatpush.msra.mxu0 %v4211_v8  ;;  %v4580_v8 = vld [vmem:[%s9210_s16 + $0x70] sm:$0xff] }
 0x998   :  { %4387 = vmatpush.msra.mxu1 %v5360_v35  ;;  %v4566_v35 = vld [vmem:[%s9210_s16] sm:$0xff] }
 0x999   :  { %4479 = vmatpush.msra.mxu0 %v4208_v1  ;;  %v4526_v1 = vld [vmem:[%s9207_s14 + $0x8] sm:$0xff] }
 0x99a   :  { %5379 = vmatmul.msk.f32.vlgmr.msra.gmra.mxu0 %vm2615_vm3, %v5378_v39  ;;  %4388 = vmatpush.msra.mxu1 %v5359_v50  ;;  %v4574_v39 = vld [vmem:[%s9210_s16 + $0x40] sm:$0xff] }
 0x99b   :  { %4545 = vmatpush.msrb.mxu0 %v4540_v26 }
 0x99c   :  { %4389 = vmatpush.msra.mxu1 %v5358_v60 }
 0x99d   :  { %4546 = vmatpush.msrb.mxu0 %v4539_v62 }
 0x99e   :  { %4390 = vmatpush.msra.mxu1 %v5357_v58 }
 0x99f   :  { %4547 = vmatpush.msrb.mxu0 %v4538_v42 }
 0x9a0   :  { %4391 = vmatpush.msra.mxu1 %v5356_v56 }
 0x9a1   :  { %4548 = vmatpush.msrb.mxu0 %v4537_v14 }
 0x9a2   :  { %4392 = vmatpush.msra.mxu1 %v5355_v2 }
 0x9a3   :  { %4549 = vmatpush.msrb.mxu0 %v4536_v46 }
 0x9a4   :  { %4393 = vmatpush.msra.mxu1 %v5354_v5 }
 0x9a5   :  { %4550 = vmatpush.msrb.mxu0 %v4535_v53 }
 0x9a6   :  { %4586 = vmatpush.msrb.mxu1 %v4581_v33 }
 0x9a7   :  { %4551 = vmatpush.msrb.mxu0 %v4534_v63 }
 0x9a8   :  { %4587 = vmatpush.msrb.mxu1 %v4580_v8 }
 0x9a9   :  { %4552 = vmatpush.msrb.mxu0 %v4533_v49 }
 0x9aa   :  { %4588 = vmatpush.msrb.mxu1 %v4579_v22 }
 0x9ab   :  { %4553 = vmatpush.msrb.mxu0 %v4532_v45 }
 0x9ac   :  { %4589 = vmatpush.msrb.mxu1 %v4578_v3 }
 0x9ad   :  { %4554 = vmatpush.msrb.mxu0 %v4531_v37 }
 0x9ae   :  { %4590 = vmatpush.msrb.mxu1 %v4577_v6 }
 0x9af   :  { %4555 = vmatpush.msrb.mxu0 %v4530_v29 }
 0x9b0   :  { %4591 = vmatpush.msrb.mxu1 %v4576_v61 }
 0x9b1   :  { %4556 = vmatpush.msrb.mxu0 %v4529_v47 }
 0x9b2   :  { %4592 = vmatpush.msrb.mxu1 %v4575_v59 }
 0x9b3   :  { %4557 = vmatpush.msrb.mxu0 %v4528_v30 }
 0x9b4   :  { %4593 = vmatpush.msrb.mxu1 %v4574_v39 }
 0x9b5   :  { %4558 = vmatpush.msrb.mxu0 %v4527_v41 }
 0x9b6   :  { %4594 = vmatpush.msrb.mxu1 %v4573_v40 }
 0x9b7   :  { %4559 = vmatpush.msrb.mxu0 %v4526_v1 }
 0x9b8   :  { %4595 = vmatpush.msrb.mxu1 %v4572_v48 }
 0x9b9   :  { %4560 = vmatpush.msrb.mxu0 %v4525_v25 }
 0x9ba   :  { %4596 = vmatpush.msrb.mxu1 %v4571_v27 }
 0xa0d   :  { %v4279_v31 = vpop.f32.mrf.mxu1  ;;  %v4244_v20 = vpop.f32.mrf.mxu0 }
 0xa0e   :  { %5350 = vmatmul.msk.f32.vlgmr.msra.gmra.mxu2 %vm4175_vm10, %v4279_v31  ;;  %5351 = vmatmul.msk.f32.vlgmr.msrb.gmra.mxu3 %vm4175_vm10, %v4244_v20  ;;  %v4569_v20 = vld [vmem:[%s9210_s16 + $0x18] sm:$0xff] }
 0xa0f   :  { %4444 = vmatpush.msrb.mxu3 %v5376_v15  ;;  %4504 = vmatpush.msra.mxu2 %v5389_v38  ;;  %v4570_v38 = vld [vmem:[%s9210_s16 + $0x20] sm:$0xff] }
 0xa10   :  { %4597 = vmatpush.msrb.mxu1 %v4570_v38 }
 0xa11   :  { %4445 = vmatpush.msrb.mxu3 %v5375_v9  ;;  %4505 = vmatpush.msra.mxu2 %v5388_v19 }
 0xa12   :  { %4598 = vmatpush.msrb.mxu1 %v4569_v20 }
 0xa13   :  { %4446 = vmatpush.msrb.mxu3 %v5374_v7  ;;  %4506 = vmatpush.msra.mxu2 %v5387_v18  ;;  %v5395_v18 = vld [vmem:[%s9208_s13] ss:$0 sm:$0xff] }
 0xa15   :  { %4447 = vmatpush.msrb.mxu3 %v5373_v4  ;;  %4507 = vmatpush.msra.mxu2 %v5386_v28 }
 0xa16   :  { %5366 = vmatmul.msk.f32.vlgmr.msrb.gmra.mxu2 %vm2615_vm3, %v5365_v32  ;;  %5353 = vmatmul.msk.f32.vlgmr.msra.gmra.mxu3 %vm2615_vm3, %v5352_v43  ;;  %v4568_v43 = vld [vmem:[%s9210_s16 + $0x10] sm:$0xff] }
 0xa17   :  { %4448 = vmatpush.msrb.mxu3 %v5372_v55  ;;  %4508 = vmatpush.msra.mxu2 %v5385_v57  ;;  %v4481_v16 = vpop.f32.mrf.mxu0  ;;  %v4567_v55 = vld [vmem:[%s9210_s16 + $0x8] sm:$0xff] }
 0xa18   :  { %4599 = vmatpush.msrb.mxu1 %v4568_v43 }
 0xa19   :  { %4449 = vmatpush.msrb.mxu3 %v5371_v17  ;;  %4509 = vmatpush.msra.mxu2 %v5384_v54  ;;  %v5396_v17 = vld [vmem:[%s9209_s15] ss:$0 sm:$0xff] }
 0xa1a   :  { %4600 = vmatpush.msrb.mxu1 %v4567_v55  ;;  %v5397_v54 = vld [vmem:[%s9211_s17] ss:$0 sm:$0xff] }
 0xa1b   :  { %4450 = vmatpush.msrb.mxu3 %v5370_v44  ;;  %4510 = vmatpush.msra.mxu2 %v5383_v36 }
 0xa1c   :  { %4601 = vmatpush.msrb.mxu1 %v4566_v35 }
 0xa1d   :  { %4451 = vmatpush.msrb.mxu3 %v5369_v52  ;;  %4511 = vmatpush.msra.mxu2 %v5382_v10 }
 0xa1f   :  { %4452 = vmatpush.msrb.mxu3 %v5368_v51  ;;  %4512 = vmatpush.msra.mxu2 %v5381_v11 }
 0xa21   :  { %4453 = vmatpush.msrb.mxu3 %v5367_v13  ;;  %4513 = vmatpush.msra.mxu2 %v5380_v12 }
 0xa22   :  { %5390 = vmatmul.msk.f32.vlgmr.msra.gmra.mxu2 %vm4175_vm10, %v4481_v16 }
 0xa91   :  { %v4313_v34 = vpop.f32.mrf.mxu2  ;;  %v4336_v0 = vpop.f32.mrf.mxu3 }
 0xa92   :  { %v4337_v24 = vadd.f32 %v4336_v0, %v4313_v34 }
 0xa99   :  { %v4421_v23 = vpop.f32.mrf.mxu2  ;;  %v4361_v21 = vpop.f32.mrf.mxu3 }
 0xa9a   :  { %5377 = vmatmul.msk.f32.vlgmr.msrb.gmra.mxu3 %vm4175_vm10, %v4421_v23  ;;  %5364 = vmatmul.msk.f32.vlgmr.msra.gmra.mxu1 %vm4175_vm10, %v4361_v21 }
 0xaa5   :  { %v4515_v19 = vpop.f32.mrf.mxu2 }
 0xb17   :  { %v4395_v15 = vpop.f32.mrf.mxu1 }
 0xb18   :  { %v4398_v31 = vadd.f32 %v4395_v15, %v4337_v24 }
 0xb1d   :  { %v4455_v9 = vpop.f32.mrf.mxu3 }
 0xb1e   :  { %v4458_v7 = vadd.f32 %v4455_v9, %v4398_v31 }
 0xb20   :  { %v4518_v4 = vadd.f32 %v4515_v19, %v4458_v7 }
 0xb22   :  { %v4523_v28 = vadd.f32 %v5395_v18, %v4518_v4 }
 0xb24   :  { %v4524_v32 = vmax.f32 %v4523_v28, 0.0 }
 0xb26   :  { %4561 = vmatmul.f32.vlgmr.msrb.gmra.mxu0 %v4524_v32 }
 0xba3   :  { %v4562_v57 = vpop.f32.mrf.mxu0 }
 0xba4   :  { %v4563_v50 = vadd.f32 %v5396_v17, %v4562_v57 }
 0xba6   :  { %v4565_v44 = vmax.f32 %v4563_v50, 0.0 }
 0xba8   :  { %4602 = vmatmul.f32.vlgmr.msrb.gmra.mxu1 %v4565_v44 }
 0xc25   :  { %v4603_v60 = vpop.f32.mrf.mxu1 }
 0xc26   :  { %v4604_v52 = vadd.f32 %v5397_v54, %v4603_v60 }
 0xc28   :  { %4607 = vst.msk [vmem:[%s9212_s18] sm:$0xff] %vm4606_vm11, %v4604_v52 }

</bundles_post_ra>
